<compile_context>
chip_gen: v6e
topology: v6e:2x2x1
jax: 0.10.0
libtpu: 0.0.40
codegen_flags: <defaults>
</compile_context>

<pallas_src>
import functools

import jax
import jax.numpy as jnp
from jax.experimental import pallas as pl
from jax.experimental.pallas import tpu as pltpu

EPS = 1e-5
LANES = 128
SUBLANES = 8


def _round_up(n, m):
    return (n + m - 1) // m * m


def _elementwise_dtype():
    """bf16 elementwise path on v6e/v7x (bf16 EUP/VPU); f32 on v5e/others."""
    try:
        kind = jax.devices()[0].device_kind.lower()
    except Exception:
        return jnp.float32
    if "v6" in kind or "v7" in kind:
        return jnp.bfloat16
    return jnp.float32


def _fused_fastkan_kernel(*refs, layer_dins, grid_scaled, inv_denom, ew_dtype):
    """refs = [x, (gamma, beta, fused_w, bias) * L, out]."""
    x_ref = refs[0]
    out_ref = refs[-1]
    layer_refs = refs[1:-1]
    num_layers = len(layer_dins)

    x = x_ref[...].astype(jnp.float32)                        # (TB, Din0_pad)
    for layer in range(num_layers):
        gamma_ref, beta_ref, w_ref, b_ref = layer_refs[4 * layer: 4 * layer + 4]

        # LayerNorm, single-pass stats. Padded feature columns are zero and
        # the divisor is the *real* Din, so the stats are unaffected by the
        # lane padding. gamma/beta are zero in the padded columns -> y_pad = 0.
        inv_n = 1.0 / float(layer_dins[layer])
        s1 = jnp.sum(x, axis=-1, keepdims=True)
        s2 = jnp.sum(x * x, axis=-1, keepdims=True)
        mean = s1 * inv_n
        var = jnp.maximum(s2 * inv_n - mean * mean, 0.0)
        y = (x - mean) * jax.lax.rsqrt(var + EPS)
        y = y * gamma_ref[...] + beta_ref[...]                 # (TB, Din_pad)

        # RBF basis + SiLU(x), built directly lane-packed as the single MXU
        # K operand: [basis(g=0) ... basis(g=G-1), silu(x)].
        #   basis_g[:, d] = exp(-((y[:, d] - grid[g]) / denom)^2)
        # grid_scaled[g] = grid[g]/denom (scalar constant), 1/denom hoisted
        # into one scale of y -> only sub/square/neg/exp per basis element.
        y_s = (y * inv_denom).astype(ew_dtype)
        x_e = x.astype(ew_dtype)
        pieces = [jnp.exp(-jnp.square(y_s - g)) for g in grid_scaled]
        pieces.append(x_e * jax.nn.sigmoid(x_e))               # SiLU base path
        k_op = jnp.concatenate(pieces, axis=-1).astype(jnp.bfloat16)

        # Single fused (spline + base) matmul: K = (G+1)*Din_pad, bf16
        # operands, f32 accumulation; bias folded into the add.
        x = jnp.dot(k_op, w_ref[...],
                    preferred_element_type=jnp.float32) + b_ref[...]

    out_ref[...] = x.astype(out_ref.dtype)                     # lane-dense store


def fastkan_forward(x, kparams, meta, *, batch_tile=256, weight_buffer_count=1):
    """Fused multi-layer FastKAN forward. x: (B, Din0) -> (B, Dout_last)."""
    B, d0 = x.shape
    din0_pad = meta["din0_pad"]
    dout_last = meta["dout_last"]
    dout_last_pad = meta["dout_last_pad"]

    # Pad the feature dim to a lane-dense width (zeros; stats corrected inside).
    x = x.astype(jnp.float32)
    if d0 != din0_pad:
        x = jnp.pad(x, ((0, 0), (0, din0_pad - d0)))

    # Batch tiling: never collapse to tb = B; pad the batch to a tile multiple
    # instead (padded rows are finite garbage, sliced off afterwards).
    tb = min(batch_tile, _round_up(B, SUBLANES))
    b_pad = _round_up(B, tb)
    if b_pad != B:
        x = jnp.pad(x, ((0, b_pad - B), (0, 0)))
    grid = (b_pad // tb,)

    def _const_idx(i):
        return (0, 0)

    in_specs = [pl.BlockSpec((tb, din0_pad), lambda i: (i, 0))]
    args = [x]
    weight_bytes = 0
    for p in kparams:
        for name in ("gamma", "beta", "w", "b"):
            a = p[name]
            weight_bytes += int(a.size) * a.dtype.itemsize
            if weight_buffer_count is None:
                spec = pl.BlockSpec(a.shape, _const_idx)
            else:
                # Constant index_map + single buffering: weights stay
                # VMEM-resident across batch tiles with no 2x multiplier.
                spec = pl.BlockSpec(a.shape, _const_idx,
                                    pipeline_mode=pl.Buffered(weight_buffer_count))
            in_specs.append(spec)
            args.append(a)

    # VMEM budget: resident weights x buffer count + a few tile-sized slabs.
    kdim_max = max(p["w"].shape[0] for p in kparams)
    act_bytes = tb * kdim_max * 4 * 3
    wbuf = 2 if weight_buffer_count is None else int(weight_buffer_count)
    needed = weight_bytes * wbuf + 2 * act_bytes + (4 << 20)
    vmem_limit = int(min(max(needed, 32 << 20), 64 << 20))   # v7x-safe ceiling

    flops = 2 * b_pad * sum(p["w"].shape[0] * p["w"].shape[1] for p in kparams)
    transcendentals = b_pad * sum(p["w"].shape[0] for p in kparams)
    bytes_accessed = int(x.size) * 4 + weight_bytes + b_pad * dout_last_pad * 4

    kernel = functools.partial(
        _fused_fastkan_kernel,
        layer_dins=meta["layer_dins"],
        grid_scaled=meta["grid_scaled"],
        inv_denom=meta["inv_denom"],
        ew_dtype=meta["ew_dtype"])

    out_padded = pl.pallas_call(
        kernel,
        out_shape=jax.ShapeDtypeStruct((b_pad, dout_last_pad), jnp.float32),
        grid_spec=pltpu.PrefetchScalarGridSpec(
            num_scalar_prefetch=0,
            grid=grid,
            in_specs=in_specs,
            out_specs=pl.BlockSpec((tb, dout_last_pad), lambda i: (i, 0)),
        ),
        compiler_params=pltpu.CompilerParams(
            dimension_semantics=("parallel",),
            vmem_limit_bytes=vmem_limit),
        cost_estimate=pl.CostEstimate(
            flops=int(flops),
            transcendentals=int(transcendentals),
            bytes_accessed=int(bytes_accessed)),
    )(*args)

    return out_padded[:B, :dout_last]


def init_fastkan_params(key, layers_hidden, grid_min=-2.0, grid_max=2.0,
                        num_grids=8, spline_weight_init_scale=0.1):
    """Logical (PyTorch-shaped) parameters, f32."""
    grid_vals = jnp.linspace(grid_min, grid_max, num_grids)
    denom = (grid_max - grid_min) / (num_grids - 1)
    params = []
    for din, dout in zip(layers_hidden[:-1], layers_hidden[1:]):
        key, k1, k2, k3 = jax.random.split(key, 4)
        gamma = jnp.ones((din,), jnp.float32)
        beta = jnp.zeros((din,), jnp.float32)
        # SplineLinear: trunc_normal(std=init_scale), weight shape (Dout, Din*G)
        spline_w = (spline_weight_init_scale *
                    jax.random.truncated_normal(k1, -2.0, 2.0,
                                                (dout, din * num_grids),
                                                jnp.float32))
        # base_linear: nn.Linear default-style uniform init
        bound = 1.0 / float(din) ** 0.5
        base_w = jax.random.uniform(k2, (dout, din), jnp.float32, -bound, bound)
        base_b = jax.random.uniform(k3, (dout,), jnp.float32, -bound, bound)
        params.append(dict(gamma=gamma, beta=beta, spline_w=spline_w,
                           base_w=base_w, base_b=base_b, din=din, dout=dout))
    return params, grid_vals, denom


def prepare_kernel_params(params, grid_vals, denom, ew_dtype=None):
    """Host-side re-layout: reorder/pad/stack weights for the fused kernel."""
    num_grids = int(grid_vals.shape[0])
    inv_denom = 1.0 / float(denom)
    grid_scaled = tuple(float(g) * inv_denom for g in grid_vals)
    if ew_dtype is None:
        ew_dtype = _elementwise_dtype()

    kparams = []
    layer_dins = []
    for p in params:
        din, dout = p["din"], p["dout"]
        din_pad = _round_up(din, LANES)
        dout_pad = _round_up(dout, LANES)
        layer_dins.append(din)

        # torch flattens the basis d-major/g-minor (index d*G+g); reorder the
        # (Dout, Din*G) spline weight to g-major/d-minor, pad Din/Dout to lane
        # multiples with zero rows/cols, flatten K.
        sw = jnp.transpose(p["spline_w"].reshape(dout, din, num_grids), (2, 1, 0))
        sw_p = jnp.zeros((num_grids, din_pad, dout_pad), jnp.float32)
        sw_p = sw_p.at[:, :din, :dout].set(sw)
        sw_p = sw_p.reshape(num_grids * din_pad, dout_pad)

        bw_p = jnp.zeros((din_pad, dout_pad), jnp.float32)
        bw_p = bw_p.at[:din, :dout].set(p["base_w"].T)

        # Fused MXU weight: [spline blocks (g-major) ; base block].
        w = jnp.concatenate([sw_p, bw_p], axis=0).astype(jnp.bfloat16)

        b = jnp.zeros((1, dout_pad), jnp.float32).at[:, :dout].set(
            p["base_b"].reshape(1, dout))
        gamma = jnp.zeros((1, din_pad), jnp.float32).at[:, :din].set(
            p["gamma"].reshape(1, din))
        beta = jnp.zeros((1, din_pad), jnp.float32).at[:, :din].set(
            p["beta"].reshape(1, din))

        kparams.append(dict(gamma=gamma, beta=beta, w=w, b=b))

    meta = dict(
        grid_scaled=grid_scaled,
        inv_denom=inv_denom,
        layer_dins=tuple(layer_dins),
        din0_pad=_round_up(params[0]["din"], LANES),
        dout_last=int(params[-1]["dout"]),
        dout_last_pad=_round_up(params[-1]["dout"], LANES),
        ew_dtype=ew_dtype,
    )
    return kparams, meta


def fastkan_reference(x, params, grid_vals, denom):
    """Pure-JAX f32 reference mirroring the PyTorch forward."""
    for p in params:
        mean = jnp.mean(x, axis=-1, keepdims=True)
        var = jnp.mean(jnp.square(x - mean), axis=-1, keepdims=True)
        y = (x - mean) / jnp.sqrt(var + EPS) * p["gamma"] + p["beta"]
        basis = jnp.exp(-jnp.square((y[..., None] - grid_vals) / denom))  # (B,Din,G)
        ret = basis.reshape(basis.shape[0], -1) @ p["spline_w"].T          # d-major
        base = (x * jax.nn.sigmoid(x)) @ p["base_w"].T + p["base_b"]
        x = ret + base
    return x


if __name__ == "__main__":
    # FastKAN-head-style sizes consistent with the module: features -> hidden -> classes.
    layers_hidden = [32, 64, 16]
    batch = 64

    key = jax.random.PRNGKey(0)
    key, xk = jax.random.split(key)
    x = jax.random.normal(xk, (batch, layers_hidden[0]), jnp.float32)

    params, grid_vals, denom = init_fastkan_params(key, layers_hidden)
    kparams, meta = prepare_kernel_params(params, grid_vals, denom)

    try:
        out = jax.block_until_ready(
            fastkan_forward(x, kparams, meta, batch_tile=32, weight_buffer_count=1))
    except Exception:
        # Fallback: default (double-buffered) weight pipelining if single
        # buffering is not supported by the installed Pallas version.
        out = jax.block_until_ready(
            fastkan_forward(x, kparams, meta, batch_tile=32, weight_buffer_count=None))

    ref = fastkan_reference(x, params, grid_vals, denom)
    assert out.shape == (batch, layers_hidden[-1])
    # bf16 MXU operands (and bf16 basis on v6e/v7x) with f32 accumulation
    # -> loosened tolerance vs the f32 reference.
    max_err = float(jnp.max(jnp.abs(out - ref)))
    scale = float(jnp.max(jnp.abs(ref)))
    assert max_err <= 6e-2 * max(scale, 1.0), (max_err, scale)

    print("KERNEL_OK")
</pallas_src>

<mosaic_0001>
module attributes {stable_mosaic.version = 11 : i64} {
  func.func @_fused_fastkan_kernel(%arg0: i32, %arg1: memref<32x128xf32, #tpu.memory_space<vmem>>, %arg2: memref<1x128xf32, #tpu.memory_space<vmem>>, %arg3: memref<1x128xf32, #tpu.memory_space<vmem>>, %arg4: memref<1152x128xbf16, #tpu.memory_space<vmem>>, %arg5: memref<1x128xf32, #tpu.memory_space<vmem>>, %arg6: memref<1x128xf32, #tpu.memory_space<vmem>>, %arg7: memref<1x128xf32, #tpu.memory_space<vmem>>, %arg8: memref<1152x128xbf16, #tpu.memory_space<vmem>>, %arg9: memref<1x128xf32, #tpu.memory_space<vmem>>, %arg10: memref<32x128xf32, #tpu.memory_space<vmem>>) attributes {dimension_semantics = [#tpu.dimension_semantics<parallel>], iteration_bounds = array<i64: 2>, scalar_prefetch = 0 : i64, scratch_operands = 0 : i64, tpu.core_type = #tpu.core_type<tc>, window_params = [{transform_indices = @transform_0, window_bounds = array<i64: 32, 128>}, {pipeline_mode = #tpu.pipeline_mode<synchronous>, transform_indices = @transform_1, window_bounds = array<i64: 1, 128>}, {pipeline_mode = #tpu.pipeline_mode<synchronous>, transform_indices = @transform_2, window_bounds = array<i64: 1, 128>}, {pipeline_mode = #tpu.pipeline_mode<synchronous>, transform_indices = @transform_3, window_bounds = array<i64: 1152, 128>}, {pipeline_mode = #tpu.pipeline_mode<synchronous>, transform_indices = @transform_4, window_bounds = array<i64: 1, 128>}, {pipeline_mode = #tpu.pipeline_mode<synchronous>, transform_indices = @transform_5, window_bounds = array<i64: 1, 128>}, {pipeline_mode = #tpu.pipeline_mode<synchronous>, transform_indices = @transform_6, window_bounds = array<i64: 1, 128>}, {pipeline_mode = #tpu.pipeline_mode<synchronous>, transform_indices = @transform_7, window_bounds = array<i64: 1152, 128>}, {pipeline_mode = #tpu.pipeline_mode<synchronous>, transform_indices = @transform_8, window_bounds = array<i64: 1, 128>}, {transform_indices = @transform_9, window_bounds = array<i64: 32, 128>}]} {
    %c0 = arith.constant 0 : index
    %c0_0 = arith.constant 0 : index
    %0 = vector.load %arg1[%c0, %c0_0] : memref<32x128xf32, #tpu.memory_space<vmem>>, vector<32x128xf32>
    %cst = arith.constant dense<0.000000e+00> : vector<32xf32>
    %1 = vector.multi_reduction <add>, %0, %cst [1] : vector<32x128xf32> to vector<32xf32>
    %2 = vector.shape_cast %1 : vector<32xf32> to vector<32x1xf32>
    %3 = arith.mulf %0, %0 : vector<32x128xf32>
    %cst_1 = arith.constant dense<0.000000e+00> : vector<32xf32>
    %4 = vector.multi_reduction <add>, %3, %cst_1 [1] : vector<32x128xf32> to vector<32xf32>
    %5 = vector.shape_cast %4 : vector<32xf32> to vector<32x1xf32>
    %cst_2 = arith.constant 3.125000e-02 : f32
    %6 = vector.broadcast %cst_2 : f32 to vector<32x1xf32>
    %7 = arith.mulf %2, %6 : vector<32x1xf32>
    %cst_3 = arith.constant 3.125000e-02 : f32
    %8 = vector.broadcast %cst_3 : f32 to vector<32x1xf32>
    %9 = arith.mulf %5, %8 : vector<32x1xf32>
    %10 = arith.mulf %7, %7 : vector<32x1xf32>
    %11 = arith.subf %9, %10 : vector<32x1xf32>
    %cst_4 = arith.constant 0.000000e+00 : f32
    %12 = vector.broadcast %cst_4 : f32 to vector<32x1xf32>
    %13 = arith.maximumf %11, %12 : vector<32x1xf32>
    %14 = vector.broadcast %7 : vector<32x1xf32> to vector<32x128xf32>
    %15 = arith.subf %0, %14 : vector<32x128xf32>
    %cst_5 = arith.constant 9.99999974E-6 : f32
    %16 = vector.broadcast %cst_5 : f32 to vector<32x1xf32>
    %17 = arith.addf %13, %16 : vector<32x1xf32>
    %18 = math.rsqrt %17 : vector<32x1xf32>
    %19 = vector.broadcast %18 : vector<32x1xf32> to vector<32x128xf32>
    %20 = arith.mulf %15, %19 : vector<32x128xf32>
    %c0_6 = arith.constant 0 : index
    %c0_7 = arith.constant 0 : index
    %21 = vector.load %arg2[%c0_6, %c0_7] : memref<1x128xf32, #tpu.memory_space<vmem>>, vector<1x128xf32>
    %22 = vector.broadcast %21 : vector<1x128xf32> to vector<32x128xf32>
    %23 = arith.mulf %20, %22 : vector<32x128xf32>
    %c0_8 = arith.constant 0 : index
    %c0_9 = arith.constant 0 : index
    %24 = vector.load %arg3[%c0_8, %c0_9] : memref<1x128xf32, #tpu.memory_space<vmem>>, vector<1x128xf32>
    %25 = vector.broadcast %24 : vector<1x128xf32> to vector<32x128xf32>
    %26 = arith.addf %23, %25 : vector<32x128xf32>
    %cst_10 = arith.constant 1.750000e+00 : f32
    %27 = vector.broadcast %cst_10 : f32 to vector<32x128xf32>
    %28 = arith.mulf %26, %27 : vector<32x128xf32>
    %cst_11 = arith.constant -3.500000e+00 : f32
    %29 = vector.broadcast %cst_11 : f32 to vector<32x128xf32>
    %30 = arith.subf %28, %29 : vector<32x128xf32>
    %31 = arith.mulf %30, %30 : vector<32x128xf32>
    %cst_12 = arith.constant 0.000000e+00 : f32
    %32 = vector.broadcast %cst_12 : f32 to vector<32x128xf32>
    %33 = arith.subf %32, %31 : vector<32x128xf32>
    %34 = math.exp %33 : vector<32x128xf32>
    %cst_13 = arith.constant -2.500000e+00 : f32
    %35 = vector.broadcast %cst_13 : f32 to vector<32x128xf32>
    %36 = arith.subf %28, %35 : vector<32x128xf32>
    %37 = arith.mulf %36, %36 : vector<32x128xf32>
    %cst_14 = arith.constant 0.000000e+00 : f32
    %38 = vector.broadcast %cst_14 : f32 to vector<32x128xf32>
    %39 = arith.subf %38, %37 : vector<32x128xf32>
    %40 = math.exp %39 : vector<32x128xf32>
    %cst_15 = arith.constant -1.500000e+00 : f32
    %41 = vector.broadcast %cst_15 : f32 to vector<32x128xf32>
    %42 = arith.subf %28, %41 : vector<32x128xf32>
    %43 = arith.mulf %42, %42 : vector<32x128xf32>
    %cst_16 = arith.constant 0.000000e+00 : f32
    %44 = vector.broadcast %cst_16 : f32 to vector<32x128xf32>
    %45 = arith.subf %44, %43 : vector<32x128xf32>
    %46 = math.exp %45 : vector<32x128xf32>
    %cst_17 = arith.constant -0.499999821 : f32
    %47 = vector.broadcast %cst_17 : f32 to vector<32x128xf32>
    %48 = arith.subf %28, %47 : vector<32x128xf32>
    %49 = arith.mulf %48, %48 : vector<32x128xf32>
    %cst_18 = arith.constant 0.000000e+00 : f32
    %50 = vector.broadcast %cst_18 : f32 to vector<32x128xf32>
    %51 = arith.subf %50, %49 : vector<32x128xf32>
    %52 = math.exp %51 : vector<32x128xf32>
    %cst_19 = arith.constant 0.500000179 : f32
    %53 = vector.broadcast %cst_19 : f32 to vector<32x128xf32>
    %54 = arith.subf %28, %53 : vector<32x128xf32>
    %55 = arith.mulf %54, %54 : vector<32x128xf32>
    %cst_20 = arith.constant 0.000000e+00 : f32
    %56 = vector.broadcast %cst_20 : f32 to vector<32x128xf32>
    %57 = arith.subf %56, %55 : vector<32x128xf32>
    %58 = math.exp %57 : vector<32x128xf32>
    %cst_21 = arith.constant 1.50000012 : f32
    %59 = vector.broadcast %cst_21 : f32 to vector<32x128xf32>
    %60 = arith.subf %28, %59 : vector<32x128xf32>
    %61 = arith.mulf %60, %60 : vector<32x128xf32>
    %cst_22 = arith.constant 0.000000e+00 : f32
    %62 = vector.broadcast %cst_22 : f32 to vector<32x128xf32>
    %63 = arith.subf %62, %61 : vector<32x128xf32>
    %64 = math.exp %63 : vector<32x128xf32>
    %cst_23 = arith.constant 2.50000048 : f32
    %65 = vector.broadcast %cst_23 : f32 to vector<32x128xf32>
    %66 = arith.subf %28, %65 : vector<32x128xf32>
    %67 = arith.mulf %66, %66 : vector<32x128xf32>
    %cst_24 = arith.constant 0.000000e+00 : f32
    %68 = vector.broadcast %cst_24 : f32 to vector<32x128xf32>
    %69 = arith.subf %68, %67 : vector<32x128xf32>
    %70 = math.exp %69 : vector<32x128xf32>
    %cst_25 = arith.constant 3.500000e+00 : f32
    %71 = vector.broadcast %cst_25 : f32 to vector<32x128xf32>
    %72 = arith.subf %28, %71 : vector<32x128xf32>
    %73 = arith.mulf %72, %72 : vector<32x128xf32>
    %cst_26 = arith.constant 0.000000e+00 : f32
    %74 = vector.broadcast %cst_26 : f32 to vector<32x128xf32>
    %75 = arith.subf %74, %73 : vector<32x128xf32>
    %76 = math.exp %75 : vector<32x128xf32>
    %77 = arith.negf %0 : vector<32x128xf32>
    %78 = math.exp %77 : vector<32x128xf32>
    %cst_27 = arith.constant 1.000000e+00 : f32
    %79 = vector.broadcast %cst_27 : f32 to vector<32x128xf32>
    %80 = arith.addf %79, %78 : vector<32x128xf32>
    %81 = arith.divf %79, %80 : vector<32x128xf32>
    %82 = arith.mulf %0, %81 : vector<32x128xf32>
    %83 = tpu.concatenate %34, %40, %46, %52, %58, %64, %70, %76, %82 in 1 : vector<32x128xf32>, vector<32x128xf32>, vector<32x128xf32>, vector<32x128xf32>, vector<32x128xf32>, vector<32x128xf32>, vector<32x128xf32>, vector<32x128xf32>, vector<32x128xf32> -> vector<32x1152xf32>
    %84 = arith.truncf %83 : vector<32x1152xf32> to vector<32x1152xbf16>
    %c0_28 = arith.constant 0 : index
    %c0_29 = arith.constant 0 : index
    %85 = vector.load %arg4[%c0_28, %c0_29] : memref<1152x128xbf16, #tpu.memory_space<vmem>>, vector<1152x128xbf16>
    %cst_30 = arith.constant dense<0.000000e+00> : vector<32x128xf32>
    %86 = tpu.matmul %84, %85, %cst_30 {dimension_numbers = #tpu.dot_dimension_numbers<[1], [0], [0], [1], [0, 0, 1, 1], [], []>} : vector<32x1152xbf16>, vector<1152x128xbf16>, vector<32x128xf32> -> vector<32x128xf32>
    %c0_31 = arith.constant 0 : index
    %c0_32 = arith.constant 0 : index
    %87 = vector.load %arg5[%c0_31, %c0_32] : memref<1x128xf32, #tpu.memory_space<vmem>>, vector<1x128xf32>
    %88 = vector.broadcast %87 : vector<1x128xf32> to vector<32x128xf32>
    %89 = arith.addf %86, %88 : vector<32x128xf32>
    %cst_33 = arith.constant dense<0.000000e+00> : vector<32xf32>
    %90 = vector.multi_reduction <add>, %89, %cst_33 [1] : vector<32x128xf32> to vector<32xf32>
    %91 = vector.shape_cast %90 : vector<32xf32> to vector<32x1xf32>
    %92 = arith.mulf %89, %89 : vector<32x128xf32>
    %cst_34 = arith.constant dense<0.000000e+00> : vector<32xf32>
    %93 = vector.multi_reduction <add>, %92, %cst_34 [1] : vector<32x128xf32> to vector<32xf32>
    %94 = vector.shape_cast %93 : vector<32xf32> to vector<32x1xf32>
    %cst_35 = arith.constant 1.562500e-02 : f32
    %95 = vector.broadcast %cst_35 : f32 to vector<32x1xf32>
    %96 = arith.mulf %91, %95 : vector<32x1xf32>
    %cst_36 = arith.constant 1.562500e-02 : f32
    %97 = vector.broadcast %cst_36 : f32 to vector<32x1xf32>
    %98 = arith.mulf %94, %97 : vector<32x1xf32>
    %99 = arith.mulf %96, %96 : vector<32x1xf32>
    %100 = arith.subf %98, %99 : vector<32x1xf32>
    %cst_37 = arith.constant 0.000000e+00 : f32
    %101 = vector.broadcast %cst_37 : f32 to vector<32x1xf32>
    %102 = arith.maximumf %100, %101 : vector<32x1xf32>
    %103 = vector.broadcast %96 : vector<32x1xf32> to vector<32x128xf32>
    %104 = arith.subf %89, %103 : vector<32x128xf32>
    %cst_38 = arith.constant 9.99999974E-6 : f32
    %105 = vector.broadcast %cst_38 : f32 to vector<32x1xf32>
    %106 = arith.addf %102, %105 : vector<32x1xf32>
    %107 = math.rsqrt %106 : vector<32x1xf32>
    %108 = vector.broadcast %107 : vector<32x1xf32> to vector<32x128xf32>
    %109 = arith.mulf %104, %108 : vector<32x128xf32>
    %c0_39 = arith.constant 0 : index
    %c0_40 = arith.constant 0 : index
    %110 = vector.load %arg6[%c0_39, %c0_40] : memref<1x128xf32, #tpu.memory_space<vmem>>, vector<1x128xf32>
    %111 = vector.broadcast %110 : vector<1x128xf32> to vector<32x128xf32>
    %112 = arith.mulf %109, %111 : vector<32x128xf32>
    %c0_41 = arith.constant 0 : index
    %c0_42 = arith.constant 0 : index
    %113 = vector.load %arg7[%c0_41, %c0_42] : memref<1x128xf32, #tpu.memory_space<vmem>>, vector<1x128xf32>
    %114 = vector.broadcast %113 : vector<1x128xf32> to vector<32x128xf32>
    %115 = arith.addf %112, %114 : vector<32x128xf32>
    %cst_43 = arith.constant 1.750000e+00 : f32
    %116 = vector.broadcast %cst_43 : f32 to vector<32x128xf32>
    %117 = arith.mulf %115, %116 : vector<32x128xf32>
    %cst_44 = arith.constant -3.500000e+00 : f32
    %118 = vector.broadcast %cst_44 : f32 to vector<32x128xf32>
    %119 = arith.subf %117, %118 : vector<32x128xf32>
    %120 = arith.mulf %119, %119 : vector<32x128xf32>
    %cst_45 = arith.constant 0.000000e+00 : f32
    %121 = vector.broadcast %cst_45 : f32 to vector<32x128xf32>
    %122 = arith.subf %121, %120 : vector<32x128xf32>
    %123 = math.exp %122 : vector<32x128xf32>
    %cst_46 = arith.constant -2.500000e+00 : f32
    %124 = vector.broadcast %cst_46 : f32 to vector<32x128xf32>
    %125 = arith.subf %117, %124 : vector<32x128xf32>
    %126 = arith.mulf %125, %125 : vector<32x128xf32>
    %cst_47 = arith.constant 0.000000e+00 : f32
    %127 = vector.broadcast %cst_47 : f32 to vector<32x128xf32>
    %128 = arith.subf %127, %126 : vector<32x128xf32>
    %129 = math.exp %128 : vector<32x128xf32>
    %cst_48 = arith.constant -1.500000e+00 : f32
    %130 = vector.broadcast %cst_48 : f32 to vector<32x128xf32>
    %131 = arith.subf %117, %130 : vector<32x128xf32>
    %132 = arith.mulf %131, %131 : vector<32x128xf32>
    %cst_49 = arith.constant 0.000000e+00 : f32
    %133 = vector.broadcast %cst_49 : f32 to vector<32x128xf32>
    %134 = arith.subf %133, %132 : vector<32x128xf32>
    %135 = math.exp %134 : vector<32x128xf32>
    %cst_50 = arith.constant -0.499999821 : f32
    %136 = vector.broadcast %cst_50 : f32 to vector<32x128xf32>
    %137 = arith.subf %117, %136 : vector<32x128xf32>
    %138 = arith.mulf %137, %137 : vector<32x128xf32>
    %cst_51 = arith.constant 0.000000e+00 : f32
    %139 = vector.broadcast %cst_51 : f32 to vector<32x128xf32>
    %140 = arith.subf %139, %138 : vector<32x128xf32>
    %141 = math.exp %140 : vector<32x128xf32>
    %cst_52 = arith.constant 0.500000179 : f32
    %142 = vector.broadcast %cst_52 : f32 to vector<32x128xf32>
    %143 = arith.subf %117, %142 : vector<32x128xf32>
    %144 = arith.mulf %143, %143 : vector<32x128xf32>
    %cst_53 = arith.constant 0.000000e+00 : f32
    %145 = vector.broadcast %cst_53 : f32 to vector<32x128xf32>
    %146 = arith.subf %145, %144 : vector<32x128xf32>
    %147 = math.exp %146 : vector<32x128xf32>
    %cst_54 = arith.constant 1.50000012 : f32
    %148 = vector.broadcast %cst_54 : f32 to vector<32x128xf32>
    %149 = arith.subf %117, %148 : vector<32x128xf32>
    %150 = arith.mulf %149, %149 : vector<32x128xf32>
    %cst_55 = arith.constant 0.000000e+00 : f32
    %151 = vector.broadcast %cst_55 : f32 to vector<32x128xf32>
    %152 = arith.subf %151, %150 : vector<32x128xf32>
    %153 = math.exp %152 : vector<32x128xf32>
    %cst_56 = arith.constant 2.50000048 : f32
    %154 = vector.broadcast %cst_56 : f32 to vector<32x128xf32>
    %155 = arith.subf %117, %154 : vector<32x128xf32>
    %156 = arith.mulf %155, %155 : vector<32x128xf32>
    %cst_57 = arith.constant 0.000000e+00 : f32
    %157 = vector.broadcast %cst_57 : f32 to vector<32x128xf32>
    %158 = arith.subf %157, %156 : vector<32x128xf32>
    %159 = math.exp %158 : vector<32x128xf32>
    %cst_58 = arith.constant 3.500000e+00 : f32
    %160 = vector.broadcast %cst_58 : f32 to vector<32x128xf32>
    %161 = arith.subf %117, %160 : vector<32x128xf32>
    %162 = arith.mulf %161, %161 : vector<32x128xf32>
    %cst_59 = arith.constant 0.000000e+00 : f32
    %163 = vector.broadcast %cst_59 : f32 to vector<32x128xf32>
    %164 = arith.subf %163, %162 : vector<32x128xf32>
    %165 = math.exp %164 : vector<32x128xf32>
    %166 = arith.negf %89 : vector<32x128xf32>
    %167 = math.exp %166 : vector<32x128xf32>
    %cst_60 = arith.constant 1.000000e+00 : f32
    %168 = vector.broadcast %cst_60 : f32 to vector<32x128xf32>
    %169 = arith.addf %168, %167 : vector<32x128xf32>
    %170 = arith.divf %168, %169 : vector<32x128xf32>
    %171 = arith.mulf %89, %170 : vector<32x128xf32>
    %172 = tpu.concatenate %123, %129, %135, %141, %147, %153, %159, %165, %171 in 1 : vector<32x128xf32>, vector<32x128xf32>, vector<32x128xf32>, vector<32x128xf32>, vector<32x128xf32>, vector<32x128xf32>, vector<32x128xf32>, vector<32x128xf32>, vector<32x128xf32> -> vector<32x1152xf32>
    %173 = arith.truncf %172 : vector<32x1152xf32> to vector<32x1152xbf16>
    %c0_61 = arith.constant 0 : index
    %c0_62 = arith.constant 0 : index
    %174 = vector.load %arg8[%c0_61, %c0_62] : memref<1152x128xbf16, #tpu.memory_space<vmem>>, vector<1152x128xbf16>
    %cst_63 = arith.constant dense<0.000000e+00> : vector<32x128xf32>
    %175 = tpu.matmul %173, %174, %cst_63 {dimension_numbers = #tpu.dot_dimension_numbers<[1], [0], [0], [1], [0, 0, 1, 1], [], []>} : vector<32x1152xbf16>, vector<1152x128xbf16>, vector<32x128xf32> -> vector<32x128xf32>
    %c0_64 = arith.constant 0 : index
    %c0_65 = arith.constant 0 : index
    %176 = vector.load %arg9[%c0_64, %c0_65] : memref<1x128xf32, #tpu.memory_space<vmem>>, vector<1x128xf32>
    %177 = vector.broadcast %176 : vector<1x128xf32> to vector<32x128xf32>
    %178 = arith.addf %175, %177 : vector<32x128xf32>
    %c0_66 = arith.constant 0 : index
    %c0_67 = arith.constant 0 : index
    %179 = vector.load %arg10[%c0_66, %c0_67] : memref<32x128xf32, #tpu.memory_space<vmem>>, vector<32x128xf32>
    tpu.vector_store %arg10[%c0_66, %c0_67], %178 {strides = array<i32>} : memref<32x128xf32, #tpu.memory_space<vmem>>, vector<32x128xf32>,
    return
  }
  func.func @transform_0(%arg0: i32) -> (i32, i32) {
    %c0_i32 = arith.constant 0 : i32
    %c0_i32_0 = arith.constant 0 : i32
    return %arg0, %c0_i32 : i32, i32
  }
  func.func @transform_1(%arg0: i32) -> (i32, i32) {
    %c0_i32 = arith.constant 0 : i32
    %c0_i32_0 = arith.constant 0 : i32
    %c0_i32_1 = arith.constant 0 : i32
    return %c0_i32, %c0_i32_0 : i32, i32
  }
  func.func @transform_2(%arg0: i32) -> (i32, i32) {
    %c0_i32 = arith.constant 0 : i32
    %c0_i32_0 = arith.constant 0 : i32
    %c0_i32_1 = arith.constant 0 : i32
    return %c0_i32, %c0_i32_0 : i32, i32
  }
  func.func @transform_3(%arg0: i32) -> (i32, i32) {
    %c0_i32 = arith.constant 0 : i32
    %c0_i32_0 = arith.constant 0 : i32
    %c0_i32_1 = arith.constant 0 : i32
    return %c0_i32, %c0_i32_0 : i32, i32
  }
  func.func @transform_4(%arg0: i32) -> (i32, i32) {
    %c0_i32 = arith.constant 0 : i32
    %c0_i32_0 = arith.constant 0 : i32
    %c0_i32_1 = arith.constant 0 : i32
    return %c0_i32, %c0_i32_0 : i32, i32
  }
  func.func @transform_5(%arg0: i32) -> (i32, i32) {
    %c0_i32 = arith.constant 0 : i32
    %c0_i32_0 = arith.constant 0 : i32
    %c0_i32_1 = arith.constant 0 : i32
    return %c0_i32, %c0_i32_0 : i32, i32
  }
  func.func @transform_6(%arg0: i32) -> (i32, i32) {
    %c0_i32 = arith.constant 0 : i32
    %c0_i32_0 = arith.constant 0 : i32
    %c0_i32_1 = arith.constant 0 : i32
    return %c0_i32, %c0_i32_0 : i32, i32
  }
  func.func @transform_7(%arg0: i32) -> (i32, i32) {
    %c0_i32 = arith.constant 0 : i32
    %c0_i32_0 = arith.constant 0 : i32
    %c0_i32_1 = arith.constant 0 : i32
    return %c0_i32, %c0_i32_0 : i32, i32
  }
  func.func @transform_8(%arg0: i32) -> (i32, i32) {
    %c0_i32 = arith.constant 0 : i32
    %c0_i32_0 = arith.constant 0 : i32
    %c0_i32_1 = arith.constant 0 : i32
    return %c0_i32, %c0_i32_0 : i32, i32
  }
  func.func @transform_9(%arg0: i32) -> (i32, i32) {
    %c0_i32 = arith.constant 0 : i32
    %c0_i32_0 = arith.constant 0 : i32
    return %arg0, %c0_i32 : i32, i32
  }
}

module attributes {stable_mosaic.version = 11 : i64} {
  func.func @_fused_fastkan_kernel(%arg0: i32, %arg1: memref<32x128xf32, #tpu.memory_space<vmem>>, %arg2: memref<1x128xf32, #tpu.memory_space<vmem>>, %arg3: memref<1x128xf32, #tpu.memory_space<vmem>>, %arg4: memref<1152x128xbf16, #tpu.memory_space<vmem>>, %arg5: memref<1x128xf32, #tpu.memory_space<vmem>>, %arg6: memref<1x128xf32, #tpu.memory_space<vmem>>, %arg7: memref<1x128xf32, #tpu.memory_space<vmem>>, %arg8: memref<1152x128xbf16, #tpu.memory_space<vmem>>, %arg9: memref<1x128xf32, #tpu.memory_space<vmem>>, %arg10: memref<32x128xf32, #tpu.memory_space<vmem>>) attributes {dimension_semantics = [#tpu.dimension_semantics<parallel>], iteration_bounds = array<i64: 2>, scalar_prefetch = 0 : i64, scratch_operands = 0 : i64, tpu.core_type = #tpu.core_type<tc>, window_params = [{transform_indices = @transform_0, window_bounds = array<i64: 32, 128>}, {pipeline_mode = #tpu.pipeline_mode<synchronous>, transform_indices = @transform_1, window_bounds = array<i64: 1, 128>}, {pipeline_mode = #tpu.pipeline_mode<synchronous>, transform_indices = @transform_2, window_bounds = array<i64: 1, 128>}, {pipeline_mode = #tpu.pipeline_mode<synchronous>, transform_indices = @transform_3, window_bounds = array<i64: 1152, 128>}, {pipeline_mode = #tpu.pipeline_mode<synchronous>, transform_indices = @transform_4, window_bounds = array<i64: 1, 128>}, {pipeline_mode = #tpu.pipeline_mode<synchronous>, transform_indices = @transform_5, window_bounds = array<i64: 1, 128>}, {pipeline_mode = #tpu.pipeline_mode<synchronous>, transform_indices = @transform_6, window_bounds = array<i64: 1, 128>}, {pipeline_mode = #tpu.pipeline_mode<synchronous>, transform_indices = @transform_7, window_bounds = array<i64: 1152, 128>}, {pipeline_mode = #tpu.pipeline_mode<synchronous>, transform_indices = @transform_8, window_bounds = array<i64: 1, 128>}, {transform_indices = @transform_9, window_bounds = array<i64: 32, 128>}]} {
    %c0 = arith.constant 0 : index
    %c0_0 = arith.constant 0 : index
    %0 = vector.load %arg1[%c0, %c0_0] : memref<32x128xf32, #tpu.memory_space<vmem>>, vector<32x128xf32>
    %cst = arith.constant dense<0.000000e+00> : vector<32xf32>
    %1 = vector.multi_reduction <add>, %0, %cst [1] : vector<32x128xf32> to vector<32xf32>
    %2 = vector.shape_cast %1 : vector<32xf32> to vector<32x1xf32>
    %3 = arith.mulf %0, %0 : vector<32x128xf32>
    %cst_1 = arith.constant dense<0.000000e+00> : vector<32xf32>
    %4 = vector.multi_reduction <add>, %3, %cst_1 [1] : vector<32x128xf32> to vector<32xf32>
    %5 = vector.shape_cast %4 : vector<32xf32> to vector<32x1xf32>
    %cst_2 = arith.constant 3.125000e-02 : f32
    %6 = vector.broadcast %cst_2 : f32 to vector<32x1xf32>
    %7 = arith.mulf %2, %6 : vector<32x1xf32>
    %cst_3 = arith.constant 3.125000e-02 : f32
    %8 = vector.broadcast %cst_3 : f32 to vector<32x1xf32>
    %9 = arith.mulf %5, %8 : vector<32x1xf32>
    %10 = arith.mulf %7, %7 : vector<32x1xf32>
    %11 = arith.subf %9, %10 : vector<32x1xf32>
    %cst_4 = arith.constant 0.000000e+00 : f32
    %12 = vector.broadcast %cst_4 : f32 to vector<32x1xf32>
    %13 = arith.maximumf %11, %12 : vector<32x1xf32>
    %14 = vector.broadcast %7 : vector<32x1xf32> to vector<32x128xf32>
    %15 = arith.subf %0, %14 : vector<32x128xf32>
    %cst_5 = arith.constant 9.99999974E-6 : f32
    %16 = vector.broadcast %cst_5 : f32 to vector<32x1xf32>
    %17 = arith.addf %13, %16 : vector<32x1xf32>
    %18 = math.rsqrt %17 : vector<32x1xf32>
    %19 = vector.broadcast %18 : vector<32x1xf32> to vector<32x128xf32>
    %20 = arith.mulf %15, %19 : vector<32x128xf32>
    %c0_6 = arith.constant 0 : index
    %c0_7 = arith.constant 0 : index
    %21 = vector.load %arg2[%c0_6, %c0_7] : memref<1x128xf32, #tpu.memory_space<vmem>>, vector<1x128xf32>
    %22 = vector.broadcast %21 : vector<1x128xf32> to vector<32x128xf32>
    %23 = arith.mulf %20, %22 : vector<32x128xf32>
    %c0_8 = arith.constant 0 : index
    %c0_9 = arith.constant 0 : index
    %24 = vector.load %arg3[%c0_8, %c0_9] : memref<1x128xf32, #tpu.memory_space<vmem>>, vector<1x128xf32>
    %25 = vector.broadcast %24 : vector<1x128xf32> to vector<32x128xf32>
    %26 = arith.addf %23, %25 : vector<32x128xf32>
    %cst_10 = arith.constant 1.750000e+00 : f32
    %27 = vector.broadcast %cst_10 : f32 to vector<32x128xf32>
    %28 = arith.mulf %26, %27 : vector<32x128xf32>
    %cst_11 = arith.constant -3.500000e+00 : f32
    %29 = vector.broadcast %cst_11 : f32 to vector<32x128xf32>
    %30 = arith.subf %28, %29 : vector<32x128xf32>
    %31 = arith.mulf %30, %30 : vector<32x128xf32>
    %cst_12 = arith.constant 0.000000e+00 : f32
    %32 = vector.broadcast %cst_12 : f32 to vector<32x128xf32>
    %33 = arith.subf %32, %31 : vector<32x128xf32>
    %34 = math.exp %33 : vector<32x128xf32>
    %cst_13 = arith.constant -2.500000e+00 : f32
    %35 = vector.broadcast %cst_13 : f32 to vector<32x128xf32>
    %36 = arith.subf %28, %35 : vector<32x128xf32>
    %37 = arith.mulf %36, %36 : vector<32x128xf32>
    %cst_14 = arith.constant 0.000000e+00 : f32
    %38 = vector.broadcast %cst_14 : f32 to vector<32x128xf32>
    %39 = arith.subf %38, %37 : vector<32x128xf32>
    %40 = math.exp %39 : vector<32x128xf32>
    %cst_15 = arith.constant -1.500000e+00 : f32
    %41 = vector.broadcast %cst_15 : f32 to vector<32x128xf32>
    %42 = arith.subf %28, %41 : vector<32x128xf32>
    %43 = arith.mulf %42, %42 : vector<32x128xf32>
    %cst_16 = arith.constant 0.000000e+00 : f32
    %44 = vector.broadcast %cst_16 : f32 to vector<32x128xf32>
    %45 = arith.subf %44, %43 : vector<32x128xf32>
    %46 = math.exp %45 : vector<32x128xf32>
    %cst_17 = arith.constant -0.499999821 : f32
    %47 = vector.broadcast %cst_17 : f32 to vector<32x128xf32>
    %48 = arith.subf %28, %47 : vector<32x128xf32>
    %49 = arith.mulf %48, %48 : vector<32x128xf32>
    %cst_18 = arith.constant 0.000000e+00 : f32
    %50 = vector.broadcast %cst_18 : f32 to vector<32x128xf32>
    %51 = arith.subf %50, %49 : vector<32x128xf32>
    %52 = math.exp %51 : vector<32x128xf32>
    %cst_19 = arith.constant 0.500000179 : f32
    %53 = vector.broadcast %cst_19 : f32 to vector<32x128xf32>
    %54 = arith.subf %28, %53 : vector<32x128xf32>
    %55 = arith.mulf %54, %54 : vector<32x128xf32>
    %cst_20 = arith.constant 0.000000e+00 : f32
    %56 = vector.broadcast %cst_20 : f32 to vector<32x128xf32>
    %57 = arith.subf %56, %55 : vector<32x128xf32>
    %58 = math.exp %57 : vector<32x128xf32>
    %cst_21 = arith.constant 1.50000012 : f32
    %59 = vector.broadcast %cst_21 : f32 to vector<32x128xf32>
    %60 = arith.subf %28, %59 : vector<32x128xf32>
    %61 = arith.mulf %60, %60 : vector<32x128xf32>
    %cst_22 = arith.constant 0.000000e+00 : f32
    %62 = vector.broadcast %cst_22 : f32 to vector<32x128xf32>
    %63 = arith.subf %62, %61 : vector<32x128xf32>
    %64 = math.exp %63 : vector<32x128xf32>
    %cst_23 = arith.constant 2.50000048 : f32
    %65 = vector.broadcast %cst_23 : f32 to vector<32x128xf32>
    %66 = arith.subf %28, %65 : vector<32x128xf32>
    %67 = arith.mulf %66, %66 : vector<32x128xf32>
    %cst_24 = arith.constant 0.000000e+00 : f32
    %68 = vector.broadcast %cst_24 : f32 to vector<32x128xf32>
    %69 = arith.subf %68, %67 : vector<32x128xf32>
    %70 = math.exp %69 : vector<32x128xf32>
    %cst_25 = arith.constant 3.500000e+00 : f32
    %71 = vector.broadcast %cst_25 : f32 to vector<32x128xf32>
    %72 = arith.subf %28, %71 : vector<32x128xf32>
    %73 = arith.mulf %72, %72 : vector<32x128xf32>
    %cst_26 = arith.constant 0.000000e+00 : f32
    %74 = vector.broadcast %cst_26 : f32 to vector<32x128xf32>
    %75 = arith.subf %74, %73 : vector<32x128xf32>
    %76 = math.exp %75 : vector<32x128xf32>
    %77 = arith.negf %0 : vector<32x128xf32>
    %78 = math.exp %77 : vector<32x128xf32>
    %cst_27 = arith.constant 1.000000e+00 : f32
    %79 = vector.broadcast %cst_27 : f32 to vector<32x128xf32>
    %80 = arith.addf %79, %78 : vector<32x128xf32>
    %81 = arith.divf %79, %80 : vector<32x128xf32>
    %82 = arith.mulf %0, %81 : vector<32x128xf32>
    %83 = tpu.concatenate %34, %40, %46, %52, %58, %64, %70, %76, %82 in 1 : vector<32x128xf32>, vector<32x128xf32>, vector<32x128xf32>, vector<32x128xf32>, vector<32x128xf32>, vector<32x128xf32>, vector<32x128xf32>, vector<32x128xf32>, vector<32x128xf32> -> vector<32x1152xf32>
    %84 = arith.truncf %83 : vector<32x1152xf32> to vector<32x1152xbf16>
    %c0_28 = arith.constant 0 : index
    %c0_29 = arith.constant 0 : index
    %85 = vector.load %arg4[%c0_28, %c0_29] : memref<1152x128xbf16, #tpu.memory_space<vmem>>, vector<1152x128xbf16>
    %cst_30 = arith.constant dense<0.000000e+00> : vector<32x128xf32>
    %86 = tpu.matmul %84, %85, %cst_30 {dimension_numbers = #tpu.dot_dimension_numbers<[1], [0], [0], [1], [0, 0, 1, 1], [], []>} : vector<32x1152xbf16>, vector<1152x128xbf16>, vector<32x128xf32> -> vector<32x128xf32>
    %c0_31 = arith.constant 0 : index
    %c0_32 = arith.constant 0 : index
    %87 = vector.load %arg5[%c0_31, %c0_32] : memref<1x128xf32, #tpu.memory_space<vmem>>, vector<1x128xf32>
    %88 = vector.broadcast %87 : vector<1x128xf32> to vector<32x128xf32>
    %89 = arith.addf %86, %88 : vector<32x128xf32>
    %cst_33 = arith.constant dense<0.000000e+00> : vector<32xf32>
    %90 = vector.multi_reduction <add>, %89, %cst_33 [1] : vector<32x128xf32> to vector<32xf32>
    %91 = vector.shape_cast %90 : vector<32xf32> to vector<32x1xf32>
    %92 = arith.mulf %89, %89 : vector<32x128xf32>
    %cst_34 = arith.constant dense<0.000000e+00> : vector<32xf32>
    %93 = vector.multi_reduction <add>, %92, %cst_34 [1] : vector<32x128xf32> to vector<32xf32>
    %94 = vector.shape_cast %93 : vector<32xf32> to vector<32x1xf32>
    %cst_35 = arith.constant 1.562500e-02 : f32
    %95 = vector.broadcast %cst_35 : f32 to vector<32x1xf32>
    %96 = arith.mulf %91, %95 : vector<32x1xf32>
    %cst_36 = arith.constant 1.562500e-02 : f32
    %97 = vector.broadcast %cst_36 : f32 to vector<32x1xf32>
    %98 = arith.mulf %94, %97 : vector<32x1xf32>
    %99 = arith.mulf %96, %96 : vector<32x1xf32>
    %100 = arith.subf %98, %99 : vector<32x1xf32>
    %cst_37 = arith.constant 0.000000e+00 : f32
    %101 = vector.broadcast %cst_37 : f32 to vector<32x1xf32>
    %102 = arith.maximumf %100, %101 : vector<32x1xf32>
    %103 = vector.broadcast %96 : vector<32x1xf32> to vector<32x128xf32>
    %104 = arith.subf %89, %103 : vector<32x128xf32>
    %cst_38 = arith.constant 9.99999974E-6 : f32
    %105 = vector.broadcast %cst_38 : f32 to vector<32x1xf32>
    %106 = arith.addf %102, %105 : vector<32x1xf32>
    %107 = math.rsqrt %106 : vector<32x1xf32>
    %108 = vector.broadcast %107 : vector<32x1xf32> to vector<32x128xf32>
    %109 = arith.mulf %104, %108 : vector<32x128xf32>
    %c0_39 = arith.constant 0 : index
    %c0_40 = arith.constant 0 : index
    %110 = vector.load %arg6[%c0_39, %c0_40] : memref<1x128xf32, #tpu.memory_space<vmem>>, vector<1x128xf32>
    %111 = vector.broadcast %110 : vector<1x128xf32> to vector<32x128xf32>
    %112 = arith.mulf %109, %111 : vector<32x128xf32>
    %c0_41 = arith.constant 0 : index
    %c0_42 = arith.constant 0 : index
    %113 = vector.load %arg7[%c0_41, %c0_42] : memref<1x128xf32, #tpu.memory_space<vmem>>, vector<1x128xf32>
    %114 = vector.broadcast %113 : vector<1x128xf32> to vector<32x128xf32>
    %115 = arith.addf %112, %114 : vector<32x128xf32>
    %cst_43 = arith.constant 1.750000e+00 : f32
    %116 = vector.broadcast %cst_43 : f32 to vector<32x128xf32>
    %117 = arith.mulf %115, %116 : vector<32x128xf32>
    %cst_44 = arith.constant -3.500000e+00 : f32
    %118 = vector.broadcast %cst_44 : f32 to vector<32x128xf32>
    %119 = arith.subf %117, %118 : vector<32x128xf32>
    %120 = arith.mulf %119, %119 : vector<32x128xf32>
    %cst_45 = arith.constant 0.000000e+00 : f32
    %121 = vector.broadcast %cst_45 : f32 to vector<32x128xf32>
    %122 = arith.subf %121, %120 : vector<32x128xf32>
    %123 = math.exp %122 : vector<32x128xf32>
    %cst_46 = arith.constant -2.500000e+00 : f32
    %124 = vector.broadcast %cst_46 : f32 to vector<32x128xf32>
    %125 = arith.subf %117, %124 : vector<32x128xf32>
    %126 = arith.mulf %125, %125 : vector<32x128xf32>
    %cst_47 = arith.constant 0.000000e+00 : f32
    %127 = vector.broadcast %cst_47 : f32 to vector<32x128xf32>
    %128 = arith.subf %127, %126 : vector<32x128xf32>
    %129 = math.exp %128 : vector<32x128xf32>
    %cst_48 = arith.constant -1.500000e+00 : f32
    %130 = vector.broadcast %cst_48 : f32 to vector<32x128xf32>
    %131 = arith.subf %117, %130 : vector<32x128xf32>
    %132 = arith.mulf %131, %131 : vector<32x128xf32>
    %cst_49 = arith.constant 0.000000e+00 : f32
    %133 = vector.broadcast %cst_49 : f32 to vector<32x128xf32>
    %134 = arith.subf %133, %132 : vector<32x128xf32>
    %135 = math.exp %134 : vector<32x128xf32>
    %cst_50 = arith.constant -0.499999821 : f32
    %136 = vector.broadcast %cst_50 : f32 to vector<32x128xf32>
    %137 = arith.subf %117, %136 : vector<32x128xf32>
    %138 = arith.mulf %137, %137 : vector<32x128xf32>
    %cst_51 = arith.constant 0.000000e+00 : f32
    %139 = vector.broadcast %cst_51 : f32 to vector<32x128xf32>
    %140 = arith.subf %139, %138 : vector<32x128xf32>
    %141 = math.exp %140 : vector<32x128xf32>
    %cst_52 = arith.constant 0.500000179 : f32
    %142 = vector.broadcast %cst_52 : f32 to vector<32x128xf32>
    %143 = arith.subf %117, %142 : vector<32x128xf32>
    %144 = arith.mulf %143, %143 : vector<32x128xf32>
    %cst_53 = arith.constant 0.000000e+00 : f32
    %145 = vector.broadcast %cst_53 : f32 to vector<32x128xf32>
    %146 = arith.subf %145, %144 : vector<32x128xf32>
    %147 = math.exp %146 : vector<32x128xf32>
    %cst_54 = arith.constant 1.50000012 : f32
    %148 = vector.broadcast %cst_54 : f32 to vector<32x128xf32>
    %149 = arith.subf %117, %148 : vector<32x128xf32>
    %150 = arith.mulf %149, %149 : vector<32x128xf32>
    %cst_55 = arith.constant 0.000000e+00 : f32
    %151 = vector.broadcast %cst_55 : f32 to vector<32x128xf32>
    %152 = arith.subf %151, %150 : vector<32x128xf32>
    %153 = math.exp %152 : vector<32x128xf32>
    %cst_56 = arith.constant 2.50000048 : f32
    %154 = vector.broadcast %cst_56 : f32 to vector<32x128xf32>
    %155 = arith.subf %117, %154 : vector<32x128xf32>
    %156 = arith.mulf %155, %155 : vector<32x128xf32>
    %cst_57 = arith.constant 0.000000e+00 : f32
    %157 = vector.broadcast %cst_57 : f32 to vector<32x128xf32>
    %158 = arith.subf %157, %156 : vector<32x128xf32>
    %159 = math.exp %158 : vector<32x128xf32>
    %cst_58 = arith.constant 3.500000e+00 : f32
    %160 = vector.broadcast %cst_58 : f32 to vector<32x128xf32>
    %161 = arith.subf %117, %160 : vector<32x128xf32>
    %162 = arith.mulf %161, %161 : vector<32x128xf32>
    %cst_59 = arith.constant 0.000000e+00 : f32
    %163 = vector.broadcast %cst_59 : f32 to vector<32x128xf32>
    %164 = arith.subf %163, %162 : vector<32x128xf32>
    %165 = math.exp %164 : vector<32x128xf32>
    %166 = arith.negf %89 : vector<32x128xf32>
    %167 = math.exp %166 : vector<32x128xf32>
    %cst_60 = arith.constant 1.000000e+00 : f32
    %168 = vector.broadcast %cst_60 : f32 to vector<32x128xf32>
    %169 = arith.addf %168, %167 : vector<32x128xf32>
    %170 = arith.divf %168, %169 : vector<32x128xf32>
    %171 = arith.mulf %89, %170 : vector<32x128xf32>
    %172 = tpu.concatenate %123, %129, %135, %141, %147, %153, %159, %165, %171 in 1 : vector<32x128xf32>, vector<32x128xf32>, vector<32x128xf32>, vector<32x128xf32>, vector<32x128xf32>, vector<32x128xf32>, vector<32x128xf32>, vector<32x128xf32>, vector<32x128xf32> -> vector<32x1152xf32>
    %173 = arith.truncf %172 : vector<32x1152xf32> to vector<32x1152xbf16>
    %c0_61 = arith.constant 0 : index
    %c0_62 = arith.constant 0 : index
    %174 = vector.load %arg8[%c0_61, %c0_62] : memref<1152x128xbf16, #tpu.memory_space<vmem>>, vector<1152x128xbf16>
    %cst_63 = arith.constant dense<0.000000e+00> : vector<32x128xf32>
    %175 = tpu.matmul %173, %174, %cst_63 {dimension_numbers = #tpu.dot_dimension_numbers<[1], [0], [0], [1], [0, 0, 1, 1], [], []>} : vector<32x1152xbf16>, vector<1152x128xbf16>, vector<32x128xf32> -> vector<32x128xf32>
    %c0_64 = arith.constant 0 : index
    %c0_65 = arith.constant 0 : index
    %176 = vector.load %arg9[%c0_64, %c0_65] : memref<1x128xf32, #tpu.memory_space<vmem>>, vector<1x128xf32>
    %177 = vector.broadcast %176 : vector<1x128xf32> to vector<32x128xf32>
    %178 = arith.addf %175, %177 : vector<32x128xf32>
    %c0_66 = arith.constant 0 : index
    %c0_67 = arith.constant 0 : index
    %179 = vector.load %arg10[%c0_66, %c0_67] : memref<32x128xf32, #tpu.memory_space<vmem>>, vector<32x128xf32>
    tpu.vector_store %arg10[%c0_66, %c0_67], %178 {strides = array<i32>} : memref<32x128xf32, #tpu.memory_space<vmem>>, vector<32x128xf32>,
    return
  }
  func.func @transform_0(%arg0: i32) -> (i32, i32) {
    %c0_i32 = arith.constant 0 : i32
    %c0_i32_0 = arith.constant 0 : i32
    return %arg0, %c0_i32 : i32, i32
  }
  func.func @transform_1(%arg0: i32) -> (i32, i32) {
    %c0_i32 = arith.constant 0 : i32
    %c0_i32_0 = arith.constant 0 : i32
    %c0_i32_1 = arith.constant 0 : i32
    return %c0_i32, %c0_i32_0 : i32, i32
  }
  func.func @transform_2(%arg0: i32) -> (i32, i32) {
    %c0_i32 = arith.constant 0 : i32
    %c0_i32_0 = arith.constant 0 : i32
    %c0_i32_1 = arith.constant 0 : i32
    return %c0_i32, %c0_i32_0 : i32, i32
  }
  func.func @transform_3(%arg0: i32) -> (i32, i32) {
    %c0_i32 = arith.constant 0 : i32
    %c0_i32_0 = arith.constant 0 : i32
    %c0_i32_1 = arith.constant 0 : i32
    return %c0_i32, %c0_i32_0 : i32, i32
  }
  func.func @transform_4(%arg0: i32) -> (i32, i32) {
    %c0_i32 = arith.constant 0 : i32
    %c0_i32_0 = arith.constant 0 : i32
    %c0_i32_1 = arith.constant 0 : i32
    return %c0_i32, %c0_i32_0 : i32, i32
  }
  func.func @transform_5(%arg0: i32) -> (i32, i32) {
    %c0_i32 = arith.constant 0 : i32
    %c0_i32_0 = arith.constant 0 : i32
    %c0_i32_1 = arith.constant 0 : i32
    return %c0_i32, %c0_i32_0 : i32, i32
  }
  func.func @transform_6(%arg0: i32) -> (i32, i32) {
    %c0_i32 = arith.constant 0 : i32
    %c0_i32_0 = arith.constant 0 : i32
    %c0_i32_1 = arith.constant 0 : i32
    return %c0_i32, %c0_i32_0 : i32, i32
  }
  func.func @transform_7(%arg0: i32) -> (i32, i32) {
    %c0_i32 = arith.constant 0 : i32
    %c0_i32_0 = arith.constant 0 : i32
    %c0_i32_1 = arith.constant 0 : i32
    return %c0_i32, %c0_i32_0 : i32, i32
  }
  func.func @transform_8(%arg0: i32) -> (i32, i32) {
    %c0_i32 = arith.constant 0 : i32
    %c0_i32_0 = arith.constant 0 : i32
    %c0_i32_1 = arith.constant 0 : i32
    return %c0_i32, %c0_i32_0 : i32, i32
  }
  func.func @transform_9(%arg0: i32) -> (i32, i32) {
    %c0_i32 = arith.constant 0 : i32
    %c0_i32_0 = arith.constant 0 : i32
    return %arg0, %c0_i32 : i32, i32
  }
}

</mosaic_0001>

<bundles_post_ra>
// kernel: tpu_custom_call.1
= control target key start
LH: loop header
LB: loop body
LE: loop exit
PB: predicated region body
PF: predicated region fallthrough
CT: control target
= control target key end

     0   :  { %s4258_s0 = inlined_call_operand.hbm [shape: f32[64,128], index: 0, kind: input, shape index: {}]   ;;  %s4259_s1 = inlined_call_operand.vmem [shape: f32[1,128], index: 1, kind: input, shape index: {}]   ;;  %s4260_s2 = inlined_call_operand.vmem [shape: f32[1,128], index: 2, kind: input, shape index: {}]   ;;  %s4261_s3 = inlined_call_operand.hbm [shape: bf16[1152,128], index: 3, kind: input, shape index: {}]   ;;  %s4262_s4 = inlined_call_operand.vmem [shape: f32[1,128], index: 4, kind: input, shape index: {}]   ;;  %s4263_s5 = inlined_call_operand.vmem [shape: f32[1,128], index: 5, kind: input, shape index: {}]   ;;  %s4264_s6 = inlined_call_operand.vmem [shape: f32[1,128], index: 6, kind: input, shape index: {}]   ;;  %s4265_s7 = inlined_call_operand.hbm [shape: bf16[1152,128], index: 7, kind: input, shape index: {}]   ;;  %s4266_s8 = inlined_call_operand.vmem [shape: f32[1,128], index: 8, kind: input, shape index: {}]   ;;  %s4267_s9 = inlined_call_operand.hbm [shape: f32[64,128], index: 9, kind: output, shape index: {}]  }
   0x1   :  { %4272 = sst [smem:[#allocation13_spill]] %s4261_s3 }
   0x2   :  { %4273 = sst [smem:[#allocation14_spill]] %s4265_s7 }
   0x3   :  { %14 = vsyncpa [#allocation3], 0 }
   0x4   :  { %16 = vsyncpa [#allocation3 + $0x1], 0 }
   0x5   :  { %17 = vsyncpa [#allocation6], 0 }
   0x6   :  { %18 = vsyncpa [#allocation4], 0 }
   0x7   :  { %20 = vsyncpa [#allocation4 + $0x1], 0  ;;  %s3862_s30 = smov 0   ;;  %s3864_s10 = smov 0  }
   0x8   :  { %s3866_s11 = smov 0   ;;  %s3868_s12 = smov 0  }
   0x9 LB: > { %s3883_s13 = sadd.s32 4294967295, %s3800_s12   ;;  %s2729_s14 = sadd.s32 4294967294, %s3800_s12   ;;  %s3800_s12 = sphi %s3868_s12, %s4295_s12   ;;  %s3796_s11 = sphi %s3866_s11, %s4294_s11   ;;  %s3792_s10 = sphi %s3864_s10, %s4293_s10   ;;  %s3788_s30 = sphi %s3862_s30, %s4292_s30  }
   0xa   : > { %p46_p0 = scmp.ne.s32.totalorder %s3792_s10, %s3788_s30  ;;  %p4268_p1 = scmp.eq.s32.totalorder %s3883_s13, 0 }
   0xb   : > { %p244_p3 = scmp.eq.s32.totalorder %s2729_s14, 1  ;;  %p2730_p5 = scmp.ge.s32.totalorder %s3800_s12, 1 }
   0xc   : > { %p3892_p4 = por %p4268_p1, %p46_p0  ;;  %p251_p7 = scmp.lt.s32.totalorder %s3800_s12, 3 }
   0xd   : > { %p3897_p6 = por %p244_p3, %p46_p0  ;;  %s3802_s18 = smov [#allocation5]  }
   0xe   : > { %s4274_s15 = scalar_select %p3892_p4, 1, 0 }
   0xf   : > { %s4275_s16 = scalar_select %p3897_p6, 1, 0 }
  0x10   : > { %p3902_p8 = pnand %p2730_p5, %p251_p7  ;;  %s269_s19 = sshll.u32 %s3802_s18, 4  ;;  %s270_s19 = int_to_ptr.vmem [resolvable:$true] %s269_s19 }
  0x11   : > { %s3803_s21 = smov [#allocation7]   ;;  %s3663_s23 = scalar_lea.vmem %s270_s19, 9216 }
  0x12   : > { %s4276_s17 = scalar_select %p3902_p8, 1, 0 }
  0x13   : > { %p3267_p9 = pneg %p3902_p8  ;;  %s291_s22 = sshll.u32 %s3803_s21, 4  ;;  %s292_s22 = int_to_ptr.vmem [resolvable:$true] %s291_s22 }
  0x14   : > { %p3664_p13 = scmp.ne.s32.totalorder %s270_s19, %s3663_s23  ;;  %p3671_p5 = scmp.lt.s32.totalorder %s270_s19, %s270_s19 }
  0x15   : > { %p3911_p11 = pnand %p3267_p9, %p4268_p1  ;;  %p3672_p7 = scmp.lt.s32.totalorder %s3663_s23, %s3663_s23 }
  0x17   : > { %p3654_p12 = pneg %p3911_p11  ;;  %p3673_p10 = por %p3672_p7, %p3671_p5 }
  0x19   : > { %p3666_p0 = pnand %p3664_p13, %p3654_p12 }
  0x1b   : > { %p3667_p3 = pneg %p3666_p0 }
  0x1d   : > { %p3674_p9 = pnand %p3673_p10, %p3667_p3 }
  0x1f   : > { %3677 = shalt.err (!%p3674_p9)
}
  0x20   : > { %s3804_s24 = smov 64   ;;  %s3805_s25 = smov 4  }
  0x21   : > { %s4278_s3 = sld [smem:[#allocation13_spill]]  ;;  %s3689_s28 = scalar_lea.vmem %s292_s22, 9216 }
  0x22   : > { %p3690_p1 = scmp.ne.s32.totalorder %s292_s22, %s3689_s28  ;;  %p3697_p2 = scmp.lt.s32.totalorder %s292_s22, %s292_s22 }
  0x23   : > { %p3698_p6 = scmp.lt.s32.totalorder %s3689_s28, %s3689_s28 }
  0x24   : > { %p3692_p13 = pnand %p3690_p1, %p3654_p12 }
  0x25   : > { %p3699_p5 = por %p3698_p6, %p3697_p2 }
  0x26   : > { %p3693_p0 = pneg %p3692_p13 }
  0x27   : > { %3270 = dma.hbm_to_vmem [thread:$0]  (!%p3911_p11), %s4278_s3, 9216, %s270_s19, [#allocation6], %s3804_s24, %s3804_s24, %s3805_s25  }
  0x28   : > { %p3700_p10 = pnand %p3699_p5, %p3693_p0 }
  0x2a   : > { %3703 = shalt.err (!%p3700_p10)
}
  0x2b   : > { %s4279_s7 = sld [smem:[#allocation14_spill]]  ;;  %s3934_s18 = sadd.s32 1, %s3800_s12  }
  0x2c   : > { %s33_s19 = sadd.s32 1, %s3796_s11  ;;  %s30_s20 = ssub.s32 %s3800_s12, %s3934_s18 }
  0x2d   : > { %p40_p1 = scmp.ne.s32.totalorder %s3796_s11, %s3792_s10  ;;  %p31_p2 = scmp.eq.s32.totalorder %s30_s20, 0 }
  0x2e   : > { %p41_p6 = scmp.eq.s32.totalorder %s3800_s12, 0  ;;  %p4280_p12 = scmp.eq.s32.totalorder %s3883_s13, 1 }
  0x2f   : > { %p3284_p7 = scmp.lt.s32.totalorder %s3800_s12, 2  ;;  %s308_s26 = sand.u32 1, %s3796_s11  }
  0x30   : > { %p3944_p3 = por %p4280_p12, %p40_p1  ;;  %p42_p9 = por %p41_p6, %p40_p1 }
  0x31   : > { %3273 = dma.hbm_to_vmem [thread:$0]  (!%p3911_p11), %s4279_s7, 9216, %s292_s22, [#allocation6], %s3804_s24, %s3804_s24, %s3805_s25  }
  0x32   : > { %s4281_s21 = scalar_select %p3944_p3, 1, 0 }
  0x33   : > { %s3950_s23 = scalar_select %p31_p2, %s3796_s11, %s33_s19  }
  0x34   : > { %s2734_s27 = sshll.u32 %s308_s26, 5  ;;  %s2969_s22 = sshll.u32 %s3800_s12, 9 }
  0x35   : > { %4282 = sst [smem:[#allocation12_spill]] %s3950_s23  ;;  %s3957_s28 = scalar_lea.hbm %s4258_s0, %s2969_s22 }
  0x36   : > { %s312_s29 = scalar_lea.vmem [#allocation2], %s2734_s27  ;;  %p3961_p11 = pnand %p3284_p7, %p42_p9 }
  0x37   : > { %s319_s14 = sshll.u32 %s312_s29, 4  ;;  %s3965_s19 = scalar_lea.sflag [#allocation3], %s308_s26  ;;  %s3959_s14 = int_to_ptr.vmem [resolvable:$true] %s319_s14 }
  0x38   : > { %s3704_s3 = scalar_lea.hbm %s3957_s28, 512  ;;  %p3706_p0 = pneg %p3961_p11 }
  0x39   : > { %p3705_p13 = scmp.ne.s32.totalorder %s3957_s28, %s3704_s3  ;;  %s3709_s27 = scalar_lea.hbm %s4258_s0, 1024 }
  0x3a   : > { %p3710_p1 = scmp.lt.s32.totalorder %s3957_s28, %s4258_s0  ;;  %p3711_p2 = scmp.lt.s32.totalorder %s3709_s27, %s3704_s3 }
  0x3b   : > { %p3707_p5 = pnand %p3706_p0, %p3705_p13 }
  0x3c   : > { %p3712_p6 = por %p3711_p2, %p3710_p1 }
  0x3d   : > { %p3708_p10 = pneg %p3707_p5 }
  0x3f   : > { %p3713_p12 = pnand %p3712_p6, %p3708_p10 }
  0x41   : > { %3716 = shalt.err (!%p3713_p12)
}
  0x42   : > { %s3717_s26 = scalar_lea.vmem %s3959_s14, 512  ;;  %s3806_s7 = smov [#allocation2]  }
  0x43   : > { %p3718_p7 = scmp.ne.s32.totalorder %s3959_s14, %s3717_s26  ;;  %s3722_s23 = sshll.u32 %s3806_s7, 4  ;;  %s3723_s23 = int_to_ptr.vmem [resolvable:$false] %s3722_s23 }
  0x44   : > { %s3724_s22 = scalar_lea.vmem %s3723_s23, 1024  ;;  %p3725_p5 = scmp.lt.s32.totalorder %s3959_s14, %s3723_s23 }
  0x45   : > { %p3720_p9 = pnand %p3718_p7, %p3706_p0  ;;  %p3726_p3 = scmp.lt.s32.totalorder %s3724_s22, %s3717_s26 }
  0x47   : > { %p3721_p13 = pneg %p3720_p9  ;;  %p3727_p4 = por %p3726_p3, %p3725_p5 }
  0x49   : > { %p3728_p8 = pnand %p3727_p4, %p3721_p13 }
  0x4b   : > { %3731 = shalt.err (!%p3728_p8)
}
  0x4c   : > { %s3807_s3 = smov 128   ;;  %s3808_s24 = smov 8  }
  0x4d   : > { %3277 = dma.hbm_to_vmem [thread:$0]  (!%p3961_p11), %s3957_s28, 512, %s3959_s14, %s3965_s19, %s3807_s3, %s3807_s3, %s3808_s24  }
  0x4e   : > { %p4284_p0 = scmp.ne.s32.totalorder %s4276_s17, 0 }
  0x4f   : > { %s3989_s7 = sand.u32 (!%p4284_p0), 1, %s3792_s10   ;;  %p4285_p4 = scmp.ne.s32.totalorder (!%p4284_p0), %s4274_s15, 0 }
  0x50   : > { %331 = sbr.rel (%p4284_p0) target bundleno = 1033 (0x409), region = 56  ;;  %s2738_s23 = sshll.u32 (!%p4284_p0), %s3989_s7, 5 }
  0x51   : > { %s334_s27 = scalar_lea.sflag (!%p4284_p0), [#allocation3], %s3989_s7  ;;  %s3995_s25 = scalar_lea.vmem (!%p4284_p0), [#allocation2], %s2738_s23 }
  0x55   : > { %3775 = dma.done.wait (%p4285_p4), %s334_s27, 512  }
  0x56   : > { %3777 = vsyncadd (%p4285_p4), %s334_s27, 4294966784  ;;  %p4286_p8 = scmp.eq.s32.totalorder %s3883_s13, 0 }
  0x58   : > { %3779 = dma.done.wait (%p4286_p8), [#allocation6], 18432   ;;  %p4287_p3 = pmov %p4286_p8 }
  0x59   : > { %v4006_v0 = vld [vmem:[%s3995_s25] sm:$0xff]  ;;  %v4009_v1 = vld [vmem:[%s3995_s25 + $0x8] sm:$0xff]  ;;  %v4017_v4 = vld [vmem:[%s3995_s25 + $0x10] sm:$0xff]  ;;  %s2970_s17 = sshll.u32 %s3883_s13, 9  ;;  %s2624_s20 = scalar_lea.sflag [#allocation4], %s3989_s7 }
  0x5a   : > { %3781 = vsyncadd (%p4287_p3), [#allocation6], 4294948864  ;;  %387 = vadd.xlane.f32.xlu0 %v4006_v0  ;;  %v395_v2 = vmul.f32 %v4006_v0, %v4006_v0  ;;  %v396_v3 = vmul.f32 %v4009_v1, %v4009_v1  ;;  %v4021_v5 = vld [vmem:[%s3995_s25 + $0x18] sm:$0xff]  ;;  %v397_v6 = vmul.f32 %v4017_v4, %v4017_v4  ;;  %v3332_v12 = vld [vmem:[#allocation5 + $0x70] sm:$0xff]   ;;  %s4215_s14 = scalar_lea.hbm %s4267_s9, %s2970_s17  ;;  %p4288_p10 = scmp.ne.s32.totalorder %s4281_s21, 0 }
  0x5b   : > { %v398_v7 = vmul.f32 %v4021_v5, %v4021_v5  ;;  %v3328_v8 = vld [vmem:[#allocation5 + $0x78] sm:$0xff]   ;;  %v3333_v13 = vld [vmem:[#allocation5 + $0xf0] sm:$0xff]   ;;  %v3336_v16 = vld [vmem:[#allocation5 + $0x68] sm:$0xff]   ;;  %s3809_s19 = smov [#allocation8]  }
  0x5c   : > { %399 = vadd.xlane.f32.xlu1 %v395_v2  ;;  %v3329_v9 = vld [vmem:[#allocation5 + $0xf8] sm:$0xff]   ;;  %2971 = vmatprep.subr.bf16.mxu0 %v3328_v8  ;;  %v3334_v14 = vld [vmem:[#allocation5 + $0x30] sm:$0xff]   ;;  %v3337_v17 = vld [vmem:[#allocation5 + $0xe8] sm:$0xff]   ;;  %s3736_s29 = sshll.u32 %s3809_s19, 4  ;;  %s3737_s29 = int_to_ptr.vmem [resolvable:$false] %s3736_s29 }
  0x5d   : > { %v3330_v10 = vld [vmem:[#allocation5 + $0x38] sm:$0xff]   ;;  %2999 = vmatprep.subr.bf16.mxu1 %v3329_v9  ;;  %v3335_v15 = vld [vmem:[#allocation5 + $0xb0] sm:$0xff]   ;;  %v3338_v18 = vld [vmem:[#allocation5 + $0x28] sm:$0xff]   ;;  %s3738_s26 = scalar_lea.vmem %s3737_s29, 1024 }
  0x5e   : > { %389 = vadd.xlane.f32.xlu0 %v4009_v1  ;;  %v3331_v11 = vld [vmem:[#allocation5 + $0xb8] sm:$0xff]   ;;  %2972 = vmatpush3.bf16.msra.mxu0 %v3330_v10  ;;  %v3339_v19 = vld [vmem:[#allocation5 + $0xa8] sm:$0xff]   ;;  %v3340_v20 = vld [vmem:[#allocation5 + $0x60] sm:$0xff]  }
  0x5f   : > { %3000 = vmatpush3.bf16.msra.mxu1 %v3331_v11  ;;  %2973 = vmatprep.subr.bf16.mxu0 %v3332_v12  ;;  %v3341_v21 = vld [vmem:[#allocation5 + $0xe0] sm:$0xff]   ;;  %v3344_v24 = vld [vmem:[#allocation5 + $0x58] sm:$0xff]   ;;  %v3348_v28 = vld [vmem:[#allocation5 + $0x50] sm:$0xff]  }
  0x60   : > { %401 = vadd.xlane.f32.xlu1 %v396_v3  ;;  %3001 = vmatprep.subr.bf16.mxu1 %v3333_v13  ;;  %v3342_v22 = vld [vmem:[#allocation5 + $0x20] sm:$0xff]   ;;  %v3345_v25 = vld [vmem:[#allocation5 + $0xd8] sm:$0xff]   ;;  %v3349_v29 = vld [vmem:[#allocation5 + $0xd0] sm:$0xff]  }
  0x61   : > { %v3343_v23 = vld [vmem:[#allocation5 + $0xa0] sm:$0xff]   ;;  %v3346_v26 = vld [vmem:[#allocation5 + $0x18] sm:$0xff]   ;;  %v3350_v30 = vld [vmem:[#allocation5 + $0x10] sm:$0xff]  }
  0x62   : > { %391 = vadd.xlane.f32.xlu0 %v4017_v4  ;;  %2974 = vmatpush3.bf16.msra.mxu0 %v3334_v14  ;;  %v3347_v27 = vld [vmem:[#allocation5 + $0x98] sm:$0xff]   ;;  %v3351_v31 = vld [vmem:[#allocation5 + $0x90] sm:$0xff]   ;;  %v3352_v32 = vld [vmem:[#allocation5 + $0x48] sm:$0xff]  }
  0x63   : > { %3002 = vmatpush3.bf16.msra.mxu1 %v3335_v15  ;;  %2975 = vmatprep.subr.bf16.mxu0 %v3336_v16  ;;  %v3353_v33 = vld [vmem:[#allocation5 + $0xc8] sm:$0xff]   ;;  %v3356_v36 = vld [vmem:[#allocation5 + $0x40] sm:$0xff]   ;;  %v3360_v40 = vld [vmem:[#allocation5 + $0x178] sm:$0xff]  }
  0x64   : > { %393 = vadd.xlane.f32.xlu1 %v4021_v5  ;;  %3003 = vmatprep.subr.bf16.mxu1 %v3337_v17  ;;  %v3354_v34 = vld [vmem:[#allocation5 + $0x8] sm:$0xff]   ;;  %v3357_v37 = vld [vmem:[#allocation5 + $0xc0] sm:$0xff]   ;;  %v3361_v41 = vld [vmem:[#allocation5 + $0x1f8] sm:$0xff]  }
  0x65   : > { %v3355_v35 = vld [vmem:[#allocation5 + $0x88] sm:$0xff]   ;;  %v3358_v38 = vld [vmem:[#allocation5] sm:$0xff]  }
  0x66   : > { %403 = vadd.xlane.f32.xlu0 %v397_v6  ;;  %2976 = vmatpush3.bf16.msra.mxu0 %v3338_v18  ;;  %v3359_v39 = vld [vmem:[#allocation5 + $0x80] sm:$0xff]  }
  0x67   : > { %3004 = vmatpush3.bf16.msra.mxu1 %v3339_v19  ;;  %2977 = vmatprep.subr.bf16.mxu0 %v3340_v20  ;;  %v2742_v16 = vld [vmem:[%s4259_s1] ss:$0 sm:$0xff]  ;;  %v2776_v19 = vmul.f32 -1.442695, %v4006_v0 }
  0x68   : > { %405 = vadd.xlane.f32.xlu1 %v398_v7  ;;  %3005 = vmatprep.subr.bf16.mxu1 %v3341_v21  ;;  %v2743_v18 = vld [vmem:[%s4260_s2] ss:$0 sm:$0xff] }
  0x6a   : > { %2978 = vmatpush3.bf16.msra.mxu0 %v3342_v22 }
  0x6b   : > { %3006 = vmatpush3.bf16.msra.mxu1 %v3343_v23  ;;  %2979 = vmatprep.subr.bf16.mxu0 %v3344_v24  ;;  %v2777_v23 = vmul.f32 -1.442695, %v4009_v1 }
  0x6c   : > { %3007 = vmatprep.subr.bf16.mxu1 %v3345_v25 }
  0x6e   : > { %2980 = vmatpush3.bf16.msra.mxu0 %v3346_v26 }
  0x6f   : > { %3008 = vmatpush3.bf16.msra.mxu1 %v3347_v27  ;;  %2981 = vmatprep.subr.bf16.mxu0 %v3348_v28 }
  0x70   : > { %3009 = vmatprep.subr.bf16.mxu1 %v3349_v29 }
  0x72   : > { %2982 = vmatpush3.bf16.msra.mxu0 %v3350_v30 }
  0x73   : > { %3010 = vmatpush3.bf16.msra.mxu1 %v3351_v31  ;;  %2983 = vmatprep.subr.bf16.mxu0 %v3352_v32 }
  0x74   : > { %3011 = vmatprep.subr.bf16.mxu1 %v3353_v33 }
  0x76   : > { %2984 = vmatpush3.bf16.msra.mxu0 %v3354_v34 }
  0x77   : > { %3012 = vmatpush3.bf16.msra.mxu1 %v3355_v35  ;;  %2985 = vmatprep.subr.bf16.mxu0 %v3356_v36 }
  0x78   : > { %3013 = vmatprep.subr.bf16.mxu1 %v3357_v37 }
  0x7a   : > { %2986 = vmatpush3.bf16.msra.mxu0 %v3358_v38 }
  0x7b   : > { %3014 = vmatpush3.bf16.msra.mxu1 %v3359_v39  ;;  %3027 = vmatprep.subr.bf16.mxu0 %v3360_v40 }
  0x7c   : > { %3055 = vmatprep.subr.bf16.mxu1 %v3361_v41 }
  0xe3   : > { %v388_v42 = vpop.xlane.xlu0 %387 }
  0xe4   : > { %v407_v43 = vmul.f32 0.03125, %v388_v42 }
  0xe5   : > { %v400_v44 = vpop.xlane.xlu1 %399 }
  0xe6   : > { %v415_v45 = vmul.f32 %v407_v43, %v407_v43  ;;  %v411_v46 = vmul.f32 0.03125, %v400_v44  ;;  %v427_v14 = vsub.f32 %v4006_v0, %v407_v43 }
  0xe7   : > { %v390_v47 = vpop.xlane.xlu0 %389 }
  0xe8   : > { %v419_v48 = vsub.f32 %v411_v46, %v415_v45  ;;  %v408_v49 = vmul.f32 0.03125, %v390_v47 }
  0xe9   : > { %v402_v50 = vpop.xlane.xlu1 %401 }
  0xea   : > { %v423_v51 = vmax.f32 %v419_v48, 0.0  ;;  %v416_v52 = vmul.f32 %v408_v49, %v408_v49  ;;  %v412_v53 = vmul.f32 0.03125, %v402_v50  ;;  %v428_v21 = vsub.f32 %v4009_v1, %v408_v49 }
  0xeb   : > { %v392_v54 = vpop.xlane.xlu0 %391 }
  0xec   : > { %v431_v55 = vadd.f32 1e-05, %v423_v51  ;;  %v420_v56 = vsub.f32 %v412_v53, %v416_v52  ;;  %v409_v57 = vmul.f32 0.03125, %v392_v54 }
  0xed   : > { %v394_v58 = vpop.xlane.xlu1 %393 }
  0xee   : > { %3472 = vrsqrt.f32 %v431_v55  ;;  %v424_v59 = vmax.f32 %v420_v56, 0.0  ;;  %v417_v60 = vmul.f32 %v409_v57, %v409_v57  ;;  %v410_v61 = vmul.f32 0.03125, %v394_v58 }
  0xef   : > { %v404_v62 = vpop.xlane.xlu0 %403  ;;  %v429_v28 = vsub.f32 %v4017_v4, %v409_v57 }
  0xf0   : > { %v432_v63 = vadd.f32 1e-05, %v424_v59  ;;  %v413_v2 = vmul.f32 0.03125, %v404_v62  ;;  %v418_v3 = vmul.f32 %v410_v61, %v410_v61  ;;  %v430_v33 = vsub.f32 %v4021_v5, %v410_v61 }
  0xf1   : > { %v406_v6 = vpop.xlane.xlu1 %405 }
  0xf2   : > { %3474 = vrsqrt.f32 %v432_v63  ;;  %v421_v7 = vsub.f32 %v413_v2, %v417_v60  ;;  %v414_v8 = vmul.f32 0.03125, %v406_v6 }
  0xf4   : > { %v425_v9 = vmax.f32 %v421_v7, 0.0  ;;  %v422_v10 = vsub.f32 %v414_v8, %v418_v3 }
  0xf6   : > { %v433_v11 = vadd.f32 1e-05, %v425_v9  ;;  %v426_v12 = vmax.f32 %v422_v10, 0.0 }
  0xf8   : > { %3476 = vrsqrt.f32 %v433_v11  ;;  %v434_v13 = vadd.f32 1e-05, %v426_v12 }
  0xfa   : > { %3478 = vrsqrt.f32 %v434_v13 }
  0xfb   : > { %v3473_v15 = vpop.eup %3472  ;;  %3480 = vpow2.f32 %v2776_v19 }
  0xfc   : > { %v439_v17 = vmul.f32 %v3473_v15, %v427_v14  ;;  %3482 = vpow2.f32 %v2777_v23 }
  0xfe   : > { %v450_v20 = vmul.f32 %v2742_v16, %v439_v17 }
  0xff   : > { %v3475_v22 = vpop.eup %3474 }
 0x100   : > { %v461_v24 = vadd.f32 %v2743_v18, %v450_v20  ;;  %v440_v25 = vmul.f32 %v3475_v22, %v428_v21 }
 0x102   : > { %v4039_v26 = vmul.f32 1.75, %v461_v24  ;;  %v451_v27 = vmul.f32 %v2742_v16, %v440_v25 }
 0x104   : > { %v462_v29 = vadd.f32 %v2743_v18, %v451_v27  ;;  %v2748_v30 = vadd.f32 2.5, %v4039_v26  ;;  %v2756_v0 = vadd.f32 0.49999982, %v4039_v26  ;;  %v2744_v31 = vadd.f32 3.5, %v4039_v26 }
 0x105   : > { %v3477_v32 = vpop.eup %3476  ;;  %v2752_v1 = vadd.f32 1.5, %v4039_v26  ;;  %v2764_v34 = vadd.f32 -1.5000001, %v4039_v26  ;;  %v2772_v35 = vadd.f32 -3.5, %v4039_v26 }
 0x106   : > { %v4049_v36 = vmul.f32 1.75, %v462_v29  ;;  %v441_v37 = vmul.f32 %v3477_v32, %v429_v28  ;;  %v493_v4 = vmul.f32 %v2748_v30, %v2748_v30  ;;  %v533_v38 = vmul.f32 %v2756_v0, %v2756_v0 }
 0x107   : > { %v3479_v39 = vpop.eup %3478  ;;  %v473_v40 = vmul.f32 %v2744_v31, %v2744_v31  ;;  %v513_v41 = vmul.f32 %v2752_v1, %v2752_v1  ;;  %v4051_v42 = vmul.f32 %v2764_v34, %v2764_v34  ;;  %v4053_v43 = vmul.f32 %v2772_v35, %v2772_v35 }
 0x108   : > { %v452_v44 = vmul.f32 %v2742_v16, %v441_v37  ;;  %v442_v5 = vmul.f32 %v3479_v39, %v430_v33  ;;  %v2749_v45 = vadd.f32 2.5, %v4049_v36  ;;  %v497_v46 = vsub.f32 0.0, %v493_v4  ;;  %v4063_v8 = vpop.eup %3480 }
 0x109   : > { %v2757_v47 = vadd.f32 0.49999982, %v4049_v36  ;;  %v537_v48 = vsub.f32 0.0, %v533_v38  ;;  %v2745_v49 = vadd.f32 3.5, %v4049_v36  ;;  %v477_v50 = vsub.f32 0.0, %v473_v40  ;;  %v4066_v13 = vpop.eup %3482 }
 0x10a   : > { %v463_v51 = vadd.f32 %v2743_v18, %v452_v44  ;;  %v453_v52 = vmul.f32 %v2742_v16, %v442_v5  ;;  %v494_v53 = vmul.f32 %v2749_v45, %v2749_v45  ;;  %v501_v54 = vmul.f32 1.442695, %v497_v46 }
 0x10b   : > { %v534_v55 = vmul.f32 %v2757_v47, %v2757_v47  ;;  %v541_v56 = vmul.f32 1.442695, %v537_v48  ;;  %v474_v57 = vmul.f32 %v2745_v49, %v2745_v49  ;;  %v481_v58 = vmul.f32 1.442695, %v477_v50 }
 0x10c   : > { %v4058_v59 = vmul.f32 1.75, %v463_v51  ;;  %v464_v60 = vadd.f32 %v2743_v18, %v453_v52  ;;  %v498_v61 = vsub.f32 0.0, %v494_v53  ;;  %3484 = vpow2.f32 %v501_v54 }
 0x10d   : > { %v538_v62 = vsub.f32 0.0, %v534_v55  ;;  %3486 = vpow2.f32 %v541_v56  ;;  %v478_v63 = vsub.f32 0.0, %v474_v57  ;;  %v2753_v2 = vadd.f32 1.5, %v4049_v36 }
 0x10e   : > { %v4061_v3 = vmul.f32 1.75, %v464_v60  ;;  %v503_v6 = vmul.f32 1.442695, %v498_v61  ;;  %3488 = vpow2.f32 %v481_v58  ;;  %v517_v7 = vsub.f32 0.0, %v513_v41 }
 0x10f   : > { %v543_v9 = vmul.f32 1.442695, %v538_v62  ;;  %v483_v10 = vmul.f32 1.442695, %v478_v63  ;;  %v514_v11 = vmul.f32 %v2753_v2, %v2753_v2  ;;  %v2750_v12 = vadd.f32 2.5, %v4058_v59 }
 0x110   : > { %3490 = vpow2.f32 %v503_v6  ;;  %v521_v14 = vmul.f32 1.442695, %v517_v7  ;;  %v2751_v15 = vadd.f32 2.5, %v4061_v3  ;;  %v2758_v16 = vadd.f32 0.49999982, %v4058_v59  ;;  %v3362_v7 = vld [vmem:[#allocation5 + $0x138] sm:$0xff]  }
 0x111   : > { %3492 = vpow2.f32 %v543_v9  ;;  %v518_v17 = vsub.f32 0.0, %v514_v11  ;;  %v495_v18 = vmul.f32 %v2750_v12, %v2750_v12  ;;  %v2759_v19 = vadd.f32 0.49999982, %v4061_v3 }
 0x112   : > { %3494 = vpow2.f32 %v483_v10  ;;  %v496_v20 = vmul.f32 %v2751_v15, %v2751_v15  ;;  %v535_v21 = vmul.f32 %v2758_v16, %v2758_v16  ;;  %v2746_v22 = vadd.f32 3.5, %v4058_v59 }
 0x113   : > { %3496 = vpow2.f32 %v521_v14  ;;  %v523_v23 = vmul.f32 1.442695, %v518_v17  ;;  %v499_v24 = vsub.f32 0.0, %v495_v18  ;;  %v536_v25 = vmul.f32 %v2759_v19, %v2759_v19  ;;  %v3363_v18 = vld [vmem:[#allocation5 + $0x1b8] sm:$0xff]  }
 0x114   : > { %v500_v27 = vsub.f32 0.0, %v496_v20  ;;  %v539_v28 = vsub.f32 0.0, %v535_v21  ;;  %v2747_v29 = vadd.f32 3.5, %v4061_v3  ;;  %v475_v30 = vmul.f32 %v2746_v22, %v2746_v22  ;;  %v4084_v20 = vld [vmem:[%s3995_s25 + $0x10] sm:$0xff] }
 0x115   : > { %3498 = vpow2.f32 %v523_v23  ;;  %v505_v0 = vmul.f32 1.442695, %v499_v24  ;;  %v540_v31 = vsub.f32 0.0, %v536_v25  ;;  %v2754_v32 = vadd.f32 1.5, %v4058_v59  ;;  %v3365_v23 = vld [vmem:[#allocation5 + $0x1f0] sm:$0xff]  }
 0x116   : > { %v507_v33 = vmul.f32 1.442695, %v500_v27  ;;  %v545_v1 = vmul.f32 1.442695, %v539_v28  ;;  %v476_v34 = vmul.f32 %v2747_v29, %v2747_v29  ;;  %v479_v35 = vsub.f32 0.0, %v475_v30  ;;  %v3366_v24 = vld [vmem:[#allocation5 + $0x130] sm:$0xff]  }
 0x117   : > { %3500 = vpow2.f32 %v505_v0  ;;  %v547_v37 = vmul.f32 1.442695, %v540_v31  ;;  %v2755_v4 = vadd.f32 1.5, %v4061_v3  ;;  %v515_v38 = vmul.f32 %v2754_v32, %v2754_v32 }
 0x118   : > { %3502 = vpow2.f32 %v507_v33  ;;  %v480_v39 = vsub.f32 0.0, %v476_v34  ;;  %v485_v40 = vmul.f32 1.442695, %v479_v35  ;;  %v2765_v41 = vadd.f32 -1.5000001, %v4049_v36  ;;  %v3367_v34 = vld [vmem:[#allocation5 + $0x1b0] sm:$0xff]  }
 0x119   : > { %v3485_v44 = vpop.eup %3484  ;;  %3504 = vpow2.f32 %v545_v1  ;;  %v516_v5 = vmul.f32 %v2755_v4, %v2755_v4  ;;  %v519_v45 = vsub.f32 0.0, %v515_v38  ;;  %v577_v46 = vsub.f32 0.0, %v4051_v42 }
 0x11a   : > { %v3487_v47 = vpop.eup %3486  ;;  %3506 = vpow2.f32 %v547_v37  ;;  %v487_v48 = vmul.f32 1.442695, %v480_v39  ;;  %v574_v49 = vmul.f32 %v2765_v41, %v2765_v41  ;;  %v2773_v50 = vadd.f32 -3.5, %v4049_v36 }
 0x11b   : > { %v3489_v51 = vpop.eup %3488  ;;  %3508 = vpow2.f32 %v485_v40  ;;  %v520_v52 = vsub.f32 0.0, %v516_v5  ;;  %v525_v53 = vmul.f32 1.442695, %v519_v45  ;;  %v581_v54 = vmul.f32 1.442695, %v577_v46  ;;  %v3370_v40 = vld [vmem:[#allocation5 + $0x128] sm:$0xff]  }
 0x11c   : > { %3510 = vpow2.f32 %v487_v48  ;;  %v578_v55 = vsub.f32 0.0, %v574_v49  ;;  %v614_v56 = vmul.f32 %v2773_v50, %v2773_v50  ;;  %v617_v57 = vsub.f32 0.0, %v4053_v43  ;;  %v3364_v43 = vld [vmem:[#allocation5 + $0x170] sm:$0xff]   ;;  %v3372_v45 = vld [vmem:[#allocation5 + $0x160] sm:$0xff]  }
 0x11d   : > { %v3491_v58 = vpop.eup %3490  ;;  %3512 = vpow2.f32 %v525_v53  ;;  %v527_v60 = vmul.f32 1.442695, %v520_v52  ;;  %v2760_v10 = vadd.f32 -0.5000002, %v4039_v26  ;;  %v2761_v15 = vadd.f32 -0.5000002, %v4049_v36 }
 0x11e   : > { %v3493_v42 = vpop.eup %3492  ;;  %v658_v61 = vpack.c.bf16 %v3491_v58, %v3485_v44  ;;  %3514 = vpow2.f32 %v581_v54  ;;  %v583_v62 = vmul.f32 1.442695, %v578_v55  ;;  %v618_v63 = vsub.f32 0.0, %v614_v56  ;;  %v3371_v53 = vld [vmem:[#allocation5 + $0x1a8] sm:$0xff]   ;;  %v3373_v58 = vld [vmem:[#allocation5 + $0x1e0] sm:$0xff]  }
 0x11f   : > { %v3495_v2 = vpop.eup %3494  ;;  %v660_v6 = vpack.c.bf16 %v3493_v42, %v3487_v47  ;;  %3516 = vpow2.f32 %v527_v60  ;;  %v621_v9 = vmul.f32 1.442695, %v617_v57  ;;  %v2769_v16 = vadd.f32 -2.5000005, %v4049_v36  ;;  %v3368_v36 = vld [vmem:[#allocation5 + $0x168] sm:$0xff]   ;;  %v3374_v60 = vld [vmem:[#allocation5 + $0x120] sm:$0xff]  }
 0x120   : > { %v3497_v11 = vpop.eup %3496  ;;  %1290 = vmatprep.mubr.bf16.mxu0 %v658_v61  ;;  %v657_v12 = vpack.c.bf16 %v3495_v2, %v3489_v51  ;;  %3518 = vpow2.f32 %v583_v62  ;;  %v623_v14 = vmul.f32 1.442695, %v618_v63  ;;  %v2767_v19 = vadd.f32 -1.5000001, %v4061_v3 }
 0x121   : > { %1339 = vmatprep.mubr.bf16.mxu1 %v660_v6  ;;  %3520 = vpow2.f32 %v621_v9  ;;  %v2778_v21 = vmul.f32 -1.442695, %v4084_v20  ;;  %v553_v25 = vmul.f32 %v2760_v10, %v2760_v10  ;;  %v2766_v27 = vadd.f32 -1.5000001, %v4058_v59 }
 0x122   : > { %v3499_v17 = vpop.eup %3498  ;;  %1291 = vmatmul.mubr.bf16.vlgmr.msra.gmra.mxu0 %v657_v12  ;;  %3522 = vpow2.f32 %v623_v14  ;;  %v554_v29 = vmul.f32 %v2761_v15, %v2761_v15  ;;  %v2768_v30 = vadd.f32 -2.5000005, %v4039_v26  ;;  %v641_v31 = vadd.f32 1.0, %v4063_v8  ;;  %v3369_v26 = vld [vmem:[#allocation5 + $0x1e8] sm:$0xff]  }
 0x123   : > { %v659_v22 = vpack.c.bf16 %v3499_v17, %v3497_v11  ;;  %3028 = vmatpush3.bf16.msra.mxu0 %v3362_v7  ;;  %v594_v32 = vmul.f32 %v2769_v16, %v2769_v16  ;;  %v2775_v33 = vadd.f32 -3.5, %v4061_v3  ;;  %v576_v37 = vmul.f32 %v2767_v19, %v2767_v19  ;;  %v3376_v11 = vld [vmem:[#allocation5 + $0x158] sm:$0xff]   ;;  %v3375_v17 = vld [vmem:[#allocation5 + $0x1a0] sm:$0xff]  }
 0x124   : > { %v3501_v28 = vpop.eup %3500  ;;  %3029 = vmatprep.subr.bf16.mxu0 %v3364_v43  ;;  %v2774_v4 = vadd.f32 -3.5, %v4058_v59  ;;  %v642_v39 = vadd.f32 1.0, %v4066_v13  ;;  %3524 = vpow2.f32 %v2778_v21  ;;  %v557_v8 = vsub.f32 0.0, %v553_v25 }
 0x125   : > { %v3503_v0 = vpop.eup %3502  ;;  %1340 = vmatmul.mubr.bf16.vlgmr.msra.gmra.mxu1 %v659_v22  ;;  %v575_v41 = vmul.f32 %v2766_v27, %v2766_v27  ;;  %v558_v46 = vsub.f32 0.0, %v554_v29  ;;  %v593_v47 = vmul.f32 %v2768_v30, %v2768_v30  ;;  %v616_v48 = vmul.f32 %v2775_v33, %v2775_v33  ;;  %v3378_v27 = vld [vmem:[#allocation5 + $0x118] sm:$0xff]  }
 0x126   : > { %v3505_v1 = vpop.eup %3504  ;;  %3056 = vmatpush3.bf16.msra.mxu1 %v3363_v18  ;;  %v667_v35 = vpack.c.bf16 %v3503_v0, %v3501_v28  ;;  %3526 = vrcp.f32 %v641_v31  ;;  %v598_v50 = vsub.f32 0.0, %v594_v32  ;;  %v2763_v13 = vadd.f32 -0.5000002, %v4061_v3  ;;  %v3380_v28 = vld [vmem:[#allocation5 + $0x150] sm:$0xff]   ;;  %v3379_v0 = vld [vmem:[#allocation5 + $0x198] sm:$0xff]  }
 0x127   : > { %v3507_v38 = vpop.eup %3506  ;;  %3057 = vmatprep.subr.bf16.mxu1 %v3365_v23  ;;  %3030 = vmatpush3.bf16.msra.mxu0 %v3366_v24  ;;  %v580_v54 = vsub.f32 0.0, %v576_v37  ;;  %v615_v55 = vmul.f32 %v2774_v4, %v2774_v4  ;;  %v2762_v56 = vadd.f32 -0.5000002, %v4058_v59  ;;  %3528 = vrcp.f32 %v642_v39  ;;  %v3377_v23 = vld [vmem:[#allocation5 + $0x1d8] sm:$0xff]   ;;  %v3382_v4 = vld [vmem:[#allocation5 + $0x110] sm:$0xff]  }
 0x128   : > { %v3509_v44 = vpop.eup %3508  ;;  %1298 = vmatprep.mubr.bf16.mxu0 %v667_v35  ;;  %v669_v5 = vpack.c.bf16 %v3507_v38, %v3505_v1  ;;  %3031 = vmatprep.subr.bf16.mxu0 %v3368_v36  ;;  %v561_v42 = vmul.f32 1.442695, %v557_v8  ;;  %v579_v61 = vsub.f32 0.0, %v575_v41  ;;  %v563_v63 = vmul.f32 1.442695, %v558_v46  ;;  %v4098_v33 = vld [vmem:[%s3995_s25 + $0x18] sm:$0xff] }
 0x129   : > { %v3511_v49 = vpop.eup %3510  ;;  %v597_v2 = vsub.f32 0.0, %v593_v47  ;;  %v620_v6 = vsub.f32 0.0, %v616_v48  ;;  %v2771_v7 = vadd.f32 -2.5000005, %v4061_v3  ;;  %v603_v12 = vmul.f32 1.442695, %v598_v50 }
 0x12a   : > { %v3513_v51 = vpop.eup %3512  ;;  %3058 = vmatpush3.bf16.msra.mxu1 %v3367_v34  ;;  %1347 = vmatprep.mubr.bf16.mxu1 %v669_v5  ;;  %v666_v52 = vpack.c.bf16 %v3511_v49, %v3509_v44  ;;  %v556_v43 = vmul.f32 %v2763_v13, %v2763_v13  ;;  %v2770_v14 = vadd.f32 -2.5000005, %v4058_v59  ;;  %v587_v18 = vmul.f32 1.442695, %v580_v54  ;;  %v3381_v34 = vld [vmem:[#allocation5 + $0x1d0] sm:$0xff]   ;;  %v3384_v38 = vld [vmem:[#allocation5 + $0x148] sm:$0xff]  }
 0x12b   : > { %v3515_v57 = vpop.eup %3514  ;;  %3059 = vmatprep.subr.bf16.mxu1 %v3369_v26  ;;  %3032 = vmatpush3.bf16.msra.mxu0 %v3370_v40  ;;  %v619_v19 = vsub.f32 0.0, %v615_v55  ;;  %v555_v21 = vmul.f32 %v2762_v56, %v2762_v56  ;;  %3530 = vpow2.f32 %v561_v42  ;;  %v585_v3 = vmul.f32 1.442695, %v579_v61  ;;  %v3383_v8 = vld [vmem:[#allocation5 + $0x190] sm:$0xff]   ;;  %v3385_v44 = vld [vmem:[#allocation5 + $0x1c8] sm:$0xff]   ;;  %v3388_v47 = vld [vmem:[#allocation5 + $0x140] sm:$0xff]  }
 0x12c   : > { %v3517_v62 = vpop.eup %3516  ;;  %1299 = vmatmul.mubr.bf16.gmra.mxu0 %v666_v52  ;;  %3033 = vmatprep.subr.bf16.mxu0 %v3372_v45  ;;  %v596_v24 = vmul.f32 %v2771_v7, %v2771_v7  ;;  %3532 = vpow2.f32 %v563_v63  ;;  %v627_v59 = vmul.f32 1.442695, %v620_v6  ;;  %v601_v36 = vmul.f32 1.442695, %v597_v2  ;;  %v3386_v46 = vld [vmem:[#allocation5 + $0x108] sm:$0xff]   ;;  %v3389_v50 = vld [vmem:[#allocation5 + $0x1c0] sm:$0xff]  }
 0x12d   : > { %v3519_v9 = vpop.eup %3518  ;;  %v668_v10 = vpack.c.bf16 %v3517_v62, %v3513_v51  ;;  %3534 = vpow2.f32 %v603_v12  ;;  %v560_v29 = vsub.f32 0.0, %v556_v43  ;;  %v595_v30 = vmul.f32 %v2770_v14, %v2770_v14  ;;  %v3387_v49 = vld [vmem:[#allocation5 + $0x188] sm:$0xff]   ;;  %v3390_v51 = vld [vmem:[#allocation5 + $0x100] sm:$0xff]   ;;  %v3393_v42 = vld [vmem:[#allocation5 + $0x230] sm:$0xff]  }
 0x12e   : > { %v3521_v15 = vpop.eup %3520  ;;  %3060 = vmatpush3.bf16.msra.mxu1 %v3371_v53  ;;  %v662_v16 = vpack.c.bf16 %v3519_v9, %v3515_v57  ;;  %3536 = vpow2.f32 %v587_v18  ;;  %v625_v31 = vmul.f32 1.442695, %v619_v19  ;;  %v559_v32 = vsub.f32 0.0, %v555_v21  ;;  %v3392_v53 = vld [vmem:[#allocation5 + $0x238] sm:$0xff]   ;;  %v3391_v55 = vld [vmem:[#allocation5 + $0x180] sm:$0xff]   ;;  %v3394_v43 = vld [vmem:[#allocation5 + $0x228] sm:$0xff]  }
 0x12f   : > { %v3523_v22 = vpop.eup %3522  ;;  %1348 = vmatmul.mubr.bf16.gmra.mxu1 %v668_v10  ;;  %3061 = vmatprep.subr.bf16.mxu1 %v3373_v58  ;;  %v2779_v1 = vmul.f32 -1.442695, %v4098_v33  ;;  %3538 = vpow2.f32 %v585_v3  ;;  %v600_v35 = vsub.f32 0.0, %v596_v24  ;;  %v567_v39 = vmul.f32 1.442695, %v560_v29  ;;  %v3650_v9 = vld [vmem:[%s3995_s25] sm:$0xff] }
 0x130   : > { %1388 = vmatprep.mubr.bf16.mxu0 %v662_v16  ;;  %v664_v25 = vpack.c.bf16 %v3523_v22, %v3521_v15  ;;  %3034 = vmatpush3.bf16.msra.mxu0 %v3374_v60  ;;  %3540 = vpow2.f32 %v627_v59  ;;  %v599_v26 = vsub.f32 0.0, %v595_v30  ;;  %v565_v41 = vmul.f32 1.442695, %v559_v32  ;;  %v3395_v22 = vld [vmem:[#allocation5 + $0x220] sm:$0xff]   ;;  %v3396_v24 = vld [vmem:[#allocation5 + $0x218] sm:$0xff]  }
 0x131   : > { %3035 = vmatprep.subr.bf16.mxu0 %v3376_v11  ;;  %v4101_v37 = vpop.eup %3524  ;;  %3542 = vpow2.f32 %v601_v36  ;;  %v607_v5 = vmul.f32 1.442695, %v600_v35  ;;  %v3651_v11 = vld [vmem:[%s3995_s25 + $0x8] sm:$0xff]  ;;  %v3399_v36 = vld [vmem:[#allocation5 + $0x200] sm:$0xff]   ;;  %s379_s25 = scalar_lea.vmem [#allocation8], %s2738_s23 }
 0x132   : > { %1437 = vmatprep.mubr.bf16.mxu1 %v664_v25  ;;  %3062 = vmatpush3.bf16.msra.mxu1 %v3375_v17  ;;  %3544 = vpow2.f32 %v625_v31  ;;  %v605_v48 = vmul.f32 1.442695, %v599_v26  ;;  %v643_v15 = vadd.f32 1.0, %v4101_v37  ;;  %v3397_v25 = vld [vmem:[#allocation5 + $0x210] sm:$0xff]   ;;  %s2637_s15 = sshll.u32 %s379_s25, 4  ;;  %s4210_s15 = int_to_ptr.vmem [resolvable:$true] %s2637_s15 }
 0x133   : > { %3063 = vmatprep.subr.bf16.mxu1 %v3377_v23  ;;  %v3527_v40 = vpop.eup %3526  ;;  %3546 = vpow2.f32 %v2779_v1  ;;  %s3732_s13 = scalar_lea.vmem %s4210_s15, 512  ;;  %p3739_p6 = scmp.lt.s32.totalorder %s4210_s15, %s3737_s29 }
 0x134   : > { %3036 = vmatpush3.bf16.msra.mxu0 %v3378_v27  ;;  %v3529_v45 = vpop.eup %3528  ;;  %3548 = vpow2.f32 %v567_v39  ;;  %v653_v10 = vmul.f32 %v3650_v9, %v3527_v40  ;;  %v3398_v27 = vld [vmem:[#allocation5 + $0x208] sm:$0xff]   ;;  %p3733_p11 = scmp.ne.s32.totalorder %s4210_s15, %s3732_s13  ;;  %p3740_p12 = scmp.lt.s32.totalorder %s3738_s26, %s3732_s13 }
 0x135   : > { %3037 = vmatprep.subr.bf16.mxu0 %v3380_v28  ;;  %3550 = vpow2.f32 %v565_v41  ;;  %v654_v12 = vmul.f32 %v3651_v11, %v3529_v45 }
 0x136   : > { %3064 = vmatpush3.bf16.msra.mxu1 %v3379_v0  ;;  %3552 = vpow2.f32 %v607_v5  ;;  %p3734_p1 = pnand %p3733_p11, %p4288_p10  ;;  %p3741_p7 = por %p3740_p12, %p3739_p6 }
 0x137   : > { %3065 = vmatprep.subr.bf16.mxu1 %v3381_v34  ;;  %3554 = vpow2.f32 %v605_v48  ;;  %v665_v19 = vpack.c.bf16 %v654_v12, %v653_v10 }
 0x138   : > { %3038 = vmatpush3.bf16.msra.mxu0 %v3382_v4  ;;  %v3531_v13 = vpop.eup %3530  ;;  %3556 = vrcp.f32 %v643_v15  ;;  %p3735_p2 = pneg %p3734_p1 }
 0x139   : > { %3039 = vmatprep.subr.bf16.mxu0 %v3384_v38  ;;  %v3533_v52 = vpop.eup %3532 }
 0x13a   : > { %3066 = vmatpush3.bf16.msra.mxu1 %v3383_v8  ;;  %v3535_v54 = vpop.eup %3534  ;;  %v661_v60 = vpack.c.bf16 %v3533_v52, %v3531_v13  ;;  %p3742_p9 = pnand %p3741_p7, %p3735_p2 }
 0x13b   : > { %3067 = vmatprep.subr.bf16.mxu1 %v3385_v44  ;;  %v3537_v56 = vpop.eup %3536 }
 0x13c   : > { %3040 = vmatpush3.bf16.msra.mxu0 %v3386_v46  ;;  %v3539_v57 = vpop.eup %3538 }
 0x13d   : > { %3041 = vmatprep.subr.bf16.mxu0 %v3388_v47  ;;  %v3541_v58 = vpop.eup %3540  ;;  %v671_v62 = vpack.c.bf16 %v3537_v56, %v3539_v57 }
 0x13e   : > { %3068 = vmatpush3.bf16.msra.mxu1 %v3387_v49  ;;  %v3543_v61 = vpop.eup %3542 }
 0x13f   : > { %3069 = vmatprep.subr.bf16.mxu1 %v3389_v50  ;;  %v3545_v63 = vpop.eup %3544  ;;  %v663_v2 = vpack.c.bf16 %v3535_v54, %v3543_v61 }
 0x140   : > { %3042 = vmatpush3.bf16.msra.mxu0 %v3390_v51  ;;  %v3547_v6 = vpop.eup %3546  ;;  %v673_v7 = vpack.c.bf16 %v3541_v58, %v3545_v63  ;;  %v2780_v51 = vld [vmem:[%s4262_s4] ss:$0 sm:$0xff] }
 0x141   : > { %3215 = vmatprep.subr.bf16.mxu0 %v3392_v53  ;;  %v3549_v14 = vpop.eup %3548  ;;  %v644_v17 = vadd.f32 1.0, %v3547_v6 }
 0x142   : > { %3070 = vmatpush3.bf16.msra.mxu1 %v3391_v55  ;;  %v3551_v16 = vpop.eup %3550 }
 0x143   : > { %1389 = vmatmul.mubr.bf16.vlgmr.msra.gmra.mxu0 %v661_v60  ;;  %v3553_v18 = vpop.eup %3552  ;;  %v670_v21 = vpack.c.bf16 %v3549_v14, %v3551_v16  ;;  %3558 = vrcp.f32 %v644_v17 }
 0x144   : > { %1396 = vmatprep.mubr.bf16.mxu0 %v671_v62  ;;  %3216 = vmatpush3.bf16.msra.mxu0 %v3392_v53  ;;  %v3555_v23 = vpop.eup %3554 }
 0x145   : > { %1438 = vmatmul.mubr.bf16.vlgmr.msra.gmra.mxu1 %v663_v2  ;;  %3217 = vmatprep.subr.bf16.mxu0 %v3393_v42  ;;  %v672_v3 = vpack.c.bf16 %v3553_v18, %v3555_v23  ;;  %v3557_v59 = vpop.eup %3556 }
 0x146   : > { %1445 = vmatprep.mubr.bf16.mxu1 %v673_v7  ;;  %v655_v29 = vmul.f32 %v4084_v20, %v3557_v59 }
 0x148   : > { %3218 = vmatpush3.bf16.msra.mxu0 %v3393_v42 }
 0x149   : > { %3219 = vmatprep.subr.bf16.mxu0 %v3394_v43 }
 0x14b   : > { %1397 = vmatmul.mubr.bf16.gmra.mxu0 %v670_v21 }
 0x14c   : > { %3220 = vmatpush3.bf16.msra.mxu0 %v3394_v43  ;;  %3231 = vmatprep.mubr.bf16.mxu0 %v665_v19 }
 0x14d   : > { %1446 = vmatmul.mubr.bf16.gmra.mxu1 %v672_v3  ;;  %3221 = vmatprep.subr.bf16.mxu0 %v3395_v22 }
 0x150   : > { %3222 = vmatpush3.bf16.msra.mxu0 %v3395_v22  ;;  %v3559_v28 = vpop.eup %3558 }
 0x151   : > { %3223 = vmatprep.subr.bf16.mxu0 %v3396_v24  ;;  %v656_v30 = vmul.f32 %v4098_v33, %v3559_v28 }
 0x153   : > { %v674_v0 = vpack.c.bf16 %v656_v30, %v655_v29 }
 0x154   : > { %3224 = vmatpush3.bf16.msra.mxu0 %v3396_v24 }
 0x155   : > { %3225 = vmatprep.subr.bf16.mxu0 %v3397_v25 }
 0x158   : > { %3226 = vmatpush3.bf16.msra.mxu0 %v3397_v25 }
 0x159   : > { %3227 = vmatprep.subr.bf16.mxu0 %v3398_v27 }
 0x15c   : > { %3228 = vmatpush3.bf16.msra.mxu0 %v3398_v27 }
 0x15d   : > { %3229 = vmatprep.subr.bf16.mxu0 %v3399_v36 }
 0x160   : > { %3230 = vmatpush3.bf16.msra.mxu0 %v3399_v36 }
 0x163   : > { %3232 = vmatmul.mubr.bf16.vlgmr.msra.gmra.mxu0 %v674_v0 }
 0x1e2   : > { %v2987_v31 = vpop.f32.mrf.mxu0 }
 0x1e4   : > { %v2988_v32 = vpop.f32.mrf.mxu0 }
 0x1e5   : > { %v3015_v34 = vpop.f32.mrf.mxu1  ;;  %v2989_v13 = vadd.f32 %v2988_v32, %v2987_v31 }
 0x1e6   : > { %v2990_v1 = vpop.f32.mrf.mxu0 }
 0x1e7   : > { %v3016_v37 = vpop.f32.mrf.mxu1  ;;  %v1293_v54 = vadd.f32 %v2989_v13, %v2780_v51  ;;  %v3410_v13 = vld [vmem:[#allocation7 + $0x28] sm:$0xff]  }
 0x1e8   : > { %v2991_v35 = vpop.f32.mrf.mxu0  ;;  %v3017_v57 = vadd.f32 %v3016_v37, %v3015_v34 }
 0x1e9   : > { %v3018_v38 = vpop.f32.mrf.mxu1  ;;  %v2992_v55 = vadd.f32 %v2991_v35, %v2990_v1 }
 0x1ea   : > { %v1342_v42 = vadd.f32 %v3017_v57, %v1293_v54  ;;  %v3414_v54 = vld [vmem:[#allocation7 + $0x20] sm:$0xff]   ;;  %v3417_v57 = vld [vmem:[#allocation7 + $0xd8] sm:$0xff]  }
 0x1eb   : > { %v3019_v26 = vpop.f32.mrf.mxu1  ;;  %v1296_v61 = vadd.f32 %v2992_v55, %v2780_v51  ;;  %v3415_v55 = vld [vmem:[#allocation7 + $0xa0] sm:$0xff]  }
 0x1ec   : > { %v2993_v4 = vpop.f32.mrf.mxu0  ;;  %v3020_v2 = vadd.f32 %v3019_v26, %v3018_v38 }
 0x1ee   : > { %v2994_v39 = vpop.f32.mrf.mxu0  ;;  %v1345_v10 = vadd.f32 %v3020_v2, %v1296_v61  ;;  %v3421_v61 = vld [vmem:[#allocation7 + $0xd0] sm:$0xff]   ;;  %v3424_v2 = vld [vmem:[#allocation7 + $0x48] sm:$0xff]  }
 0x1ef   : > { %v3021_v8 = vpop.f32.mrf.mxu1  ;;  %v2995_v62 = vadd.f32 %v2994_v39, %v2993_v4 }
 0x1f0   : > { %v2996_v40 = vpop.f32.mrf.mxu0 }
 0x1f1   : > { %v3022_v41 = vpop.f32.mrf.mxu1  ;;  %v1301_v11 = vadd.f32 %v2995_v62, %v2780_v51  ;;  %v3422_v62 = vld [vmem:[#allocation7 + $0x10] sm:$0xff]  }
 0x1f2   : > { %v2997_v20 = vpop.f32.mrf.mxu0  ;;  %v3023_v16 = vadd.f32 %v3022_v41, %v3021_v8  ;;  %v3400_v41 = vld [vmem:[#allocation7 + $0x78] sm:$0xff]  }
 0x1f3   : > { %v3024_v44 = vpop.f32.mrf.mxu1  ;;  %v2998_v12 = vadd.f32 %v2997_v20, %v2996_v40  ;;  %3093 = vmatprep.subr.bf16.mxu1 %v3400_v41 }
 0x1f4   : > { %v1350_v22 = vadd.f32 %v3023_v16, %v1301_v11  ;;  %v3429_v11 = vld [vmem:[#allocation7 + $0xc0] sm:$0xff]  }
 0x1f5   : > { %v3025_v45 = vpop.f32.mrf.mxu1  ;;  %v1304_v23 = vadd.f32 %v2998_v12, %v2780_v51  ;;  %v3411_v51 = vld [vmem:[#allocation7 + $0xa8] sm:$0xff]   ;;  %v3430_v12 = vld [vmem:[#allocation7] sm:$0xff]  }
 0x1f6   : > { %v3026_v59 = vadd.f32 %v3025_v45, %v3024_v44  ;;  %v3402_v44 = vld [vmem:[#allocation7 + $0x38] sm:$0xff]   ;;  %v3404_v45 = vld [vmem:[#allocation7 + $0x70] sm:$0xff]  }
 0x1f7   : > { %3094 = vmatpush3.bf16.msra.mxu1 %v3402_v44 }
 0x1f8   : > { %v1353_v0 = vadd.f32 %v3026_v59, %v1304_v23  ;;  %3095 = vmatprep.subr.bf16.mxu1 %v3404_v45 }
 0x203   : > { %v3043_v33 = vpop.f32.mrf.mxu0 }
 0x205   : > { %v3044_v5 = vpop.f32.mrf.mxu0  ;;  %v3071_v47 = vpop.f32.mrf.mxu1 }
 0x206   : > { %v3045_v58 = vadd.f32 %v3044_v5, %v3043_v33  ;;  %v3401_v33 = vld [vmem:[#allocation7 + $0xf8] sm:$0xff]  }
 0x207   : > { %v3046_v46 = vpop.f32.mrf.mxu0  ;;  %v3072_v49 = vpop.f32.mrf.mxu1  ;;  %v3403_v5 = vld [vmem:[#allocation7 + $0xb8] sm:$0xff]   ;;  %3121 = vmatprep.subr.bf16.mxu0 %v3401_v33 }
 0x208   : > { %v1391_v6 = vadd.f32 %v3045_v58, %v1342_v42  ;;  %v3073_v43 = vadd.f32 %v3072_v49, %v3071_v47  ;;  %3122 = vmatpush3.bf16.msra.mxu0 %v3403_v5  ;;  %v3406_v47 = vld [vmem:[#allocation7 + $0x30] sm:$0xff]   ;;  %v3408_v49 = vld [vmem:[#allocation7 + $0x68] sm:$0xff]   ;;  %v3418_v58 = vld [vmem:[#allocation7 + $0x18] sm:$0xff]  }
 0x209   : > { %v3047_v48 = vpop.f32.mrf.mxu0  ;;  %v3074_v52 = vpop.f32.mrf.mxu1  ;;  %3096 = vmatpush3.bf16.msra.mxu1 %v3406_v47  ;;  %v3420_v42 = vld [vmem:[#allocation7 + $0x50] sm:$0xff]  }
 0x20a   : > { %v3048_v7 = vadd.f32 %v3047_v48, %v3046_v46  ;;  %v1440_v19 = vadd.f32 %v3073_v43, %v1391_v6  ;;  %v3405_v46 = vld [vmem:[#allocation7 + $0xf0] sm:$0xff]   ;;  %3097 = vmatprep.subr.bf16.mxu1 %v3408_v49  ;;  %v3425_v6 = vld [vmem:[#allocation7 + $0xc8] sm:$0xff]   ;;  %v3431_v43 = vld [vmem:[#allocation7 + $0x80] sm:$0xff]  }
 0x20b   : > { %v3049_v50 = vpop.f32.mrf.mxu0  ;;  %v3075_v56 = vpop.f32.mrf.mxu1  ;;  %v3407_v48 = vld [vmem:[#allocation7 + $0xb0] sm:$0xff]   ;;  %3123 = vmatprep.subr.bf16.mxu0 %v3405_v46  ;;  %v2853_v49 = vld [vmem:[%s4263_s5] ss:$0 sm:$0xff] }
 0x20c   : > { %v1394_v17 = vadd.f32 %v3048_v7, %v1345_v10  ;;  %v3076_v3 = vadd.f32 %v3075_v56, %v3074_v52  ;;  %3124 = vmatpush3.bf16.msra.mxu0 %v3407_v48  ;;  %v3412_v52 = vld [vmem:[#allocation7 + $0x60] sm:$0xff]   ;;  %v3416_v56 = vld [vmem:[#allocation7 + $0x58] sm:$0xff]   ;;  %v3426_v7 = vld [vmem:[#allocation7 + $0x8] sm:$0xff]  }
 0x20d   : > { %v3050_v53 = vpop.f32.mrf.mxu0  ;;  %v3077_v63 = vpop.f32.mrf.mxu1  ;;  %3098 = vmatpush3.bf16.msra.mxu1 %v3410_v13  ;;  %v3428_v10 = vld [vmem:[#allocation7 + $0x40] sm:$0xff]  }
 0x20e   : > { %v3051_v18 = vadd.f32 %v3050_v53, %v3049_v50  ;;  %v1443_v29 = vadd.f32 %v3076_v3, %v1394_v17  ;;  %v3409_v50 = vld [vmem:[#allocation7 + $0xe8] sm:$0xff]   ;;  %v3413_v53 = vld [vmem:[#allocation7 + $0xe0] sm:$0xff]   ;;  %3099 = vmatprep.subr.bf16.mxu1 %v3412_v52 }
 0x20f   : > { %v3052_v60 = vpop.f32.mrf.mxu0  ;;  %v3078_v14 = vpop.f32.mrf.mxu1  ;;  %3125 = vmatprep.subr.bf16.mxu0 %v3409_v50  ;;  %v2854_v13 = vld [vmem:[%s4264_s6] ss:$0 sm:$0xff] }
 0x210   : > { %v1399_v28 = vadd.f32 %v3051_v18, %v1350_v22  ;;  %v3079_v31 = vadd.f32 %v3078_v14, %v3077_v63  ;;  %3126 = vmatpush3.bf16.msra.mxu0 %v3411_v51  ;;  %v3423_v63 = vld [vmem:[#allocation7 + $0x90] sm:$0xff]   ;;  %v3432_v14 = vld [vmem:[#allocation7 + $0x178] sm:$0xff]  }
 0x211   : > { %v3053_v9 = vpop.f32.mrf.mxu0  ;;  %v3080_v25 = vpop.f32.mrf.mxu1  ;;  %3127 = vmatprep.subr.bf16.mxu0 %v3413_v53  ;;  %3100 = vmatpush3.bf16.msra.mxu1 %v3414_v54 }
 0x212   : > { %v3054_v36 = vadd.f32 %v3053_v9, %v3052_v60  ;;  %v1448_v37 = vadd.f32 %v3079_v31, %v1399_v28  ;;  %v3419_v60 = vld [vmem:[#allocation7 + $0x98] sm:$0xff]   ;;  %3101 = vmatprep.subr.bf16.mxu1 %v3416_v56  ;;  %v3427_v9 = vld [vmem:[#allocation7 + $0x88] sm:$0xff]  }
 0x213   : > { %v3081_v34 = vpop.f32.mrf.mxu1 }
 0x214   : > { %v1402_v35 = vadd.f32 %v3054_v36, %v1353_v0  ;;  %v3082_v4 = vadd.f32 %v3081_v34, %v3080_v25  ;;  %3128 = vmatpush3.bf16.msra.mxu0 %v3415_v55 }
 0x215   : > { %3129 = vmatprep.subr.bf16.mxu0 %v3417_v57  ;;  %3102 = vmatpush3.bf16.msra.mxu1 %v3418_v58 }
 0x216   : > { %v1451_v26 = vadd.f32 %v3082_v4, %v1402_v35  ;;  %3103 = vmatprep.subr.bf16.mxu1 %v3420_v42 }
 0x218   : > { %3130 = vmatpush3.bf16.msra.mxu0 %v3419_v60 }
 0x219   : > { %3131 = vmatprep.subr.bf16.mxu0 %v3421_v61  ;;  %3104 = vmatpush3.bf16.msra.mxu1 %v3422_v62 }
 0x21a   : > { %3105 = vmatprep.subr.bf16.mxu1 %v3424_v2 }
 0x21c   : > { %3132 = vmatpush3.bf16.msra.mxu0 %v3423_v63 }
 0x21d   : > { %3133 = vmatprep.subr.bf16.mxu0 %v3425_v6  ;;  %3106 = vmatpush3.bf16.msra.mxu1 %v3426_v7 }
 0x21e   : > { %3107 = vmatprep.subr.bf16.mxu1 %v3428_v10 }
 0x220   : > { %3134 = vmatpush3.bf16.msra.mxu0 %v3427_v9 }
 0x221   : > { %3135 = vmatprep.subr.bf16.mxu0 %v3429_v11  ;;  %3108 = vmatpush3.bf16.msra.mxu1 %v3430_v12 }
 0x222   : > { %3149 = vmatprep.subr.bf16.mxu1 %v3432_v14 }
 0x223   : > { %v3233_v15 = vpop.f32.mrf.mxu0 }
 0x224   : > { %v4119_v38 = vadd.f32 %v3233_v15, %v1448_v37  ;;  %v3433_v15 = vld [vmem:[#allocation7 + $0x1f8] sm:$0xff]   ;;  %3136 = vmatpush3.bf16.msra.mxu0 %v3431_v43 }
 0x225   : > { %v1488_v21 = vpop.f32.mrf.mxu0  ;;  %3177 = vmatprep.subr.bf16.mxu0 %v3433_v15 }
 0x226   : > { %v4111_v24 = vadd.f32 %v1488_v21, %v1440_v19  ;;  %v1513_v8 = vmul.f32 %v4119_v38, %v4119_v38 }
 0x227   : > { %v3234_v27 = vpop.f32.mrf.mxu0 }
 0x228   : > { %1503 = vadd.xlane.f32.xlu0 %v4111_v24  ;;  %v1511_v1 = vmul.f32 %v4111_v24, %v4111_v24  ;;  %v4124_v40 = vadd.f32 %v3234_v27, %v1451_v26  ;;  %v2887_v54 = vmul.f32 -1.442695, %v4111_v24 }
 0x229   : > { %v1491_v30 = vpop.f32.mrf.mxu0 }
 0x22a   : > { %v4114_v32 = vadd.f32 %v1491_v30, %v1443_v29  ;;  %v1514_v20 = vmul.f32 %v4124_v40, %v4124_v40 }
 0x22c   : > { %1505 = vadd.xlane.f32.xlu1 %v4114_v32  ;;  %1515 = vadd.xlane.f32.xlu0 %v1511_v1  ;;  %v1512_v39 = vmul.f32 %v4114_v32, %v4114_v32  ;;  %v2888_v61 = vmul.f32 -1.442695, %v4114_v32 }
 0x230   : > { %1517 = vadd.xlane.f32.xlu1 %v1512_v39  ;;  %1507 = vadd.xlane.f32.xlu0 %v4119_v38 }
 0x234   : > { %1509 = vadd.xlane.f32.xlu1 %v4124_v40  ;;  %1519 = vadd.xlane.f32.xlu0 %v1513_v8 }
 0x238   : > { %1521 = vadd.xlane.f32.xlu1 %v1514_v20 }
 0x2b1   : > { %v1504_v16 = vpop.xlane.xlu0 %1503 }
 0x2b2   : > { %v1523_v17 = vmul.f32 0.015625, %v1504_v16 }
 0x2b4   : > { %v1531_v21 = vmul.f32 %v1523_v17, %v1523_v17  ;;  %v1543_v47 = vsub.f32 %v4111_v24, %v1523_v17 }
 0x2b5   : > { %v1506_v18 = vpop.xlane.xlu1 %1505  ;;  %v1516_v19 = vpop.xlane.xlu0 %1515 }
 0x2b6   : > { %v1524_v22 = vmul.f32 0.015625, %v1506_v18  ;;  %v1527_v23 = vmul.f32 0.015625, %v1516_v19 }
 0x2b8   : > { %v1535_v3 = vsub.f32 %v1527_v23, %v1531_v21  ;;  %v1532_v59 = vmul.f32 %v1524_v22, %v1524_v22  ;;  %v1544_v51 = vsub.f32 %v4114_v32, %v1524_v22 }
 0x2b9   : > { %v1518_v25 = vpop.xlane.xlu1 %1517  ;;  %v1508_v27 = vpop.xlane.xlu0 %1507 }
 0x2ba   : > { %v1539_v28 = vmax.f32 %v1535_v3, 0.0  ;;  %v1528_v36 = vmul.f32 0.015625, %v1518_v25  ;;  %v1525_v29 = vmul.f32 0.015625, %v1508_v27 }
 0x2bc   : > { %v1547_v30 = vadd.f32 1e-05, %v1539_v28  ;;  %v1536_v0 = vsub.f32 %v1528_v36, %v1532_v59  ;;  %v1533_v31 = vmul.f32 %v1525_v29, %v1525_v29  ;;  %v1545_v60 = vsub.f32 %v4119_v38, %v1525_v29 }
 0x2bd   : > { %v1510_v1 = vpop.xlane.xlu1 %1509  ;;  %v1520_v34 = vpop.xlane.xlu0 %1519 }
 0x2be   : > { %3560 = vrsqrt.f32 %v1547_v30  ;;  %v1540_v35 = vmax.f32 %v1536_v0, 0.0  ;;  %v1526_v37 = vmul.f32 0.015625, %v1510_v1  ;;  %v1529_v4 = vmul.f32 0.015625, %v1520_v34 }
 0x2c0   : > { %v1548_v39 = vadd.f32 1e-05, %v1540_v35  ;;  %v1537_v26 = vsub.f32 %v1529_v4, %v1533_v31  ;;  %v1534_v20 = vmul.f32 %v1526_v37, %v1526_v37  ;;  %v1546_v62 = vsub.f32 %v4124_v40, %v1526_v37 }
 0x2c1   : > { %v1522_v8 = vpop.xlane.xlu1 %1521 }
 0x2c2   : > { %3562 = vrsqrt.f32 %v1548_v39  ;;  %v1541_v41 = vmax.f32 %v1537_v26, 0.0  ;;  %v1530_v33 = vmul.f32 0.015625, %v1522_v8 }
 0x2c4   : > { %v1549_v44 = vadd.f32 1e-05, %v1541_v41  ;;  %v1538_v5 = vsub.f32 %v1530_v33, %v1534_v20 }
 0x2c6   : > { %3564 = vrsqrt.f32 %v1549_v44  ;;  %v1542_v45 = vmax.f32 %v1538_v5, 0.0 }
 0x2c8   : > { %v1550_v46 = vadd.f32 1e-05, %v1542_v45 }
 0x2ca   : > { %3566 = vrsqrt.f32 %v1550_v46 }
 0x2cb   : > { %v3561_v48 = vpop.eup %3560  ;;  %3568 = vpow2.f32 %v2887_v54 }
 0x2cc   : > { %v1555_v50 = vmul.f32 %v3561_v48, %v1543_v47  ;;  %3570 = vpow2.f32 %v2888_v61 }
 0x2ce   : > { %v1566_v52 = vmul.f32 %v2853_v49, %v1555_v50 }
 0x2cf   : > { %v3563_v53 = vpop.eup %3562 }
 0x2d0   : > { %v1577_v55 = vadd.f32 %v2854_v13, %v1566_v52  ;;  %v1556_v56 = vmul.f32 %v3563_v53, %v1544_v51 }
 0x2d2   : > { %v4140_v57 = vmul.f32 1.75, %v1577_v55  ;;  %v1567_v58 = vmul.f32 %v2853_v49, %v1556_v56 }
 0x2d3   : > { %v3565_v42 = vpop.eup %3564 }
 0x2d4   : > { %v1578_v63 = vadd.f32 %v2854_v13, %v1567_v58  ;;  %v1557_v2 = vmul.f32 %v3565_v42, %v1545_v60  ;;  %v2859_v6 = vadd.f32 2.5, %v4140_v57  ;;  %v2867_v7 = vadd.f32 0.49999982, %v4140_v57 }
 0x2d5   : > { %v2855_v9 = vadd.f32 3.5, %v4140_v57  ;;  %v2863_v10 = vadd.f32 1.5, %v4140_v57  ;;  %v2875_v11 = vadd.f32 -1.5000001, %v4140_v57  ;;  %v2883_v12 = vadd.f32 -3.5, %v4140_v57 }
 0x2d6   : > { %v4151_v43 = vmul.f32 1.75, %v1578_v63  ;;  %v1568_v14 = vmul.f32 %v2853_v49, %v1557_v2  ;;  %v1609_v15 = vmul.f32 %v2859_v6, %v2859_v6  ;;  %v1649_v16 = vmul.f32 %v2867_v7, %v2867_v7 }
 0x2d7   : > { %v3567_v17 = vpop.eup %3566  ;;  %v1589_v18 = vmul.f32 %v2855_v9, %v2855_v9  ;;  %v1629_v19 = vmul.f32 %v2863_v10, %v2863_v10  ;;  %v4153_v21 = vmul.f32 %v2875_v11, %v2875_v11  ;;  %v4158_v31 = vmul.f32 %v2883_v12, %v2883_v12 }
 0x2d8   : > { %v1579_v22 = vadd.f32 %v2854_v13, %v1568_v14  ;;  %v1558_v23 = vmul.f32 %v3567_v17, %v1546_v62  ;;  %v2860_v3 = vadd.f32 2.5, %v4151_v43  ;;  %v1613_v25 = vsub.f32 0.0, %v1609_v15 }
 0x2d9   : > { %v2868_v27 = vadd.f32 0.49999982, %v4151_v43  ;;  %v1653_v59 = vsub.f32 0.0, %v1649_v16  ;;  %v2856_v28 = vadd.f32 3.5, %v4151_v43  ;;  %v1593_v36 = vsub.f32 0.0, %v1589_v18 }
 0x2da   : > { %v1569_v29 = vmul.f32 %v2853_v49, %v1558_v23  ;;  %v1610_v30 = vmul.f32 %v2860_v3, %v2860_v3  ;;  %v1617_v0 = vmul.f32 1.442695, %v1613_v25  ;;  %v4160_v4 = vmul.f32 1.75, %v1579_v22  ;;  %v4165_v49 = vpop.eup %3568 }
 0x2db   : > { %v1650_v1 = vmul.f32 %v2868_v27, %v2868_v27  ;;  %v1657_v34 = vmul.f32 1.442695, %v1653_v59  ;;  %v1590_v35 = vmul.f32 %v2856_v28, %v2856_v28  ;;  %v1597_v37 = vmul.f32 1.442695, %v1593_v36  ;;  %v4173_v62 = vpop.eup %3570 }
 0x2dc   : > { %v1580_v39 = vadd.f32 %v2854_v13, %v1569_v29  ;;  %v1614_v26 = vsub.f32 0.0, %v1610_v30  ;;  %v2864_v8 = vadd.f32 1.5, %v4151_v43  ;;  %3572 = vpow2.f32 %v1617_v0 }
 0x2dd   : > { %v1654_v20 = vsub.f32 0.0, %v1650_v1  ;;  %v1594_v41 = vsub.f32 0.0, %v1590_v35  ;;  %v1633_v33 = vsub.f32 0.0, %v1629_v19  ;;  %3574 = vpow2.f32 %v1657_v34 }
 0x2de   : > { %v4163_v44 = vmul.f32 1.75, %v1580_v39  ;;  %v1619_v5 = vmul.f32 1.442695, %v1614_v26  ;;  %v1630_v45 = vmul.f32 %v2864_v8, %v2864_v8  ;;  %3576 = vpow2.f32 %v1597_v37 }
 0x2df   : > { %v1659_v46 = vmul.f32 1.442695, %v1654_v20  ;;  %v1599_v47 = vmul.f32 1.442695, %v1594_v41  ;;  %v1637_v48 = vmul.f32 1.442695, %v1633_v33 }
 0x2e0   : > { %3578 = vpow2.f32 %v1619_v5  ;;  %v1634_v50 = vsub.f32 0.0, %v1630_v45  ;;  %v2861_v13 = vadd.f32 2.5, %v4160_v4  ;;  %v2862_v51 = vadd.f32 2.5, %v4163_v44 }
 0x2e1   : > { %3580 = vpow2.f32 %v1659_v46  ;;  %v2869_v52 = vadd.f32 0.49999982, %v4160_v4  ;;  %v2870_v53 = vadd.f32 0.49999982, %v4163_v44  ;;  %v2857_v54 = vadd.f32 3.5, %v4160_v4 }
 0x2e2   : > { %3582 = vpow2.f32 %v1599_v47  ;;  %v1639_v55 = vmul.f32 1.442695, %v1634_v50  ;;  %v1611_v56 = vmul.f32 %v2861_v13, %v2861_v13  ;;  %v1612_v58 = vmul.f32 %v2862_v51, %v2862_v51  ;;  %v3434_v13 = vld [vmem:[#allocation7 + $0x138] sm:$0xff]  }
 0x2e3   : > { %3584 = vpow2.f32 %v1637_v48  ;;  %v1651_v60 = vmul.f32 %v2869_v52, %v2869_v52  ;;  %v1652_v42 = vmul.f32 %v2870_v53, %v2870_v53  ;;  %v2858_v61 = vadd.f32 3.5, %v4163_v44  ;;  %v3436_v53 = vld [vmem:[#allocation7 + $0x170] sm:$0xff]  }
 0x2e4   : > { %3586 = vpow2.f32 %v1639_v55  ;;  %v1615_v63 = vsub.f32 0.0, %v1611_v56  ;;  %v1616_v2 = vsub.f32 0.0, %v1612_v58  ;;  %v1591_v6 = vmul.f32 %v2857_v54, %v2857_v54  ;;  %v3435_v56 = vld [vmem:[#allocation7 + $0x1b8] sm:$0xff]  }
 0x2e5   : > { %v1655_v7 = vsub.f32 0.0, %v1651_v60  ;;  %v1656_v9 = vsub.f32 0.0, %v1652_v42  ;;  %v1592_v10 = vmul.f32 %v2858_v61, %v2858_v61  ;;  %v2865_v11 = vadd.f32 1.5, %v4160_v4  ;;  %v3437_v42 = vld [vmem:[#allocation7 + $0x1f0] sm:$0xff]  }
 0x2e6   : > { %v1621_v12 = vmul.f32 1.442695, %v1615_v63  ;;  %v1623_v14 = vmul.f32 1.442695, %v1616_v2  ;;  %v1595_v15 = vsub.f32 0.0, %v1591_v6  ;;  %v2866_v16 = vadd.f32 1.5, %v4163_v44 }
 0x2e7   : > { %v1661_v17 = vmul.f32 1.442695, %v1655_v7  ;;  %v1663_v18 = vmul.f32 1.442695, %v1656_v9  ;;  %v1596_v19 = vsub.f32 0.0, %v1592_v10  ;;  %v1631_v22 = vmul.f32 %v2865_v11, %v2865_v11  ;;  %v3438_v2 = vld [vmem:[#allocation7 + $0x130] sm:$0xff]  }
 0x2e8   : > { %3588 = vpow2.f32 %v1621_v12  ;;  %v1601_v23 = vmul.f32 1.442695, %v1595_v15  ;;  %v1632_v3 = vmul.f32 %v2866_v16, %v2866_v16  ;;  %v2876_v25 = vadd.f32 -1.5000001, %v4151_v43  ;;  %v3440_v10 = vld [vmem:[#allocation7 + $0x168] sm:$0xff]  }
 0x2e9   : > { %3590 = vpow2.f32 %v1623_v14  ;;  %v1603_v27 = vmul.f32 1.442695, %v1596_v19  ;;  %v1635_v59 = vsub.f32 0.0, %v1631_v22  ;;  %v1693_v28 = vsub.f32 0.0, %v4153_v21  ;;  %v3573_v36 = vpop.eup %3572  ;;  %v3439_v14 = vld [vmem:[#allocation7 + $0x1b0] sm:$0xff]  }
 0x2ea   : > { %3592 = vpow2.f32 %v1661_v17  ;;  %v1636_v29 = vsub.f32 0.0, %v1632_v3  ;;  %v1690_v30 = vmul.f32 %v2876_v25, %v2876_v25  ;;  %v2884_v0 = vadd.f32 -3.5, %v4151_v43  ;;  %v3575_v1 = vpop.eup %3574 }
 0x2eb   : > { %3594 = vpow2.f32 %v1663_v18  ;;  %v1641_v34 = vmul.f32 1.442695, %v1635_v59  ;;  %v1697_v35 = vmul.f32 1.442695, %v1693_v28  ;;  %v1733_v37 = vsub.f32 0.0, %v4158_v31  ;;  %v3577_v39 = vpop.eup %3576 }
 0x2ec   : > { %3596 = vpow2.f32 %v1601_v23  ;;  %v1643_v26 = vmul.f32 1.442695, %v1636_v29  ;;  %v1694_v8 = vsub.f32 0.0, %v1690_v30  ;;  %v1730_v20 = vmul.f32 %v2884_v0, %v2884_v0  ;;  %v3444_v30 = vld [vmem:[#allocation7 + $0x160] sm:$0xff]  }
 0x2ed   : > { %v3579_v41 = vpop.eup %3578  ;;  %3598 = vpow2.f32 %v1603_v27  ;;  %v1737_v21 = vmul.f32 1.442695, %v1733_v37  ;;  %v2871_v33 = vadd.f32 -0.5000002, %v4140_v57  ;;  %v2872_v31 = vadd.f32 -0.5000002, %v4151_v43 }
 0x2ee   : > { %v3581_v5 = vpop.eup %3580  ;;  %v1774_v45 = vpack.c.bf16 %v3579_v41, %v3573_v36  ;;  %3600 = vpow2.f32 %v1641_v34  ;;  %v1699_v46 = vmul.f32 1.442695, %v1694_v8  ;;  %v1734_v47 = vsub.f32 0.0, %v1730_v20  ;;  %v3442_v27 = vld [vmem:[#allocation7 + $0x128] sm:$0xff]   ;;  %v3445_v20 = vld [vmem:[#allocation7 + $0x1e0] sm:$0xff]  }
 0x2ef   : > { %v3583_v48 = vpop.eup %3582  ;;  %v1776_v50 = vpack.c.bf16 %v3581_v5, %v3575_v1  ;;  %3602 = vpow2.f32 %v1643_v26  ;;  %v2880_v58 = vadd.f32 -2.5000005, %v4151_v43  ;;  %v1669_v61 = vmul.f32 %v2871_v33, %v2871_v33 }
 0x2f0   : > { %v3585_v51 = vpop.eup %3584  ;;  %2406 = vmatprep.mubr.bf16.mxu1 %v1774_v45  ;;  %v1773_v52 = vpack.c.bf16 %v3583_v48, %v3577_v39  ;;  %3604 = vpow2.f32 %v1697_v35  ;;  %v1739_v54 = vmul.f32 1.442695, %v1734_v47  ;;  %v2877_v63 = vadd.f32 -1.5000001, %v4160_v4  ;;  %v3443_v35 = vld [vmem:[#allocation7 + $0x1a8] sm:$0xff]   ;;  %v3446_v45 = vld [vmem:[#allocation7 + $0x120] sm:$0xff]  }
 0x2f1   : > { %v3587_v55 = vpop.eup %3586  ;;  %2455 = vmatprep.mubr.bf16.mxu0 %v1776_v50  ;;  %3606 = vpow2.f32 %v1699_v46  ;;  %v1670_v6 = vmul.f32 %v2872_v31, %v2872_v31  ;;  %v2879_v7 = vadd.f32 -2.5000005, %v4140_v57  ;;  %v2889_v9 = vmul.f32 -1.442695, %v4119_v38  ;;  %v3441_v57 = vld [vmem:[#allocation7 + $0x1e8] sm:$0xff]   ;;  %v3448_v46 = vld [vmem:[#allocation7 + $0x158] sm:$0xff]  }
 0x2f2   : > { %2407 = vmatmul.mubr.bf16.vlgmr.msra.gmra.mxu1 %v1773_v52  ;;  %v1775_v60 = vpack.c.bf16 %v3587_v55, %v3585_v51  ;;  %3608 = vpow2.f32 %v1737_v21  ;;  %v1710_v11 = vmul.f32 %v2880_v58, %v2880_v58  ;;  %v2878_v43 = vadd.f32 -1.5000001, %v4163_v44 }
 0x2f3   : > { %3150 = vmatpush3.bf16.msra.mxu1 %v3434_v13  ;;  %3610 = vpow2.f32 %v1739_v54  ;;  %v2885_v15 = vadd.f32 -3.5, %v4160_v4  ;;  %v2886_v16 = vadd.f32 -3.5, %v4163_v44  ;;  %v1758_v18 = vadd.f32 1.0, %v4173_v62 }
 0x2f4   : > { %2456 = vmatmul.mubr.bf16.vlgmr.msra.gmra.mxu0 %v1775_v60  ;;  %3151 = vmatprep.subr.bf16.mxu1 %v3436_v53  ;;  %v1673_v19 = vsub.f32 0.0, %v1669_v61  ;;  %v1691_v22 = vmul.f32 %v2877_v63, %v2877_v63  ;;  %v1692_v23 = vmul.f32 %v2878_v43, %v2878_v43  ;;  %v1674_v59 = vsub.f32 0.0, %v1670_v6  ;;  %v3449_v63 = vld [vmem:[#allocation7 + $0x1d8] sm:$0xff]  }
 0x2f5   : > { %v3589_v12 = vpop.eup %3588  ;;  %3178 = vmatpush3.bf16.msra.mxu0 %v3435_v56  ;;  %v1709_v28 = vmul.f32 %v2879_v7, %v2879_v7  ;;  %v1732_v36 = vmul.f32 %v2886_v16, %v2886_v16  ;;  %3612 = vpow2.f32 %v2889_v9  ;;  %v1714_v0 = vsub.f32 0.0, %v1710_v11  ;;  %v3447_v56 = vld [vmem:[#allocation7 + $0x1a0] sm:$0xff]   ;;  %v3452_v11 = vld [vmem:[#allocation7 + $0x150] sm:$0xff]   ;;  %v3451_v16 = vld [vmem:[#allocation7 + $0x198] sm:$0xff]  }
 0x2f6   : > { %v3591_v17 = vpop.eup %3590  ;;  %3179 = vmatprep.subr.bf16.mxu0 %v3437_v42  ;;  %v2874_v1 = vadd.f32 -0.5000002, %v4163_v44  ;;  %v1696_v37 = vsub.f32 0.0, %v1692_v23  ;;  %v1731_v39 = vmul.f32 %v2885_v15, %v2885_v15  ;;  %v2873_v26 = vadd.f32 -0.5000002, %v4160_v4 }
 0x2f7   : > { %v3593_v3 = vpop.eup %3592  ;;  %3152 = vmatpush3.bf16.msra.mxu1 %v3438_v2  ;;  %v1783_v25 = vpack.c.bf16 %v3591_v17, %v3589_v12  ;;  %3614 = vrcp.f32 %v1758_v18  ;;  %v1677_v41 = vmul.f32 1.442695, %v1673_v19  ;;  %v1695_v21 = vsub.f32 0.0, %v1691_v22  ;;  %v3453_v19 = vld [vmem:[#allocation7 + $0x1d0] sm:$0xff]  }
 0x2f8   : > { %v3595_v29 = vpop.eup %3594  ;;  %3153 = vmatprep.subr.bf16.mxu1 %v3440_v10  ;;  %v1679_v47 = vmul.f32 1.442695, %v1674_v59  ;;  %v1713_v48 = vsub.f32 0.0, %v1709_v28  ;;  %v1736_v50 = vsub.f32 0.0, %v1732_v36  ;;  %v1719_v31 = vmul.f32 1.442695, %v1714_v0 }
 0x2f9   : > { %v3597_v62 = vpop.eup %3596  ;;  %3180 = vmatpush3.bf16.msra.mxu0 %v3439_v14  ;;  %2414 = vmatprep.mubr.bf16.mxu1 %v1783_v25  ;;  %v1785_v34 = vpack.c.bf16 %v3595_v29, %v3593_v3  ;;  %v1672_v51 = vmul.f32 %v2874_v1, %v2874_v1  ;;  %v2881_v52 = vadd.f32 -2.5000005, %v4160_v4  ;;  %v2882_v53 = vadd.f32 -2.5000005, %v4163_v44  ;;  %v3450_v4 = vld [vmem:[#allocation7 + $0x118] sm:$0xff]   ;;  %v3454_v3 = vld [vmem:[#allocation7 + $0x110] sm:$0xff]  }
 0x2fa   : > { %v3599_v8 = vpop.eup %3598  ;;  %3181 = vmatprep.subr.bf16.mxu0 %v3441_v57  ;;  %v1703_v58 = vmul.f32 1.442695, %v1696_v37  ;;  %v1735_v60 = vsub.f32 0.0, %v1731_v39  ;;  %v1671_v42 = vmul.f32 %v2873_v26, %v2873_v26  ;;  %3616 = vpow2.f32 %v1677_v41  ;;  %v3456_v25 = vld [vmem:[#allocation7 + $0x148] sm:$0xff]   ;;  %v3455_v36 = vld [vmem:[#allocation7 + $0x190] sm:$0xff]   ;;  %v3461_v37 = vld [vmem:[#allocation7 + $0x1c0] sm:$0xff]  }
 0x2fb   : > { %v3601_v33 = vpop.eup %3600  ;;  %2463 = vmatprep.mubr.bf16.mxu0 %v1785_v34  ;;  %v1782_v5 = vpack.c.bf16 %v3599_v8, %v3597_v62  ;;  %3154 = vmatpush3.bf16.msra.mxu1 %v3442_v27  ;;  %v1701_v2 = vmul.f32 1.442695, %v1695_v21  ;;  %v1712_v6 = vmul.f32 %v2882_v53, %v2882_v53  ;;  %3618 = vpow2.f32 %v1679_v47  ;;  %v3458_v1 = vld [vmem:[#allocation7 + $0x108] sm:$0xff]   ;;  %v3460_v62 = vld [vmem:[#allocation7 + $0x140] sm:$0xff]   ;;  %v3465_v47 = vld [vmem:[#allocation7 + $0x230] sm:$0xff]  }
 0x2fc   : > { %v3603_v13 = vpop.eup %3602  ;;  %3155 = vmatprep.subr.bf16.mxu1 %v3444_v30  ;;  %v1743_v44 = vmul.f32 1.442695, %v1736_v50  ;;  %v1717_v43 = vmul.f32 1.442695, %v1713_v48  ;;  %3620 = vpow2.f32 %v1719_v31  ;;  %v1676_v12 = vsub.f32 0.0, %v1672_v51  ;;  %v3457_v30 = vld [vmem:[#allocation7 + $0x1c8] sm:$0xff]  }
 0x2fd   : > { %v3605_v54 = vpop.eup %3604  ;;  %2415 = vmatmul.mubr.bf16.gmra.mxu1 %v1782_v5  ;;  %v1784_v55 = vpack.c.bf16 %v3603_v13, %v3601_v33  ;;  %3182 = vmatpush3.bf16.msra.mxu0 %v3443_v35  ;;  %v1711_v14 = vmul.f32 %v2881_v52, %v2881_v52  ;;  %3622 = vpow2.f32 %v1703_v58  ;;  %v1741_v17 = vmul.f32 1.442695, %v1735_v60  ;;  %v3459_v35 = vld [vmem:[#allocation7 + $0x188] sm:$0xff]   ;;  %v3462_v26 = vld [vmem:[#allocation7 + $0x100] sm:$0xff]  }
 0x2fe   : > { %v3607_v61 = vpop.eup %3606  ;;  %3183 = vmatprep.subr.bf16.mxu0 %v3445_v20  ;;  %v1675_v18 = vsub.f32 0.0, %v1671_v42  ;;  %v2890_v57 = vmul.f32 -1.442695, %v4124_v40  ;;  %3624 = vpow2.f32 %v1701_v2  ;;  %v1716_v22 = vsub.f32 0.0, %v1712_v6  ;;  %v3464_v20 = vld [vmem:[#allocation7 + $0x238] sm:$0xff]   ;;  %v3463_v21 = vld [vmem:[#allocation7 + $0x180] sm:$0xff]  }
 0x2ff   : > { %v3609_v7 = vpop.eup %3608  ;;  %2464 = vmatmul.mubr.bf16.gmra.mxu0 %v1784_v55  ;;  %v1778_v9 = vpack.c.bf16 %v3607_v61, %v3605_v54  ;;  %3156 = vmatpush3.bf16.msra.mxu1 %v3446_v45  ;;  %v1757_v23 = vadd.f32 1.0, %v4165_v49  ;;  %3626 = vpow2.f32 %v1743_v44  ;;  %v1683_v27 = vmul.f32 1.442695, %v1676_v12  ;;  %v3466_v54 = vld [vmem:[#allocation7 + $0x228] sm:$0xff]   ;;  %v3467_v2 = vld [vmem:[#allocation7 + $0x220] sm:$0xff]  }
 0x300   : > { %v3611_v10 = vpop.eup %3610  ;;  %3157 = vmatprep.subr.bf16.mxu1 %v3448_v46  ;;  %3628 = vpow2.f32 %v1717_v43  ;;  %v1715_v59 = vsub.f32 0.0, %v1711_v14  ;;  %v1681_v29 = vmul.f32 1.442695, %v1675_v18  ;;  %v1723_v0 = vmul.f32 1.442695, %v1716_v22  ;;  %v3470_v44 = vld [vmem:[#allocation7 + $0x208] sm:$0xff]  }
 0x301   : > { %2504 = vmatprep.mubr.bf16.mxu1 %v1778_v9  ;;  %v1780_v15 = vpack.c.bf16 %v3611_v10, %v3609_v7  ;;  %3184 = vmatpush3.bf16.msra.mxu0 %v3447_v56  ;;  %3630 = vpow2.f32 %v1741_v17  ;;  %v3471_v10 = vld [vmem:[#allocation7 + $0x200] sm:$0xff]  }
 0x302   : > { %3185 = vmatprep.subr.bf16.mxu0 %v3449_v63  ;;  %v4197_v28 = vpop.eup %3612  ;;  %3632 = vpow2.f32 %v2890_v57  ;;  %v1721_v34 = vmul.f32 1.442695, %v1715_v59 }
 0x303   : > { %2553 = vmatprep.mubr.bf16.mxu0 %v1780_v15  ;;  %3158 = vmatpush3.bf16.msra.mxu1 %v3450_v4  ;;  %3634 = vrcp.f32 %v1757_v23  ;;  %v1759_v9 = vadd.f32 1.0, %v4197_v28 }
 0x304   : > { %3159 = vmatprep.subr.bf16.mxu1 %v3452_v11  ;;  %v3615_v49 = vpop.eup %3614  ;;  %3636 = vpow2.f32 %v1683_v27 }
 0x305   : > { %3186 = vmatpush3.bf16.msra.mxu0 %v3451_v16  ;;  %3638 = vpow2.f32 %v1681_v29  ;;  %v1770_v56 = vmul.f32 %v3615_v49, %v4114_v32  ;;  %v3468_v32 = vld [vmem:[#allocation7 + $0x218] sm:$0xff]  }
 0x306   : > { %3187 = vmatprep.subr.bf16.mxu0 %v3453_v19  ;;  %3640 = vpow2.f32 %v1723_v0 }
 0x307   : > { %3160 = vmatpush3.bf16.msra.mxu1 %v3454_v3  ;;  %v3617_v39 = vpop.eup %3616  ;;  %3642 = vpow2.f32 %v1721_v34 }
 0x308   : > { %3161 = vmatprep.subr.bf16.mxu1 %v3456_v25  ;;  %v3619_v8 = vpop.eup %3618 }
 0x309   : > { %3188 = vmatpush3.bf16.msra.mxu0 %v3455_v36  ;;  %v3621_v41 = vpop.eup %3620  ;;  %v1777_v46 = vpack.c.bf16 %v3619_v8, %v3617_v39 }
 0x30a   : > { %3189 = vmatprep.subr.bf16.mxu0 %v3457_v30  ;;  %v3623_v33 = vpop.eup %3622 }
 0x30b   : > { %3162 = vmatpush3.bf16.msra.mxu1 %v3458_v1  ;;  %v3625_v5 = vpop.eup %3624 }
 0x30c   : > { %3163 = vmatprep.subr.bf16.mxu1 %v3460_v62  ;;  %v3627_v45 = vpop.eup %3626  ;;  %v1787_v50 = vpack.c.bf16 %v3623_v33, %v3625_v5 }
 0x30d   : > { %3190 = vmatpush3.bf16.msra.mxu0 %v3459_v35  ;;  %v3629_v48 = vpop.eup %3628 }
 0x30e   : > { %3191 = vmatprep.subr.bf16.mxu0 %v3461_v37  ;;  %v3631_v13 = vpop.eup %3630  ;;  %v1779_v31 = vpack.c.bf16 %v3621_v41, %v3629_v48 }
 0x30f   : > { %3164 = vmatpush3.bf16.msra.mxu1 %v3462_v26  ;;  %v3633_v51 = vpop.eup %3632  ;;  %v1789_v52 = vpack.c.bf16 %v3627_v45, %v3631_v13 }
 0x310   : > { %3235 = vmatprep.subr.bf16.mxu1 %v3464_v20  ;;  %v3635_v53 = vpop.eup %3634  ;;  %v1760_v61 = vadd.f32 1.0, %v3633_v51 }
 0x311   : > { %3192 = vmatpush3.bf16.msra.mxu0 %v3463_v21  ;;  %v3637_v55 = vpop.eup %3636  ;;  %v1769_v42 = vmul.f32 %v3635_v53, %v4111_v24  ;;  %v3469_v24 = vld [vmem:[#allocation7 + $0x210] sm:$0xff]   ;;  %v2891_v21 = vld [vmem:[%s4266_s8] ss:$0 sm:$0xff] }
 0x312   : > { %2505 = vmatmul.mubr.bf16.vlgmr.msra.gmra.mxu1 %v1777_v46  ;;  %v3639_v58 = vpop.eup %3638  ;;  %3644 = vrcp.f32 %v1760_v61 }
 0x313   : > { %2512 = vmatprep.mubr.bf16.mxu1 %v1787_v50  ;;  %3236 = vmatpush3.bf16.msra.mxu1 %v3464_v20  ;;  %v3641_v60 = vpop.eup %3640  ;;  %v1786_v63 = vpack.c.bf16 %v3637_v55, %v3639_v58  ;;  %v1781_v7 = vpack.c.bf16 %v1770_v56, %v1769_v42  ;;  %3646 = vrcp.f32 %v1759_v9 }
 0x314   : > { %2554 = vmatmul.mubr.bf16.vlgmr.msra.gmra.mxu0 %v1779_v31  ;;  %3237 = vmatprep.subr.bf16.mxu1 %v3465_v47  ;;  %v3643_v6 = vpop.eup %3642 }
 0x315   : > { %2561 = vmatprep.mubr.bf16.mxu0 %v1789_v52  ;;  %v1788_v4 = vpack.c.bf16 %v3641_v60, %v3643_v6 }
 0x317   : > { %3238 = vmatpush3.bf16.msra.mxu1 %v3465_v47 }
 0x318   : > { %3239 = vmatprep.subr.bf16.mxu1 %v3466_v54 }
 0x31a   : > { %2513 = vmatmul.mubr.bf16.gmra.mxu1 %v1786_v63 }
 0x31b   : > { %3240 = vmatpush3.bf16.msra.mxu1 %v3466_v54  ;;  %3251 = vmatprep.mubr.bf16.mxu1 %v1781_v7 }
 0x31c   : > { %2562 = vmatmul.mubr.bf16.gmra.mxu0 %v1788_v4  ;;  %3241 = vmatprep.subr.bf16.mxu1 %v3467_v2 }
 0x31f   : > { %3242 = vmatpush3.bf16.msra.mxu1 %v3467_v2  ;;  %v3645_v11 = vpop.eup %3644 }
 0x320   : > { %3243 = vmatprep.subr.bf16.mxu1 %v3468_v32  ;;  %v3647_v43 = vpop.eup %3646  ;;  %v1772_v12 = vmul.f32 %v3645_v11, %v4124_v40 }
 0x321   : > { %v1771_v14 = vmul.f32 %v3647_v43, %v4119_v38 }
 0x323   : > { %3244 = vmatpush3.bf16.msra.mxu1 %v3468_v32  ;;  %v1790_v15 = vpack.c.bf16 %v1772_v12, %v1771_v14 }
 0x324   : > { %3245 = vmatprep.subr.bf16.mxu1 %v3469_v24 }
 0x327   : > { %3246 = vmatpush3.bf16.msra.mxu1 %v3469_v24 }
 0x328   : > { %3247 = vmatprep.subr.bf16.mxu1 %v3470_v44 }
 0x32b   : > { %3248 = vmatpush3.bf16.msra.mxu1 %v3470_v44 }
 0x32c   : > { %3249 = vmatprep.subr.bf16.mxu1 %v3471_v10 }
 0x32f   : > { %3250 = vmatpush3.bf16.msra.mxu1 %v3471_v10 }
 0x332   : > { %3252 = vmatmul.mubr.bf16.vlgmr.msra.gmra.mxu1 %v1790_v15 }
 0x3b2   : > { %v3109_v16 = vpop.f32.mrf.mxu1 }
 0x3b4   : > { %v3137_v17 = vpop.f32.mrf.mxu0  ;;  %v3110_v18 = vpop.f32.mrf.mxu1 }
 0x3b5   : > { %v3111_v20 = vadd.f32 %v3110_v18, %v3109_v16 }
 0x3b6   : > { %v3138_v57 = vpop.f32.mrf.mxu0  ;;  %v3112_v19 = vpop.f32.mrf.mxu1 }
 0x3b7   : > { %v2409_v46 = vadd.f32 %v3111_v20, %v2891_v21  ;;  %v3139_v31 = vadd.f32 %v3138_v57, %v3137_v17 }
 0x3b8   : > { %v3140_v22 = vpop.f32.mrf.mxu0  ;;  %v3113_v23 = vpop.f32.mrf.mxu1 }
 0x3b9   : > { %v3114_v48 = vadd.f32 %v3113_v23, %v3112_v19  ;;  %v2458_v55 = vadd.f32 %v3139_v31, %v2409_v46 }
 0x3ba   : > { %v3141_v3 = vpop.f32.mrf.mxu0 }
 0x3bb   : > { %v2412_v58 = vadd.f32 %v3114_v48, %v2891_v21  ;;  %v3142_v63 = vadd.f32 %v3141_v3, %v3140_v22 }
 0x3bd   : > { %v3115_v25 = vpop.f32.mrf.mxu1  ;;  %v2461_v32 = vadd.f32 %v3142_v63, %v2412_v58 }
 0x3bf   : > { %v3143_v27 = vpop.f32.mrf.mxu0  ;;  %v3116_v59 = vpop.f32.mrf.mxu1 }
 0x3c0   : > { %v3117_v8 = vadd.f32 %v3116_v59, %v3115_v25 }
 0x3c1   : > { %v3144_v28 = vpop.f32.mrf.mxu0  ;;  %v3118_v36 = vpop.f32.mrf.mxu1 }
 0x3c2   : > { %v2417_v5 = vadd.f32 %v3117_v8, %v2891_v21  ;;  %v3145_v50 = vadd.f32 %v3144_v28, %v3143_v27 }
 0x3c3   : > { %v3146_v40 = vpop.f32.mrf.mxu0  ;;  %v3119_v29 = vpop.f32.mrf.mxu1 }
 0x3c4   : > { %v3120_v45 = vadd.f32 %v3119_v29, %v3118_v36  ;;  %v2466_v52 = vadd.f32 %v3145_v50, %v2417_v5 }
 0x3c5   : > { %v3147_v30 = vpop.f32.mrf.mxu0 }
 0x3c6   : > { %v2420_v53 = vadd.f32 %v3120_v45, %v2891_v21  ;;  %v3148_v60 = vadd.f32 %v3147_v30, %v3146_v40 }
 0x3c8   : > { %v2469_v2 = vadd.f32 %v3148_v60, %v2420_v53 }
 0x3d2   : > { %v3165_v38 = vpop.f32.mrf.mxu1 }
 0x3d4   : > { %v3193_v0 = vpop.f32.mrf.mxu0  ;;  %v3166_v49 = vpop.f32.mrf.mxu1 }
 0x3d5   : > { %v3167_v54 = vadd.f32 %v3166_v49, %v3165_v38 }
 0x3d6   : > { %v3168_v1 = vpop.f32.mrf.mxu1  ;;  %v3194_v62 = vpop.f32.mrf.mxu0 }
 0x3d7   : > { %v2507_v6 = vadd.f32 %v3167_v54, %v2458_v55  ;;  %v3195_v24 = vadd.f32 %v3194_v62, %v3193_v0 }
 0x3d8   : > { %v3169_v34 = vpop.f32.mrf.mxu1  ;;  %v3196_v35 = vpop.f32.mrf.mxu0 }
 0x3d9   : > { %v3170_v7 = vadd.f32 %v3169_v34, %v3168_v1  ;;  %v2556_v15 = vadd.f32 %v3195_v24, %v2507_v6 }
 0x3da   : > { %v3171_v37 = vpop.f32.mrf.mxu1  ;;  %v3197_v39 = vpop.f32.mrf.mxu0 }
 0x3db   : > { %v2510_v43 = vadd.f32 %v3170_v7, %v2461_v32  ;;  %v3198_v17 = vadd.f32 %v3197_v39, %v3196_v35 }
 0x3dc   : > { %v3172_v26 = vpop.f32.mrf.mxu1  ;;  %v3199_v41 = vpop.f32.mrf.mxu0 }
 0x3dd   : > { %v3173_v13 = vadd.f32 %v3172_v26, %v3171_v37  ;;  %v2559_v23 = vadd.f32 %v3198_v17, %v2510_v43 }
 0x3de   : > { %v3174_v33 = vpop.f32.mrf.mxu1  ;;  %v3200_v47 = vpop.f32.mrf.mxu0 }
 0x3df   : > { %v2515_v42 = vadd.f32 %v3173_v13, %v2466_v52  ;;  %v3201_v9 = vadd.f32 %v3200_v47, %v3199_v41 }
 0x3e0   : > { %v3175_v51 = vpop.f32.mrf.mxu1  ;;  %v3202_v56 = vpop.f32.mrf.mxu0 }
 0x3e1   : > { %v3176_v61 = vadd.f32 %v3175_v51, %v3174_v33  ;;  %v2564_v10 = vadd.f32 %v3201_v9, %v2515_v42 }
 0x3e2   : > { %v3203_v4 = vpop.f32.mrf.mxu0 }
 0x3e3   : > { %v2518_v44 = vadd.f32 %v3176_v61, %v2469_v2  ;;  %v3204_v12 = vadd.f32 %v3203_v4, %v3202_v56 }
 0x3e5   : > { %v2567_v57 = vadd.f32 %v3204_v12, %v2518_v44 }
 0x3f2   : > { %v3253_v11 = vpop.f32.mrf.mxu1 }
 0x3f3   : > { %v2613_v14 = vadd.f32 %v3253_v11, %v2564_v10 }
 0x3f4   : > { %v2604_v16 = vpop.f32.mrf.mxu1 }
 0x3f5   : > { %2621 = vst [vmem:[%s379_s25 + $0x10] sm:$0xff] %v2613_v14  ;;  %v2605_v18 = vadd.f32 %v2604_v16, %v2556_v15 }
 0x3f6   : > { %v3254_v19 = vpop.f32.mrf.mxu1 }
 0x3f7   : > { %2619 = vst [vmem:[%s379_s25] sm:$0xff] %v2605_v18  ;;  %v2616_v22 = vadd.f32 %v3254_v19, %v2567_v57 }
 0x3f8   : > { %v2607_v3 = vpop.f32.mrf.mxu1 }
 0x3f9   : > { %2622 = vst [vmem:[%s379_s25 + $0x18] sm:$0xff] %v2616_v22  ;;  %v2608_v25 = vadd.f32 %v2607_v3, %v2559_v23 }
 0x3fb   : > { %2620 = vst [vmem:[%s379_s25 + $0x8] sm:$0xff] %v2608_v25 }
 0x3fc   : > { %3745 = shalt.err (!%p3742_p9)
}
 0x3fd   : > { %s3746_s22 = scalar_lea.hbm %s4215_s14, 512  ;;  %s3750_s27 = scalar_lea.hbm %s4267_s9, 1024 }
 0x3fe   : > { %p3747_p13 = scmp.ne.s32.totalorder %s4215_s14, %s3746_s22  ;;  %p3751_p4 = scmp.lt.s32.totalorder %s4215_s14, %s4267_s9 }
 0x3ff   : > { %p3752_p8 = scmp.lt.s32.totalorder %s3750_s27, %s3746_s22 }
 0x400   : > { %p3748_p5 = pnand %p3747_p13, %p4288_p10 }
 0x401   : > { %p3753_p3 = por %p3752_p8, %p3751_p4 }
 0x402   : > { %p3749_p0 = pneg %p3748_p5 }
 0x404   : > { %p3754_p11 = pnand %p3753_p3, %p3749_p0 }
 0x406   : > { %3757 = shalt.err (!%p3754_p11)
}
 0x407   : > { %s3810_s23 = smov 128   ;;  %s3811_s28 = smov 8  }
 0x408   : > { %3265 = dma.vmem_to_hbm [thread:$0]  (%p4288_p10), %s4210_s15, 512, %s4215_s14, %s2624_s20, %s3810_s23, %s3810_s23, %s3811_s28  }
 0x409 PF: > { %s2652_s13 = sand.u32 1, %s3788_s30   ;;  %p4289_p1 = scmp.ne.s32.totalorder %s4275_s16, 0 }
 0x40a   : > { %p4290_p2 = scmp.ge.s32.totalorder %s3800_s12, 2  ;;  %s2653_s19 = scalar_lea.sflag [#allocation4], %s2652_s13 }
 0x40c   : > { %p3279_p6 = pnand %p4290_p2, %p4289_p1 }
 0x40e   : > { %p3280_p12 = pneg %p3279_p6 }
 0x410   : > { %3783 = dma.done.wait (%p3280_p12), %s2653_s19, 512  }
 0x411   : > { %3785 = vsyncadd (%p3280_p12), %s2653_s19, 4294966784  ;;  %s4291_s29 = sld [smem:[#allocation12_spill]]  ;;  %p23_p7 = scmp.ge.s32.totalorder %s3934_s18, 4  }
 0x412   : > { %s4292_s30 = smov %s3792_s10  ;;  %s4293_s10 = smov %s3796_s11 }
 0x413   : > { %s4295_s12 = smov %s3934_s18  ;;  %25 = sbr.rel (!%p23_p7) target bundleno = 9 (0x9), region = 109 }
 0x417   : > { %s4294_s11 = smov %s4291_s29 }
 0x418   :  { %2658 = vsyncpa [#allocation3], 1 }
 0x419   :  { %2660 = vsyncpa [#allocation3 + $0x1], 1 }
 0x41a   :  { %2661 = vsyncpa [#allocation6], 1 }
 0x41b   :  { %2662 = vsyncpa [#allocation4], 1 }
 0x41c   :  { %2664 = vsyncpa [#allocation4 + $0x1], 1 }

// kernel: tpu_custom_call.1
= control target key start
LH: loop header
LB: loop body
LE: loop exit
PB: predicated region body
PF: predicated region fallthrough
CT: control target
= control target key end

     0   :  { %s4258_s0 = inlined_call_operand.hbm [shape: f32[64,128], index: 0, kind: input, shape index: {}]   ;;  %s4259_s1 = inlined_call_operand.vmem [shape: f32[1,128], index: 1, kind: input, shape index: {}]   ;;  %s4260_s2 = inlined_call_operand.vmem [shape: f32[1,128], index: 2, kind: input, shape index: {}]   ;;  %s4261_s3 = inlined_call_operand.hbm [shape: bf16[1152,128], index: 3, kind: input, shape index: {}]   ;;  %s4262_s4 = inlined_call_operand.vmem [shape: f32[1,128], index: 4, kind: input, shape index: {}]   ;;  %s4263_s5 = inlined_call_operand.vmem [shape: f32[1,128], index: 5, kind: input, shape index: {}]   ;;  %s4264_s6 = inlined_call_operand.vmem [shape: f32[1,128], index: 6, kind: input, shape index: {}]   ;;  %s4265_s7 = inlined_call_operand.hbm [shape: bf16[1152,128], index: 7, kind: input, shape index: {}]   ;;  %s4266_s8 = inlined_call_operand.vmem [shape: f32[1,128], index: 8, kind: input, shape index: {}]   ;;  %s4267_s9 = inlined_call_operand.hbm [shape: f32[64,128], index: 9, kind: output, shape index: {}]  }
   0x1   :  { %4272 = sst [smem:[#allocation13_spill]] %s4261_s3 }
   0x2   :  { %4273 = sst [smem:[#allocation14_spill]] %s4265_s7 }
   0x3   :  { %14 = vsyncpa [#allocation3], 0 }
   0x4   :  { %16 = vsyncpa [#allocation3 + $0x1], 0 }
   0x5   :  { %17 = vsyncpa [#allocation6], 0 }
   0x6   :  { %18 = vsyncpa [#allocation4], 0 }
   0x7   :  { %20 = vsyncpa [#allocation4 + $0x1], 0  ;;  %s3862_s30 = smov 0   ;;  %s3864_s10 = smov 0  }
   0x8   :  { %s3866_s11 = smov 0   ;;  %s3868_s12 = smov 0  }
   0x9 LB: > { %s3883_s13 = sadd.s32 4294967295, %s3800_s12   ;;  %s2729_s14 = sadd.s32 4294967294, %s3800_s12   ;;  %s3800_s12 = sphi %s3868_s12, %s4295_s12   ;;  %s3796_s11 = sphi %s3866_s11, %s4294_s11   ;;  %s3792_s10 = sphi %s3864_s10, %s4293_s10   ;;  %s3788_s30 = sphi %s3862_s30, %s4292_s30  }
   0xa   : > { %p46_p0 = scmp.ne.s32.totalorder %s3792_s10, %s3788_s30  ;;  %p4268_p1 = scmp.eq.s32.totalorder %s3883_s13, 0 }
   0xb   : > { %p244_p3 = scmp.eq.s32.totalorder %s2729_s14, 1  ;;  %p2730_p5 = scmp.ge.s32.totalorder %s3800_s12, 1 }
   0xc   : > { %p3892_p4 = por %p4268_p1, %p46_p0  ;;  %p251_p7 = scmp.lt.s32.totalorder %s3800_s12, 3 }
   0xd   : > { %p3897_p6 = por %p244_p3, %p46_p0  ;;  %s3802_s18 = smov [#allocation5]  }
   0xe   : > { %s4274_s15 = scalar_select %p3892_p4, 1, 0 }
   0xf   : > { %s4275_s16 = scalar_select %p3897_p6, 1, 0 }
  0x10   : > { %p3902_p8 = pnand %p2730_p5, %p251_p7  ;;  %s269_s19 = sshll.u32 %s3802_s18, 4  ;;  %s270_s19 = int_to_ptr.vmem [resolvable:$true] %s269_s19 }
  0x11   : > { %s3803_s21 = smov [#allocation7]   ;;  %s3663_s23 = scalar_lea.vmem %s270_s19, 9216 }
  0x12   : > { %s4276_s17 = scalar_select %p3902_p8, 1, 0 }
  0x13   : > { %p3267_p9 = pneg %p3902_p8  ;;  %s291_s22 = sshll.u32 %s3803_s21, 4  ;;  %s292_s22 = int_to_ptr.vmem [resolvable:$true] %s291_s22 }
  0x14   : > { %p3664_p13 = scmp.ne.s32.totalorder %s270_s19, %s3663_s23  ;;  %p3671_p5 = scmp.lt.s32.totalorder %s270_s19, %s270_s19 }
  0x15   : > { %p3911_p11 = pnand %p3267_p9, %p4268_p1  ;;  %p3672_p7 = scmp.lt.s32.totalorder %s3663_s23, %s3663_s23 }
  0x17   : > { %p3654_p12 = pneg %p3911_p11  ;;  %p3673_p10 = por %p3672_p7, %p3671_p5 }
  0x19   : > { %p3666_p0 = pnand %p3664_p13, %p3654_p12 }
  0x1b   : > { %p3667_p3 = pneg %p3666_p0 }
  0x1d   : > { %p3674_p9 = pnand %p3673_p10, %p3667_p3 }
  0x1f   : > { %3677 = shalt.err (!%p3674_p9)
}
  0x20   : > { %s3804_s24 = smov 64   ;;  %s3805_s25 = smov 4  }
  0x21   : > { %s4278_s3 = sld [smem:[#allocation13_spill]]  ;;  %s3689_s28 = scalar_lea.vmem %s292_s22, 9216 }
  0x22   : > { %p3690_p1 = scmp.ne.s32.totalorder %s292_s22, %s3689_s28  ;;  %p3697_p2 = scmp.lt.s32.totalorder %s292_s22, %s292_s22 }
  0x23   : > { %p3698_p6 = scmp.lt.s32.totalorder %s3689_s28, %s3689_s28 }
  0x24   : > { %p3692_p13 = pnand %p3690_p1, %p3654_p12 }
  0x25   : > { %p3699_p5 = por %p3698_p6, %p3697_p2 }
  0x26   : > { %p3693_p0 = pneg %p3692_p13 }
  0x27   : > { %3270 = dma.hbm_to_vmem [thread:$0]  (!%p3911_p11), %s4278_s3, 9216, %s270_s19, [#allocation6], %s3804_s24, %s3804_s24, %s3805_s25  }
  0x28   : > { %p3700_p10 = pnand %p3699_p5, %p3693_p0 }
  0x2a   : > { %3703 = shalt.err (!%p3700_p10)
}
  0x2b   : > { %s4279_s7 = sld [smem:[#allocation14_spill]]  ;;  %s3934_s18 = sadd.s32 1, %s3800_s12  }
  0x2c   : > { %s33_s19 = sadd.s32 1, %s3796_s11  ;;  %s30_s20 = ssub.s32 %s3800_s12, %s3934_s18 }
  0x2d   : > { %p40_p1 = scmp.ne.s32.totalorder %s3796_s11, %s3792_s10  ;;  %p31_p2 = scmp.eq.s32.totalorder %s30_s20, 0 }
  0x2e   : > { %p41_p6 = scmp.eq.s32.totalorder %s3800_s12, 0  ;;  %p4280_p12 = scmp.eq.s32.totalorder %s3883_s13, 1 }
  0x2f   : > { %p3284_p7 = scmp.lt.s32.totalorder %s3800_s12, 2  ;;  %s308_s26 = sand.u32 1, %s3796_s11  }
  0x30   : > { %p3944_p3 = por %p4280_p12, %p40_p1  ;;  %p42_p9 = por %p41_p6, %p40_p1 }
  0x31   : > { %3273 = dma.hbm_to_vmem [thread:$0]  (!%p3911_p11), %s4279_s7, 9216, %s292_s22, [#allocation6], %s3804_s24, %s3804_s24, %s3805_s25  }
  0x32   : > { %s4281_s21 = scalar_select %p3944_p3, 1, 0 }
  0x33   : > { %s3950_s23 = scalar_select %p31_p2, %s3796_s11, %s33_s19  }
  0x34   : > { %s2734_s27 = sshll.u32 %s308_s26, 5  ;;  %s2969_s22 = sshll.u32 %s3800_s12, 9 }
  0x35   : > { %4282 = sst [smem:[#allocation12_spill]] %s3950_s23  ;;  %s3957_s28 = scalar_lea.hbm %s4258_s0, %s2969_s22 }
  0x36   : > { %s312_s29 = scalar_lea.vmem [#allocation2], %s2734_s27  ;;  %p3961_p11 = pnand %p3284_p7, %p42_p9 }
  0x37   : > { %s319_s14 = sshll.u32 %s312_s29, 4  ;;  %s3965_s19 = scalar_lea.sflag [#allocation3], %s308_s26  ;;  %s3959_s14 = int_to_ptr.vmem [resolvable:$true] %s319_s14 }
  0x38   : > { %s3704_s3 = scalar_lea.hbm %s3957_s28, 512  ;;  %p3706_p0 = pneg %p3961_p11 }
  0x39   : > { %p3705_p13 = scmp.ne.s32.totalorder %s3957_s28, %s3704_s3  ;;  %s3709_s27 = scalar_lea.hbm %s4258_s0, 1024 }
  0x3a   : > { %p3710_p1 = scmp.lt.s32.totalorder %s3957_s28, %s4258_s0  ;;  %p3711_p2 = scmp.lt.s32.totalorder %s3709_s27, %s3704_s3 }
  0x3b   : > { %p3707_p5 = pnand %p3706_p0, %p3705_p13 }
  0x3c   : > { %p3712_p6 = por %p3711_p2, %p3710_p1 }
  0x3d   : > { %p3708_p10 = pneg %p3707_p5 }
  0x3f   : > { %p3713_p12 = pnand %p3712_p6, %p3708_p10 }
  0x41   : > { %3716 = shalt.err (!%p3713_p12)
}
  0x42   : > { %s3717_s26 = scalar_lea.vmem %s3959_s14, 512  ;;  %s3806_s7 = smov [#allocation2]  }
  0x43   : > { %p3718_p7 = scmp.ne.s32.totalorder %s3959_s14, %s3717_s26  ;;  %s3722_s23 = sshll.u32 %s3806_s7, 4  ;;  %s3723_s23 = int_to_ptr.vmem [resolvable:$false] %s3722_s23 }
  0x44   : > { %s3724_s22 = scalar_lea.vmem %s3723_s23, 1024  ;;  %p3725_p5 = scmp.lt.s32.totalorder %s3959_s14, %s3723_s23 }
  0x45   : > { %p3720_p9 = pnand %p3718_p7, %p3706_p0  ;;  %p3726_p3 = scmp.lt.s32.totalorder %s3724_s22, %s3717_s26 }
  0x47   : > { %p3721_p13 = pneg %p3720_p9  ;;  %p3727_p4 = por %p3726_p3, %p3725_p5 }
  0x49   : > { %p3728_p8 = pnand %p3727_p4, %p3721_p13 }
  0x4b   : > { %3731 = shalt.err (!%p3728_p8)
}
  0x4c   : > { %s3807_s3 = smov 128   ;;  %s3808_s24 = smov 8  }
  0x4d   : > { %3277 = dma.hbm_to_vmem [thread:$0]  (!%p3961_p11), %s3957_s28, 512, %s3959_s14, %s3965_s19, %s3807_s3, %s3807_s3, %s3808_s24  }
  0x4e   : > { %p4284_p0 = scmp.ne.s32.totalorder %s4276_s17, 0 }
  0x4f   : > { %s3989_s7 = sand.u32 (!%p4284_p0), 1, %s3792_s10   ;;  %p4285_p4 = scmp.ne.s32.totalorder (!%p4284_p0), %s4274_s15, 0 }
  0x50   : > { %331 = sbr.rel (%p4284_p0) target bundleno = 1033 (0x409), region = 56  ;;  %s2738_s23 = sshll.u32 (!%p4284_p0), %s3989_s7, 5 }
  0x51   : > { %s334_s27 = scalar_lea.sflag (!%p4284_p0), [#allocation3], %s3989_s7  ;;  %s3995_s25 = scalar_lea.vmem (!%p4284_p0), [#allocation2], %s2738_s23 }
  0x55   : > { %3775 = dma.done.wait (%p4285_p4), %s334_s27, 512  }
  0x56   : > { %3777 = vsyncadd (%p4285_p4), %s334_s27, 4294966784  ;;  %p4286_p8 = scmp.eq.s32.totalorder %s3883_s13, 0 }
  0x58   : > { %3779 = dma.done.wait (%p4286_p8), [#allocation6], 18432   ;;  %p4287_p3 = pmov %p4286_p8 }
  0x59   : > { %v4006_v0 = vld [vmem:[%s3995_s25] sm:$0xff]  ;;  %v4009_v1 = vld [vmem:[%s3995_s25 + $0x8] sm:$0xff]  ;;  %v4017_v4 = vld [vmem:[%s3995_s25 + $0x10] sm:$0xff]  ;;  %s2970_s17 = sshll.u32 %s3883_s13, 9  ;;  %s2624_s20 = scalar_lea.sflag [#allocation4], %s3989_s7 }
  0x5a   : > { %3781 = vsyncadd (%p4287_p3), [#allocation6], 4294948864  ;;  %387 = vadd.xlane.f32.xlu0 %v4006_v0  ;;  %v395_v2 = vmul.f32 %v4006_v0, %v4006_v0  ;;  %v396_v3 = vmul.f32 %v4009_v1, %v4009_v1  ;;  %v4021_v5 = vld [vmem:[%s3995_s25 + $0x18] sm:$0xff]  ;;  %v397_v6 = vmul.f32 %v4017_v4, %v4017_v4  ;;  %v3332_v12 = vld [vmem:[#allocation5 + $0x70] sm:$0xff]   ;;  %s4215_s14 = scalar_lea.hbm %s4267_s9, %s2970_s17  ;;  %p4288_p10 = scmp.ne.s32.totalorder %s4281_s21, 0 }
  0x5b   : > { %v398_v7 = vmul.f32 %v4021_v5, %v4021_v5  ;;  %v3328_v8 = vld [vmem:[#allocation5 + $0x78] sm:$0xff]   ;;  %v3333_v13 = vld [vmem:[#allocation5 + $0xf0] sm:$0xff]   ;;  %v3336_v16 = vld [vmem:[#allocation5 + $0x68] sm:$0xff]   ;;  %s3809_s19 = smov [#allocation8]  }
  0x5c   : > { %399 = vadd.xlane.f32.xlu1 %v395_v2  ;;  %v3329_v9 = vld [vmem:[#allocation5 + $0xf8] sm:$0xff]   ;;  %2971 = vmatprep.subr.bf16.mxu0 %v3328_v8  ;;  %v3334_v14 = vld [vmem:[#allocation5 + $0x30] sm:$0xff]   ;;  %v3337_v17 = vld [vmem:[#allocation5 + $0xe8] sm:$0xff]   ;;  %s3736_s29 = sshll.u32 %s3809_s19, 4  ;;  %s3737_s29 = int_to_ptr.vmem [resolvable:$false] %s3736_s29 }
  0x5d   : > { %v3330_v10 = vld [vmem:[#allocation5 + $0x38] sm:$0xff]   ;;  %2999 = vmatprep.subr.bf16.mxu1 %v3329_v9  ;;  %v3335_v15 = vld [vmem:[#allocation5 + $0xb0] sm:$0xff]   ;;  %v3338_v18 = vld [vmem:[#allocation5 + $0x28] sm:$0xff]   ;;  %s3738_s26 = scalar_lea.vmem %s3737_s29, 1024 }
  0x5e   : > { %389 = vadd.xlane.f32.xlu0 %v4009_v1  ;;  %v3331_v11 = vld [vmem:[#allocation5 + $0xb8] sm:$0xff]   ;;  %2972 = vmatpush3.bf16.msra.mxu0 %v3330_v10  ;;  %v3339_v19 = vld [vmem:[#allocation5 + $0xa8] sm:$0xff]   ;;  %v3340_v20 = vld [vmem:[#allocation5 + $0x60] sm:$0xff]  }
  0x5f   : > { %3000 = vmatpush3.bf16.msra.mxu1 %v3331_v11  ;;  %2973 = vmatprep.subr.bf16.mxu0 %v3332_v12  ;;  %v3341_v21 = vld [vmem:[#allocation5 + $0xe0] sm:$0xff]   ;;  %v3344_v24 = vld [vmem:[#allocation5 + $0x58] sm:$0xff]   ;;  %v3348_v28 = vld [vmem:[#allocation5 + $0x50] sm:$0xff]  }
  0x60   : > { %401 = vadd.xlane.f32.xlu1 %v396_v3  ;;  %3001 = vmatprep.subr.bf16.mxu1 %v3333_v13  ;;  %v3342_v22 = vld [vmem:[#allocation5 + $0x20] sm:$0xff]   ;;  %v3345_v25 = vld [vmem:[#allocation5 + $0xd8] sm:$0xff]   ;;  %v3349_v29 = vld [vmem:[#allocation5 + $0xd0] sm:$0xff]  }
  0x61   : > { %v3343_v23 = vld [vmem:[#allocation5 + $0xa0] sm:$0xff]   ;;  %v3346_v26 = vld [vmem:[#allocation5 + $0x18] sm:$0xff]   ;;  %v3350_v30 = vld [vmem:[#allocation5 + $0x10] sm:$0xff]  }
  0x62   : > { %391 = vadd.xlane.f32.xlu0 %v4017_v4  ;;  %2974 = vmatpush3.bf16.msra.mxu0 %v3334_v14  ;;  %v3347_v27 = vld [vmem:[#allocation5 + $0x98] sm:$0xff]   ;;  %v3351_v31 = vld [vmem:[#allocation5 + $0x90] sm:$0xff]   ;;  %v3352_v32 = vld [vmem:[#allocation5 + $0x48] sm:$0xff]  }
  0x63   : > { %3002 = vmatpush3.bf16.msra.mxu1 %v3335_v15  ;;  %2975 = vmatprep.subr.bf16.mxu0 %v3336_v16  ;;  %v3353_v33 = vld [vmem:[#allocation5 + $0xc8] sm:$0xff]   ;;  %v3356_v36 = vld [vmem:[#allocation5 + $0x40] sm:$0xff]   ;;  %v3360_v40 = vld [vmem:[#allocation5 + $0x178] sm:$0xff]  }
  0x64   : > { %393 = vadd.xlane.f32.xlu1 %v4021_v5  ;;  %3003 = vmatprep.subr.bf16.mxu1 %v3337_v17  ;;  %v3354_v34 = vld [vmem:[#allocation5 + $0x8] sm:$0xff]   ;;  %v3357_v37 = vld [vmem:[#allocation5 + $0xc0] sm:$0xff]   ;;  %v3361_v41 = vld [vmem:[#allocation5 + $0x1f8] sm:$0xff]  }
  0x65   : > { %v3355_v35 = vld [vmem:[#allocation5 + $0x88] sm:$0xff]   ;;  %v3358_v38 = vld [vmem:[#allocation5] sm:$0xff]  }
  0x66   : > { %403 = vadd.xlane.f32.xlu0 %v397_v6  ;;  %2976 = vmatpush3.bf16.msra.mxu0 %v3338_v18  ;;  %v3359_v39 = vld [vmem:[#allocation5 + $0x80] sm:$0xff]  }
  0x67   : > { %3004 = vmatpush3.bf16.msra.mxu1 %v3339_v19  ;;  %2977 = vmatprep.subr.bf16.mxu0 %v3340_v20  ;;  %v2742_v16 = vld [vmem:[%s4259_s1] ss:$0 sm:$0xff]  ;;  %v2776_v19 = vmul.f32 -1.442695, %v4006_v0 }
  0x68   : > { %405 = vadd.xlane.f32.xlu1 %v398_v7  ;;  %3005 = vmatprep.subr.bf16.mxu1 %v3341_v21  ;;  %v2743_v18 = vld [vmem:[%s4260_s2] ss:$0 sm:$0xff] }
  0x6a   : > { %2978 = vmatpush3.bf16.msra.mxu0 %v3342_v22 }
  0x6b   : > { %3006 = vmatpush3.bf16.msra.mxu1 %v3343_v23  ;;  %2979 = vmatprep.subr.bf16.mxu0 %v3344_v24  ;;  %v2777_v23 = vmul.f32 -1.442695, %v4009_v1 }
  0x6c   : > { %3007 = vmatprep.subr.bf16.mxu1 %v3345_v25 }
  0x6e   : > { %2980 = vmatpush3.bf16.msra.mxu0 %v3346_v26 }
  0x6f   : > { %3008 = vmatpush3.bf16.msra.mxu1 %v3347_v27  ;;  %2981 = vmatprep.subr.bf16.mxu0 %v3348_v28 }
  0x70   : > { %3009 = vmatprep.subr.bf16.mxu1 %v3349_v29 }
  0x72   : > { %2982 = vmatpush3.bf16.msra.mxu0 %v3350_v30 }
  0x73   : > { %3010 = vmatpush3.bf16.msra.mxu1 %v3351_v31  ;;  %2983 = vmatprep.subr.bf16.mxu0 %v3352_v32 }
  0x74   : > { %3011 = vmatprep.subr.bf16.mxu1 %v3353_v33 }
  0x76   : > { %2984 = vmatpush3.bf16.msra.mxu0 %v3354_v34 }
  0x77   : > { %3012 = vmatpush3.bf16.msra.mxu1 %v3355_v35  ;;  %2985 = vmatprep.subr.bf16.mxu0 %v3356_v36 }
  0x78   : > { %3013 = vmatprep.subr.bf16.mxu1 %v3357_v37 }
  0x7a   : > { %2986 = vmatpush3.bf16.msra.mxu0 %v3358_v38 }
  0x7b   : > { %3014 = vmatpush3.bf16.msra.mxu1 %v3359_v39  ;;  %3027 = vmatprep.subr.bf16.mxu0 %v3360_v40 }
  0x7c   : > { %3055 = vmatprep.subr.bf16.mxu1 %v3361_v41 }
  0xe3   : > { %v388_v42 = vpop.xlane.xlu0 %387 }
  0xe4   : > { %v407_v43 = vmul.f32 0.03125, %v388_v42 }
  0xe5   : > { %v400_v44 = vpop.xlane.xlu1 %399 }
  0xe6   : > { %v415_v45 = vmul.f32 %v407_v43, %v407_v43  ;;  %v411_v46 = vmul.f32 0.03125, %v400_v44  ;;  %v427_v14 = vsub.f32 %v4006_v0, %v407_v43 }
  0xe7   : > { %v390_v47 = vpop.xlane.xlu0 %389 }
  0xe8   : > { %v419_v48 = vsub.f32 %v411_v46, %v415_v45  ;;  %v408_v49 = vmul.f32 0.03125, %v390_v47 }
  0xe9   : > { %v402_v50 = vpop.xlane.xlu1 %401 }
  0xea   : > { %v423_v51 = vmax.f32 %v419_v48, 0.0  ;;  %v416_v52 = vmul.f32 %v408_v49, %v408_v49  ;;  %v412_v53 = vmul.f32 0.03125, %v402_v50  ;;  %v428_v21 = vsub.f32 %v4009_v1, %v408_v49 }
  0xeb   : > { %v392_v54 = vpop.xlane.xlu0 %391 }
  0xec   : > { %v431_v55 = vadd.f32 1e-05, %v423_v51  ;;  %v420_v56 = vsub.f32 %v412_v53, %v416_v52  ;;  %v409_v57 = vmul.f32 0.03125, %v392_v54 }
  0xed   : > { %v394_v58 = vpop.xlane.xlu1 %393 }
  0xee   : > { %3472 = vrsqrt.f32 %v431_v55  ;;  %v424_v59 = vmax.f32 %v420_v56, 0.0  ;;  %v417_v60 = vmul.f32 %v409_v57, %v409_v57  ;;  %v410_v61 = vmul.f32 0.03125, %v394_v58 }
  0xef   : > { %v404_v62 = vpop.xlane.xlu0 %403  ;;  %v429_v28 = vsub.f32 %v4017_v4, %v409_v57 }
  0xf0   : > { %v432_v63 = vadd.f32 1e-05, %v424_v59  ;;  %v413_v2 = vmul.f32 0.03125, %v404_v62  ;;  %v418_v3 = vmul.f32 %v410_v61, %v410_v61  ;;  %v430_v33 = vsub.f32 %v4021_v5, %v410_v61 }
  0xf1   : > { %v406_v6 = vpop.xlane.xlu1 %405 }
  0xf2   : > { %3474 = vrsqrt.f32 %v432_v63  ;;  %v421_v7 = vsub.f32 %v413_v2, %v417_v60  ;;  %v414_v8 = vmul.f32 0.03125, %v406_v6 }
  0xf4   : > { %v425_v9 = vmax.f32 %v421_v7, 0.0  ;;  %v422_v10 = vsub.f32 %v414_v8, %v418_v3 }
  0xf6   : > { %v433_v11 = vadd.f32 1e-05, %v425_v9  ;;  %v426_v12 = vmax.f32 %v422_v10, 0.0 }
  0xf8   : > { %3476 = vrsqrt.f32 %v433_v11  ;;  %v434_v13 = vadd.f32 1e-05, %v426_v12 }
  0xfa   : > { %3478 = vrsqrt.f32 %v434_v13 }
  0xfb   : > { %v3473_v15 = vpop.eup %3472  ;;  %3480 = vpow2.f32 %v2776_v19 }
  0xfc   : > { %v439_v17 = vmul.f32 %v3473_v15, %v427_v14  ;;  %3482 = vpow2.f32 %v2777_v23 }
  0xfe   : > { %v450_v20 = vmul.f32 %v2742_v16, %v439_v17 }
  0xff   : > { %v3475_v22 = vpop.eup %3474 }
 0x100   : > { %v461_v24 = vadd.f32 %v2743_v18, %v450_v20  ;;  %v440_v25 = vmul.f32 %v3475_v22, %v428_v21 }
 0x102   : > { %v4039_v26 = vmul.f32 1.75, %v461_v24  ;;  %v451_v27 = vmul.f32 %v2742_v16, %v440_v25 }
 0x104   : > { %v462_v29 = vadd.f32 %v2743_v18, %v451_v27  ;;  %v2748_v30 = vadd.f32 2.5, %v4039_v26  ;;  %v2756_v0 = vadd.f32 0.49999982, %v4039_v26  ;;  %v2744_v31 = vadd.f32 3.5, %v4039_v26 }
 0x105   : > { %v3477_v32 = vpop.eup %3476  ;;  %v2752_v1 = vadd.f32 1.5, %v4039_v26  ;;  %v2764_v34 = vadd.f32 -1.5000001, %v4039_v26  ;;  %v2772_v35 = vadd.f32 -3.5, %v4039_v26 }
 0x106   : > { %v4049_v36 = vmul.f32 1.75, %v462_v29  ;;  %v441_v37 = vmul.f32 %v3477_v32, %v429_v28  ;;  %v493_v4 = vmul.f32 %v2748_v30, %v2748_v30  ;;  %v533_v38 = vmul.f32 %v2756_v0, %v2756_v0 }
 0x107   : > { %v3479_v39 = vpop.eup %3478  ;;  %v473_v40 = vmul.f32 %v2744_v31, %v2744_v31  ;;  %v513_v41 = vmul.f32 %v2752_v1, %v2752_v1  ;;  %v4051_v42 = vmul.f32 %v2764_v34, %v2764_v34  ;;  %v4053_v43 = vmul.f32 %v2772_v35, %v2772_v35 }
 0x108   : > { %v452_v44 = vmul.f32 %v2742_v16, %v441_v37  ;;  %v442_v5 = vmul.f32 %v3479_v39, %v430_v33  ;;  %v2749_v45 = vadd.f32 2.5, %v4049_v36  ;;  %v497_v46 = vsub.f32 0.0, %v493_v4  ;;  %v4063_v8 = vpop.eup %3480 }
 0x109   : > { %v2757_v47 = vadd.f32 0.49999982, %v4049_v36  ;;  %v537_v48 = vsub.f32 0.0, %v533_v38  ;;  %v2745_v49 = vadd.f32 3.5, %v4049_v36  ;;  %v477_v50 = vsub.f32 0.0, %v473_v40  ;;  %v4066_v13 = vpop.eup %3482 }
 0x10a   : > { %v463_v51 = vadd.f32 %v2743_v18, %v452_v44  ;;  %v453_v52 = vmul.f32 %v2742_v16, %v442_v5  ;;  %v494_v53 = vmul.f32 %v2749_v45, %v2749_v45  ;;  %v501_v54 = vmul.f32 1.442695, %v497_v46 }
 0x10b   : > { %v534_v55 = vmul.f32 %v2757_v47, %v2757_v47  ;;  %v541_v56 = vmul.f32 1.442695, %v537_v48  ;;  %v474_v57 = vmul.f32 %v2745_v49, %v2745_v49  ;;  %v481_v58 = vmul.f32 1.442695, %v477_v50 }
 0x10c   : > { %v4058_v59 = vmul.f32 1.75, %v463_v51  ;;  %v464_v60 = vadd.f32 %v2743_v18, %v453_v52  ;;  %v498_v61 = vsub.f32 0.0, %v494_v53  ;;  %3484 = vpow2.f32 %v501_v54 }
 0x10d   : > { %v538_v62 = vsub.f32 0.0, %v534_v55  ;;  %3486 = vpow2.f32 %v541_v56  ;;  %v478_v63 = vsub.f32 0.0, %v474_v57  ;;  %v2753_v2 = vadd.f32 1.5, %v4049_v36 }
 0x10e   : > { %v4061_v3 = vmul.f32 1.75, %v464_v60  ;;  %v503_v6 = vmul.f32 1.442695, %v498_v61  ;;  %3488 = vpow2.f32 %v481_v58  ;;  %v517_v7 = vsub.f32 0.0, %v513_v41 }
 0x10f   : > { %v543_v9 = vmul.f32 1.442695, %v538_v62  ;;  %v483_v10 = vmul.f32 1.442695, %v478_v63  ;;  %v514_v11 = vmul.f32 %v2753_v2, %v2753_v2  ;;  %v2750_v12 = vadd.f32 2.5, %v4058_v59 }
 0x110   : > { %3490 = vpow2.f32 %v503_v6  ;;  %v521_v14 = vmul.f32 1.442695, %v517_v7  ;;  %v2751_v15 = vadd.f32 2.5, %v4061_v3  ;;  %v2758_v16 = vadd.f32 0.49999982, %v4058_v59  ;;  %v3362_v7 = vld [vmem:[#allocation5 + $0x138] sm:$0xff]  }
 0x111   : > { %3492 = vpow2.f32 %v543_v9  ;;  %v518_v17 = vsub.f32 0.0, %v514_v11  ;;  %v495_v18 = vmul.f32 %v2750_v12, %v2750_v12  ;;  %v2759_v19 = vadd.f32 0.49999982, %v4061_v3 }
 0x112   : > { %3494 = vpow2.f32 %v483_v10  ;;  %v496_v20 = vmul.f32 %v2751_v15, %v2751_v15  ;;  %v535_v21 = vmul.f32 %v2758_v16, %v2758_v16  ;;  %v2746_v22 = vadd.f32 3.5, %v4058_v59 }
 0x113   : > { %3496 = vpow2.f32 %v521_v14  ;;  %v523_v23 = vmul.f32 1.442695, %v518_v17  ;;  %v499_v24 = vsub.f32 0.0, %v495_v18  ;;  %v536_v25 = vmul.f32 %v2759_v19, %v2759_v19  ;;  %v3363_v18 = vld [vmem:[#allocation5 + $0x1b8] sm:$0xff]  }
 0x114   : > { %v500_v27 = vsub.f32 0.0, %v496_v20  ;;  %v539_v28 = vsub.f32 0.0, %v535_v21  ;;  %v2747_v29 = vadd.f32 3.5, %v4061_v3  ;;  %v475_v30 = vmul.f32 %v2746_v22, %v2746_v22  ;;  %v4084_v20 = vld [vmem:[%s3995_s25 + $0x10] sm:$0xff] }
 0x115   : > { %3498 = vpow2.f32 %v523_v23  ;;  %v505_v0 = vmul.f32 1.442695, %v499_v24  ;;  %v540_v31 = vsub.f32 0.0, %v536_v25  ;;  %v2754_v32 = vadd.f32 1.5, %v4058_v59  ;;  %v3365_v23 = vld [vmem:[#allocation5 + $0x1f0] sm:$0xff]  }
 0x116   : > { %v507_v33 = vmul.f32 1.442695, %v500_v27  ;;  %v545_v1 = vmul.f32 1.442695, %v539_v28  ;;  %v476_v34 = vmul.f32 %v2747_v29, %v2747_v29  ;;  %v479_v35 = vsub.f32 0.0, %v475_v30  ;;  %v3366_v24 = vld [vmem:[#allocation5 + $0x130] sm:$0xff]  }
 0x117   : > { %3500 = vpow2.f32 %v505_v0  ;;  %v547_v37 = vmul.f32 1.442695, %v540_v31  ;;  %v2755_v4 = vadd.f32 1.5, %v4061_v3  ;;  %v515_v38 = vmul.f32 %v2754_v32, %v2754_v32 }
 0x118   : > { %3502 = vpow2.f32 %v507_v33  ;;  %v480_v39 = vsub.f32 0.0, %v476_v34  ;;  %v485_v40 = vmul.f32 1.442695, %v479_v35  ;;  %v2765_v41 = vadd.f32 -1.5000001, %v4049_v36  ;;  %v3367_v34 = vld [vmem:[#allocation5 + $0x1b0] sm:$0xff]  }
 0x119   : > { %v3485_v44 = vpop.eup %3484  ;;  %3504 = vpow2.f32 %v545_v1  ;;  %v516_v5 = vmul.f32 %v2755_v4, %v2755_v4  ;;  %v519_v45 = vsub.f32 0.0, %v515_v38  ;;  %v577_v46 = vsub.f32 0.0, %v4051_v42 }
 0x11a   : > { %v3487_v47 = vpop.eup %3486  ;;  %3506 = vpow2.f32 %v547_v37  ;;  %v487_v48 = vmul.f32 1.442695, %v480_v39  ;;  %v574_v49 = vmul.f32 %v2765_v41, %v2765_v41  ;;  %v2773_v50 = vadd.f32 -3.5, %v4049_v36 }
 0x11b   : > { %v3489_v51 = vpop.eup %3488  ;;  %3508 = vpow2.f32 %v485_v40  ;;  %v520_v52 = vsub.f32 0.0, %v516_v5  ;;  %v525_v53 = vmul.f32 1.442695, %v519_v45  ;;  %v581_v54 = vmul.f32 1.442695, %v577_v46  ;;  %v3370_v40 = vld [vmem:[#allocation5 + $0x128] sm:$0xff]  }
 0x11c   : > { %3510 = vpow2.f32 %v487_v48  ;;  %v578_v55 = vsub.f32 0.0, %v574_v49  ;;  %v614_v56 = vmul.f32 %v2773_v50, %v2773_v50  ;;  %v617_v57 = vsub.f32 0.0, %v4053_v43  ;;  %v3364_v43 = vld [vmem:[#allocation5 + $0x170] sm:$0xff]   ;;  %v3372_v45 = vld [vmem:[#allocation5 + $0x160] sm:$0xff]  }
 0x11d   : > { %v3491_v58 = vpop.eup %3490  ;;  %3512 = vpow2.f32 %v525_v53  ;;  %v527_v60 = vmul.f32 1.442695, %v520_v52  ;;  %v2760_v10 = vadd.f32 -0.5000002, %v4039_v26  ;;  %v2761_v15 = vadd.f32 -0.5000002, %v4049_v36 }
 0x11e   : > { %v3493_v42 = vpop.eup %3492  ;;  %v658_v61 = vpack.c.bf16 %v3491_v58, %v3485_v44  ;;  %3514 = vpow2.f32 %v581_v54  ;;  %v583_v62 = vmul.f32 1.442695, %v578_v55  ;;  %v618_v63 = vsub.f32 0.0, %v614_v56  ;;  %v3371_v53 = vld [vmem:[#allocation5 + $0x1a8] sm:$0xff]   ;;  %v3373_v58 = vld [vmem:[#allocation5 + $0x1e0] sm:$0xff]  }
 0x11f   : > { %v3495_v2 = vpop.eup %3494  ;;  %v660_v6 = vpack.c.bf16 %v3493_v42, %v3487_v47  ;;  %3516 = vpow2.f32 %v527_v60  ;;  %v621_v9 = vmul.f32 1.442695, %v617_v57  ;;  %v2769_v16 = vadd.f32 -2.5000005, %v4049_v36  ;;  %v3368_v36 = vld [vmem:[#allocation5 + $0x168] sm:$0xff]   ;;  %v3374_v60 = vld [vmem:[#allocation5 + $0x120] sm:$0xff]  }
 0x120   : > { %v3497_v11 = vpop.eup %3496  ;;  %1290 = vmatprep.mubr.bf16.mxu0 %v658_v61  ;;  %v657_v12 = vpack.c.bf16 %v3495_v2, %v3489_v51  ;;  %3518 = vpow2.f32 %v583_v62  ;;  %v623_v14 = vmul.f32 1.442695, %v618_v63  ;;  %v2767_v19 = vadd.f32 -1.5000001, %v4061_v3 }
 0x121   : > { %1339 = vmatprep.mubr.bf16.mxu1 %v660_v6  ;;  %3520 = vpow2.f32 %v621_v9  ;;  %v2778_v21 = vmul.f32 -1.442695, %v4084_v20  ;;  %v553_v25 = vmul.f32 %v2760_v10, %v2760_v10  ;;  %v2766_v27 = vadd.f32 -1.5000001, %v4058_v59 }
 0x122   : > { %v3499_v17 = vpop.eup %3498  ;;  %1291 = vmatmul.mubr.bf16.vlgmr.msra.gmra.mxu0 %v657_v12  ;;  %3522 = vpow2.f32 %v623_v14  ;;  %v554_v29 = vmul.f32 %v2761_v15, %v2761_v15  ;;  %v2768_v30 = vadd.f32 -2.5000005, %v4039_v26  ;;  %v641_v31 = vadd.f32 1.0, %v4063_v8  ;;  %v3369_v26 = vld [vmem:[#allocation5 + $0x1e8] sm:$0xff]  }
 0x123   : > { %v659_v22 = vpack.c.bf16 %v3499_v17, %v3497_v11  ;;  %3028 = vmatpush3.bf16.msra.mxu0 %v3362_v7  ;;  %v594_v32 = vmul.f32 %v2769_v16, %v2769_v16  ;;  %v2775_v33 = vadd.f32 -3.5, %v4061_v3  ;;  %v576_v37 = vmul.f32 %v2767_v19, %v2767_v19  ;;  %v3376_v11 = vld [vmem:[#allocation5 + $0x158] sm:$0xff]   ;;  %v3375_v17 = vld [vmem:[#allocation5 + $0x1a0] sm:$0xff]  }
 0x124   : > { %v3501_v28 = vpop.eup %3500  ;;  %3029 = vmatprep.subr.bf16.mxu0 %v3364_v43  ;;  %v2774_v4 = vadd.f32 -3.5, %v4058_v59  ;;  %v642_v39 = vadd.f32 1.0, %v4066_v13  ;;  %3524 = vpow2.f32 %v2778_v21  ;;  %v557_v8 = vsub.f32 0.0, %v553_v25 }
 0x125   : > { %v3503_v0 = vpop.eup %3502  ;;  %1340 = vmatmul.mubr.bf16.vlgmr.msra.gmra.mxu1 %v659_v22  ;;  %v575_v41 = vmul.f32 %v2766_v27, %v2766_v27  ;;  %v558_v46 = vsub.f32 0.0, %v554_v29  ;;  %v593_v47 = vmul.f32 %v2768_v30, %v2768_v30  ;;  %v616_v48 = vmul.f32 %v2775_v33, %v2775_v33  ;;  %v3378_v27 = vld [vmem:[#allocation5 + $0x118] sm:$0xff]  }
 0x126   : > { %v3505_v1 = vpop.eup %3504  ;;  %3056 = vmatpush3.bf16.msra.mxu1 %v3363_v18  ;;  %v667_v35 = vpack.c.bf16 %v3503_v0, %v3501_v28  ;;  %3526 = vrcp.f32 %v641_v31  ;;  %v598_v50 = vsub.f32 0.0, %v594_v32  ;;  %v2763_v13 = vadd.f32 -0.5000002, %v4061_v3  ;;  %v3380_v28 = vld [vmem:[#allocation5 + $0x150] sm:$0xff]   ;;  %v3379_v0 = vld [vmem:[#allocation5 + $0x198] sm:$0xff]  }
 0x127   : > { %v3507_v38 = vpop.eup %3506  ;;  %3057 = vmatprep.subr.bf16.mxu1 %v3365_v23  ;;  %3030 = vmatpush3.bf16.msra.mxu0 %v3366_v24  ;;  %v580_v54 = vsub.f32 0.0, %v576_v37  ;;  %v615_v55 = vmul.f32 %v2774_v4, %v2774_v4  ;;  %v2762_v56 = vadd.f32 -0.5000002, %v4058_v59  ;;  %3528 = vrcp.f32 %v642_v39  ;;  %v3377_v23 = vld [vmem:[#allocation5 + $0x1d8] sm:$0xff]   ;;  %v3382_v4 = vld [vmem:[#allocation5 + $0x110] sm:$0xff]  }
 0x128   : > { %v3509_v44 = vpop.eup %3508  ;;  %1298 = vmatprep.mubr.bf16.mxu0 %v667_v35  ;;  %v669_v5 = vpack.c.bf16 %v3507_v38, %v3505_v1  ;;  %3031 = vmatprep.subr.bf16.mxu0 %v3368_v36  ;;  %v561_v42 = vmul.f32 1.442695, %v557_v8  ;;  %v579_v61 = vsub.f32 0.0, %v575_v41  ;;  %v563_v63 = vmul.f32 1.442695, %v558_v46  ;;  %v4098_v33 = vld [vmem:[%s3995_s25 + $0x18] sm:$0xff] }
 0x129   : > { %v3511_v49 = vpop.eup %3510  ;;  %v597_v2 = vsub.f32 0.0, %v593_v47  ;;  %v620_v6 = vsub.f32 0.0, %v616_v48  ;;  %v2771_v7 = vadd.f32 -2.5000005, %v4061_v3  ;;  %v603_v12 = vmul.f32 1.442695, %v598_v50 }
 0x12a   : > { %v3513_v51 = vpop.eup %3512  ;;  %3058 = vmatpush3.bf16.msra.mxu1 %v3367_v34  ;;  %1347 = vmatprep.mubr.bf16.mxu1 %v669_v5  ;;  %v666_v52 = vpack.c.bf16 %v3511_v49, %v3509_v44  ;;  %v556_v43 = vmul.f32 %v2763_v13, %v2763_v13  ;;  %v2770_v14 = vadd.f32 -2.5000005, %v4058_v59  ;;  %v587_v18 = vmul.f32 1.442695, %v580_v54  ;;  %v3381_v34 = vld [vmem:[#allocation5 + $0x1d0] sm:$0xff]   ;;  %v3384_v38 = vld [vmem:[#allocation5 + $0x148] sm:$0xff]  }
 0x12b   : > { %v3515_v57 = vpop.eup %3514  ;;  %3059 = vmatprep.subr.bf16.mxu1 %v3369_v26  ;;  %3032 = vmatpush3.bf16.msra.mxu0 %v3370_v40  ;;  %v619_v19 = vsub.f32 0.0, %v615_v55  ;;  %v555_v21 = vmul.f32 %v2762_v56, %v2762_v56  ;;  %3530 = vpow2.f32 %v561_v42  ;;  %v585_v3 = vmul.f32 1.442695, %v579_v61  ;;  %v3383_v8 = vld [vmem:[#allocation5 + $0x190] sm:$0xff]   ;;  %v3385_v44 = vld [vmem:[#allocation5 + $0x1c8] sm:$0xff]   ;;  %v3388_v47 = vld [vmem:[#allocation5 + $0x140] sm:$0xff]  }
 0x12c   : > { %v3517_v62 = vpop.eup %3516  ;;  %1299 = vmatmul.mubr.bf16.gmra.mxu0 %v666_v52  ;;  %3033 = vmatprep.subr.bf16.mxu0 %v3372_v45  ;;  %v596_v24 = vmul.f32 %v2771_v7, %v2771_v7  ;;  %3532 = vpow2.f32 %v563_v63  ;;  %v627_v59 = vmul.f32 1.442695, %v620_v6  ;;  %v601_v36 = vmul.f32 1.442695, %v597_v2  ;;  %v3386_v46 = vld [vmem:[#allocation5 + $0x108] sm:$0xff]   ;;  %v3389_v50 = vld [vmem:[#allocation5 + $0x1c0] sm:$0xff]  }
 0x12d   : > { %v3519_v9 = vpop.eup %3518  ;;  %v668_v10 = vpack.c.bf16 %v3517_v62, %v3513_v51  ;;  %3534 = vpow2.f32 %v603_v12  ;;  %v560_v29 = vsub.f32 0.0, %v556_v43  ;;  %v595_v30 = vmul.f32 %v2770_v14, %v2770_v14  ;;  %v3387_v49 = vld [vmem:[#allocation5 + $0x188] sm:$0xff]   ;;  %v3390_v51 = vld [vmem:[#allocation5 + $0x100] sm:$0xff]   ;;  %v3393_v42 = vld [vmem:[#allocation5 + $0x230] sm:$0xff]  }
 0x12e   : > { %v3521_v15 = vpop.eup %3520  ;;  %3060 = vmatpush3.bf16.msra.mxu1 %v3371_v53  ;;  %v662_v16 = vpack.c.bf16 %v3519_v9, %v3515_v57  ;;  %3536 = vpow2.f32 %v587_v18  ;;  %v625_v31 = vmul.f32 1.442695, %v619_v19  ;;  %v559_v32 = vsub.f32 0.0, %v555_v21  ;;  %v3392_v53 = vld [vmem:[#allocation5 + $0x238] sm:$0xff]   ;;  %v3391_v55 = vld [vmem:[#allocation5 + $0x180] sm:$0xff]   ;;  %v3394_v43 = vld [vmem:[#allocation5 + $0x228] sm:$0xff]  }
 0x12f   : > { %v3523_v22 = vpop.eup %3522  ;;  %1348 = vmatmul.mubr.bf16.gmra.mxu1 %v668_v10  ;;  %3061 = vmatprep.subr.bf16.mxu1 %v3373_v58  ;;  %v2779_v1 = vmul.f32 -1.442695, %v4098_v33  ;;  %3538 = vpow2.f32 %v585_v3  ;;  %v600_v35 = vsub.f32 0.0, %v596_v24  ;;  %v567_v39 = vmul.f32 1.442695, %v560_v29  ;;  %v3650_v9 = vld [vmem:[%s3995_s25] sm:$0xff] }
 0x130   : > { %1388 = vmatprep.mubr.bf16.mxu0 %v662_v16  ;;  %v664_v25 = vpack.c.bf16 %v3523_v22, %v3521_v15  ;;  %3034 = vmatpush3.bf16.msra.mxu0 %v3374_v60  ;;  %3540 = vpow2.f32 %v627_v59  ;;  %v599_v26 = vsub.f32 0.0, %v595_v30  ;;  %v565_v41 = vmul.f32 1.442695, %v559_v32  ;;  %v3395_v22 = vld [vmem:[#allocation5 + $0x220] sm:$0xff]   ;;  %v3396_v24 = vld [vmem:[#allocation5 + $0x218] sm:$0xff]  }
 0x131   : > { %3035 = vmatprep.subr.bf16.mxu0 %v3376_v11  ;;  %v4101_v37 = vpop.eup %3524  ;;  %3542 = vpow2.f32 %v601_v36  ;;  %v607_v5 = vmul.f32 1.442695, %v600_v35  ;;  %v3651_v11 = vld [vmem:[%s3995_s25 + $0x8] sm:$0xff]  ;;  %v3399_v36 = vld [vmem:[#allocation5 + $0x200] sm:$0xff]   ;;  %s379_s25 = scalar_lea.vmem [#allocation8], %s2738_s23 }
 0x132   : > { %1437 = vmatprep.mubr.bf16.mxu1 %v664_v25  ;;  %3062 = vmatpush3.bf16.msra.mxu1 %v3375_v17  ;;  %3544 = vpow2.f32 %v625_v31  ;;  %v605_v48 = vmul.f32 1.442695, %v599_v26  ;;  %v643_v15 = vadd.f32 1.0, %v4101_v37  ;;  %v3397_v25 = vld [vmem:[#allocation5 + $0x210] sm:$0xff]   ;;  %s2637_s15 = sshll.u32 %s379_s25, 4  ;;  %s4210_s15 = int_to_ptr.vmem [resolvable:$true] %s2637_s15 }
 0x133   : > { %3063 = vmatprep.subr.bf16.mxu1 %v3377_v23  ;;  %v3527_v40 = vpop.eup %3526  ;;  %3546 = vpow2.f32 %v2779_v1  ;;  %s3732_s13 = scalar_lea.vmem %s4210_s15, 512  ;;  %p3739_p6 = scmp.lt.s32.totalorder %s4210_s15, %s3737_s29 }
 0x134   : > { %3036 = vmatpush3.bf16.msra.mxu0 %v3378_v27  ;;  %v3529_v45 = vpop.eup %3528  ;;  %3548 = vpow2.f32 %v567_v39  ;;  %v653_v10 = vmul.f32 %v3650_v9, %v3527_v40  ;;  %v3398_v27 = vld [vmem:[#allocation5 + $0x208] sm:$0xff]   ;;  %p3733_p11 = scmp.ne.s32.totalorder %s4210_s15, %s3732_s13  ;;  %p3740_p12 = scmp.lt.s32.totalorder %s3738_s26, %s3732_s13 }
 0x135   : > { %3037 = vmatprep.subr.bf16.mxu0 %v3380_v28  ;;  %3550 = vpow2.f32 %v565_v41  ;;  %v654_v12 = vmul.f32 %v3651_v11, %v3529_v45 }
 0x136   : > { %3064 = vmatpush3.bf16.msra.mxu1 %v3379_v0  ;;  %3552 = vpow2.f32 %v607_v5  ;;  %p3734_p1 = pnand %p3733_p11, %p4288_p10  ;;  %p3741_p7 = por %p3740_p12, %p3739_p6 }
 0x137   : > { %3065 = vmatprep.subr.bf16.mxu1 %v3381_v34  ;;  %3554 = vpow2.f32 %v605_v48  ;;  %v665_v19 = vpack.c.bf16 %v654_v12, %v653_v10 }
 0x138   : > { %3038 = vmatpush3.bf16.msra.mxu0 %v3382_v4  ;;  %v3531_v13 = vpop.eup %3530  ;;  %3556 = vrcp.f32 %v643_v15  ;;  %p3735_p2 = pneg %p3734_p1 }
 0x139   : > { %3039 = vmatprep.subr.bf16.mxu0 %v3384_v38  ;;  %v3533_v52 = vpop.eup %3532 }
 0x13a   : > { %3066 = vmatpush3.bf16.msra.mxu1 %v3383_v8  ;;  %v3535_v54 = vpop.eup %3534  ;;  %v661_v60 = vpack.c.bf16 %v3533_v52, %v3531_v13  ;;  %p3742_p9 = pnand %p3741_p7, %p3735_p2 }
 0x13b   : > { %3067 = vmatprep.subr.bf16.mxu1 %v3385_v44  ;;  %v3537_v56 = vpop.eup %3536 }
 0x13c   : > { %3040 = vmatpush3.bf16.msra.mxu0 %v3386_v46  ;;  %v3539_v57 = vpop.eup %3538 }
 0x13d   : > { %3041 = vmatprep.subr.bf16.mxu0 %v3388_v47  ;;  %v3541_v58 = vpop.eup %3540  ;;  %v671_v62 = vpack.c.bf16 %v3537_v56, %v3539_v57 }
 0x13e   : > { %3068 = vmatpush3.bf16.msra.mxu1 %v3387_v49  ;;  %v3543_v61 = vpop.eup %3542 }
 0x13f   : > { %3069 = vmatprep.subr.bf16.mxu1 %v3389_v50  ;;  %v3545_v63 = vpop.eup %3544  ;;  %v663_v2 = vpack.c.bf16 %v3535_v54, %v3543_v61 }
 0x140   : > { %3042 = vmatpush3.bf16.msra.mxu0 %v3390_v51  ;;  %v3547_v6 = vpop.eup %3546  ;;  %v673_v7 = vpack.c.bf16 %v3541_v58, %v3545_v63  ;;  %v2780_v51 = vld [vmem:[%s4262_s4] ss:$0 sm:$0xff] }
 0x141   : > { %3215 = vmatprep.subr.bf16.mxu0 %v3392_v53  ;;  %v3549_v14 = vpop.eup %3548  ;;  %v644_v17 = vadd.f32 1.0, %v3547_v6 }
 0x142   : > { %3070 = vmatpush3.bf16.msra.mxu1 %v3391_v55  ;;  %v3551_v16 = vpop.eup %3550 }
 0x143   : > { %1389 = vmatmul.mubr.bf16.vlgmr.msra.gmra.mxu0 %v661_v60  ;;  %v3553_v18 = vpop.eup %3552  ;;  %v670_v21 = vpack.c.bf16 %v3549_v14, %v3551_v16  ;;  %3558 = vrcp.f32 %v644_v17 }
 0x144   : > { %1396 = vmatprep.mubr.bf16.mxu0 %v671_v62  ;;  %3216 = vmatpush3.bf16.msra.mxu0 %v3392_v53  ;;  %v3555_v23 = vpop.eup %3554 }
 0x145   : > { %1438 = vmatmul.mubr.bf16.vlgmr.msra.gmra.mxu1 %v663_v2  ;;  %3217 = vmatprep.subr.bf16.mxu0 %v3393_v42  ;;  %v672_v3 = vpack.c.bf16 %v3553_v18, %v3555_v23  ;;  %v3557_v59 = vpop.eup %3556 }
 0x146   : > { %1445 = vmatprep.mubr.bf16.mxu1 %v673_v7  ;;  %v655_v29 = vmul.f32 %v4084_v20, %v3557_v59 }
 0x148   : > { %3218 = vmatpush3.bf16.msra.mxu0 %v3393_v42 }
 0x149   : > { %3219 = vmatprep.subr.bf16.mxu0 %v3394_v43 }
 0x14b   : > { %1397 = vmatmul.mubr.bf16.gmra.mxu0 %v670_v21 }
 0x14c   : > { %3220 = vmatpush3.bf16.msra.mxu0 %v3394_v43  ;;  %3231 = vmatprep.mubr.bf16.mxu0 %v665_v19 }
 0x14d   : > { %1446 = vmatmul.mubr.bf16.gmra.mxu1 %v672_v3  ;;  %3221 = vmatprep.subr.bf16.mxu0 %v3395_v22 }
 0x150   : > { %3222 = vmatpush3.bf16.msra.mxu0 %v3395_v22  ;;  %v3559_v28 = vpop.eup %3558 }
 0x151   : > { %3223 = vmatprep.subr.bf16.mxu0 %v3396_v24  ;;  %v656_v30 = vmul.f32 %v4098_v33, %v3559_v28 }
 0x153   : > { %v674_v0 = vpack.c.bf16 %v656_v30, %v655_v29 }
 0x154   : > { %3224 = vmatpush3.bf16.msra.mxu0 %v3396_v24 }
 0x155   : > { %3225 = vmatprep.subr.bf16.mxu0 %v3397_v25 }
 0x158   : > { %3226 = vmatpush3.bf16.msra.mxu0 %v3397_v25 }
 0x159   : > { %3227 = vmatprep.subr.bf16.mxu0 %v3398_v27 }
 0x15c   : > { %3228 = vmatpush3.bf16.msra.mxu0 %v3398_v27 }
 0x15d   : > { %3229 = vmatprep.subr.bf16.mxu0 %v3399_v36 }
 0x160   : > { %3230 = vmatpush3.bf16.msra.mxu0 %v3399_v36 }
 0x163   : > { %3232 = vmatmul.mubr.bf16.vlgmr.msra.gmra.mxu0 %v674_v0 }
 0x1e2   : > { %v2987_v31 = vpop.f32.mrf.mxu0 }
 0x1e4   : > { %v2988_v32 = vpop.f32.mrf.mxu0 }
 0x1e5   : > { %v3015_v34 = vpop.f32.mrf.mxu1  ;;  %v2989_v13 = vadd.f32 %v2988_v32, %v2987_v31 }
 0x1e6   : > { %v2990_v1 = vpop.f32.mrf.mxu0 }
 0x1e7   : > { %v3016_v37 = vpop.f32.mrf.mxu1  ;;  %v1293_v54 = vadd.f32 %v2989_v13, %v2780_v51  ;;  %v3410_v13 = vld [vmem:[#allocation7 + $0x28] sm:$0xff]  }
 0x1e8   : > { %v2991_v35 = vpop.f32.mrf.mxu0  ;;  %v3017_v57 = vadd.f32 %v3016_v37, %v3015_v34 }
 0x1e9   : > { %v3018_v38 = vpop.f32.mrf.mxu1  ;;  %v2992_v55 = vadd.f32 %v2991_v35, %v2990_v1 }
 0x1ea   : > { %v1342_v42 = vadd.f32 %v3017_v57, %v1293_v54  ;;  %v3414_v54 = vld [vmem:[#allocation7 + $0x20] sm:$0xff]   ;;  %v3417_v57 = vld [vmem:[#allocation7 + $0xd8] sm:$0xff]  }
 0x1eb   : > { %v3019_v26 = vpop.f32.mrf.mxu1  ;;  %v1296_v61 = vadd.f32 %v2992_v55, %v2780_v51  ;;  %v3415_v55 = vld [vmem:[#allocation7 + $0xa0] sm:$0xff]  }
 0x1ec   : > { %v2993_v4 = vpop.f32.mrf.mxu0  ;;  %v3020_v2 = vadd.f32 %v3019_v26, %v3018_v38 }
 0x1ee   : > { %v2994_v39 = vpop.f32.mrf.mxu0  ;;  %v1345_v10 = vadd.f32 %v3020_v2, %v1296_v61  ;;  %v3421_v61 = vld [vmem:[#allocation7 + $0xd0] sm:$0xff]   ;;  %v3424_v2 = vld [vmem:[#allocation7 + $0x48] sm:$0xff]  }
 0x1ef   : > { %v3021_v8 = vpop.f32.mrf.mxu1  ;;  %v2995_v62 = vadd.f32 %v2994_v39, %v2993_v4 }
 0x1f0   : > { %v2996_v40 = vpop.f32.mrf.mxu0 }
 0x1f1   : > { %v3022_v41 = vpop.f32.mrf.mxu1  ;;  %v1301_v11 = vadd.f32 %v2995_v62, %v2780_v51  ;;  %v3422_v62 = vld [vmem:[#allocation7 + $0x10] sm:$0xff]  }
 0x1f2   : > { %v2997_v20 = vpop.f32.mrf.mxu0  ;;  %v3023_v16 = vadd.f32 %v3022_v41, %v3021_v8  ;;  %v3400_v41 = vld [vmem:[#allocation7 + $0x78] sm:$0xff]  }
 0x1f3   : > { %v3024_v44 = vpop.f32.mrf.mxu1  ;;  %v2998_v12 = vadd.f32 %v2997_v20, %v2996_v40  ;;  %3093 = vmatprep.subr.bf16.mxu1 %v3400_v41 }
 0x1f4   : > { %v1350_v22 = vadd.f32 %v3023_v16, %v1301_v11  ;;  %v3429_v11 = vld [vmem:[#allocation7 + $0xc0] sm:$0xff]  }
 0x1f5   : > { %v3025_v45 = vpop.f32.mrf.mxu1  ;;  %v1304_v23 = vadd.f32 %v2998_v12, %v2780_v51  ;;  %v3411_v51 = vld [vmem:[#allocation7 + $0xa8] sm:$0xff]   ;;  %v3430_v12 = vld [vmem:[#allocation7] sm:$0xff]  }
 0x1f6   : > { %v3026_v59 = vadd.f32 %v3025_v45, %v3024_v44  ;;  %v3402_v44 = vld [vmem:[#allocation7 + $0x38] sm:$0xff]   ;;  %v3404_v45 = vld [vmem:[#allocation7 + $0x70] sm:$0xff]  }
 0x1f7   : > { %3094 = vmatpush3.bf16.msra.mxu1 %v3402_v44 }
 0x1f8   : > { %v1353_v0 = vadd.f32 %v3026_v59, %v1304_v23  ;;  %3095 = vmatprep.subr.bf16.mxu1 %v3404_v45 }
 0x203   : > { %v3043_v33 = vpop.f32.mrf.mxu0 }
 0x205   : > { %v3044_v5 = vpop.f32.mrf.mxu0  ;;  %v3071_v47 = vpop.f32.mrf.mxu1 }
 0x206   : > { %v3045_v58 = vadd.f32 %v3044_v5, %v3043_v33  ;;  %v3401_v33 = vld [vmem:[#allocation7 + $0xf8] sm:$0xff]  }
 0x207   : > { %v3046_v46 = vpop.f32.mrf.mxu0  ;;  %v3072_v49 = vpop.f32.mrf.mxu1  ;;  %v3403_v5 = vld [vmem:[#allocation7 + $0xb8] sm:$0xff]   ;;  %3121 = vmatprep.subr.bf16.mxu0 %v3401_v33 }
 0x208   : > { %v1391_v6 = vadd.f32 %v3045_v58, %v1342_v42  ;;  %v3073_v43 = vadd.f32 %v3072_v49, %v3071_v47  ;;  %3122 = vmatpush3.bf16.msra.mxu0 %v3403_v5  ;;  %v3406_v47 = vld [vmem:[#allocation7 + $0x30] sm:$0xff]   ;;  %v3408_v49 = vld [vmem:[#allocation7 + $0x68] sm:$0xff]   ;;  %v3418_v58 = vld [vmem:[#allocation7 + $0x18] sm:$0xff]  }
 0x209   : > { %v3047_v48 = vpop.f32.mrf.mxu0  ;;  %v3074_v52 = vpop.f32.mrf.mxu1  ;;  %3096 = vmatpush3.bf16.msra.mxu1 %v3406_v47  ;;  %v3420_v42 = vld [vmem:[#allocation7 + $0x50] sm:$0xff]  }
 0x20a   : > { %v3048_v7 = vadd.f32 %v3047_v48, %v3046_v46  ;;  %v1440_v19 = vadd.f32 %v3073_v43, %v1391_v6  ;;  %v3405_v46 = vld [vmem:[#allocation7 + $0xf0] sm:$0xff]   ;;  %3097 = vmatprep.subr.bf16.mxu1 %v3408_v49  ;;  %v3425_v6 = vld [vmem:[#allocation7 + $0xc8] sm:$0xff]   ;;  %v3431_v43 = vld [vmem:[#allocation7 + $0x80] sm:$0xff]  }
 0x20b   : > { %v3049_v50 = vpop.f32.mrf.mxu0  ;;  %v3075_v56 = vpop.f32.mrf.mxu1  ;;  %v3407_v48 = vld [vmem:[#allocation7 + $0xb0] sm:$0xff]   ;;  %3123 = vmatprep.subr.bf16.mxu0 %v3405_v46  ;;  %v2853_v49 = vld [vmem:[%s4263_s5] ss:$0 sm:$0xff] }
 0x20c   : > { %v1394_v17 = vadd.f32 %v3048_v7, %v1345_v10  ;;  %v3076_v3 = vadd.f32 %v3075_v56, %v3074_v52  ;;  %3124 = vmatpush3.bf16.msra.mxu0 %v3407_v48  ;;  %v3412_v52 = vld [vmem:[#allocation7 + $0x60] sm:$0xff]   ;;  %v3416_v56 = vld [vmem:[#allocation7 + $0x58] sm:$0xff]   ;;  %v3426_v7 = vld [vmem:[#allocation7 + $0x8] sm:$0xff]  }
 0x20d   : > { %v3050_v53 = vpop.f32.mrf.mxu0  ;;  %v3077_v63 = vpop.f32.mrf.mxu1  ;;  %3098 = vmatpush3.bf16.msra.mxu1 %v3410_v13  ;;  %v3428_v10 = vld [vmem:[#allocation7 + $0x40] sm:$0xff]  }
 0x20e   : > { %v3051_v18 = vadd.f32 %v3050_v53, %v3049_v50  ;;  %v1443_v29 = vadd.f32 %v3076_v3, %v1394_v17  ;;  %v3409_v50 = vld [vmem:[#allocation7 + $0xe8] sm:$0xff]   ;;  %v3413_v53 = vld [vmem:[#allocation7 + $0xe0] sm:$0xff]   ;;  %3099 = vmatprep.subr.bf16.mxu1 %v3412_v52 }
 0x20f   : > { %v3052_v60 = vpop.f32.mrf.mxu0  ;;  %v3078_v14 = vpop.f32.mrf.mxu1  ;;  %3125 = vmatprep.subr.bf16.mxu0 %v3409_v50  ;;  %v2854_v13 = vld [vmem:[%s4264_s6] ss:$0 sm:$0xff] }
 0x210   : > { %v1399_v28 = vadd.f32 %v3051_v18, %v1350_v22  ;;  %v3079_v31 = vadd.f32 %v3078_v14, %v3077_v63  ;;  %3126 = vmatpush3.bf16.msra.mxu0 %v3411_v51  ;;  %v3423_v63 = vld [vmem:[#allocation7 + $0x90] sm:$0xff]   ;;  %v3432_v14 = vld [vmem:[#allocation7 + $0x178] sm:$0xff]  }
 0x211   : > { %v3053_v9 = vpop.f32.mrf.mxu0  ;;  %v3080_v25 = vpop.f32.mrf.mxu1  ;;  %3127 = vmatprep.subr.bf16.mxu0 %v3413_v53  ;;  %3100 = vmatpush3.bf16.msra.mxu1 %v3414_v54 }
 0x212   : > { %v3054_v36 = vadd.f32 %v3053_v9, %v3052_v60  ;;  %v1448_v37 = vadd.f32 %v3079_v31, %v1399_v28  ;;  %v3419_v60 = vld [vmem:[#allocation7 + $0x98] sm:$0xff]   ;;  %3101 = vmatprep.subr.bf16.mxu1 %v3416_v56  ;;  %v3427_v9 = vld [vmem:[#allocation7 + $0x88] sm:$0xff]  }
 0x213   : > { %v3081_v34 = vpop.f32.mrf.mxu1 }
 0x214   : > { %v1402_v35 = vadd.f32 %v3054_v36, %v1353_v0  ;;  %v3082_v4 = vadd.f32 %v3081_v34, %v3080_v25  ;;  %3128 = vmatpush3.bf16.msra.mxu0 %v3415_v55 }
 0x215   : > { %3129 = vmatprep.subr.bf16.mxu0 %v3417_v57  ;;  %3102 = vmatpush3.bf16.msra.mxu1 %v3418_v58 }
 0x216   : > { %v1451_v26 = vadd.f32 %v3082_v4, %v1402_v35  ;;  %3103 = vmatprep.subr.bf16.mxu1 %v3420_v42 }
 0x218   : > { %3130 = vmatpush3.bf16.msra.mxu0 %v3419_v60 }
 0x219   : > { %3131 = vmatprep.subr.bf16.mxu0 %v3421_v61  ;;  %3104 = vmatpush3.bf16.msra.mxu1 %v3422_v62 }
 0x21a   : > { %3105 = vmatprep.subr.bf16.mxu1 %v3424_v2 }
 0x21c   : > { %3132 = vmatpush3.bf16.msra.mxu0 %v3423_v63 }
 0x21d   : > { %3133 = vmatprep.subr.bf16.mxu0 %v3425_v6  ;;  %3106 = vmatpush3.bf16.msra.mxu1 %v3426_v7 }
 0x21e   : > { %3107 = vmatprep.subr.bf16.mxu1 %v3428_v10 }
 0x220   : > { %3134 = vmatpush3.bf16.msra.mxu0 %v3427_v9 }
 0x221   : > { %3135 = vmatprep.subr.bf16.mxu0 %v3429_v11  ;;  %3108 = vmatpush3.bf16.msra.mxu1 %v3430_v12 }
 0x222   : > { %3149 = vmatprep.subr.bf16.mxu1 %v3432_v14 }
 0x223   : > { %v3233_v15 = vpop.f32.mrf.mxu0 }
 0x224   : > { %v4119_v38 = vadd.f32 %v3233_v15, %v1448_v37  ;;  %v3433_v15 = vld [vmem:[#allocation7 + $0x1f8] sm:$0xff]   ;;  %3136 = vmatpush3.bf16.msra.mxu0 %v3431_v43 }
 0x225   : > { %v1488_v21 = vpop.f32.mrf.mxu0  ;;  %3177 = vmatprep.subr.bf16.mxu0 %v3433_v15 }
 0x226   : > { %v4111_v24 = vadd.f32 %v1488_v21, %v1440_v19  ;;  %v1513_v8 = vmul.f32 %v4119_v38, %v4119_v38 }
 0x227   : > { %v3234_v27 = vpop.f32.mrf.mxu0 }
 0x228   : > { %1503 = vadd.xlane.f32.xlu0 %v4111_v24  ;;  %v1511_v1 = vmul.f32 %v4111_v24, %v4111_v24  ;;  %v4124_v40 = vadd.f32 %v3234_v27, %v1451_v26  ;;  %v2887_v54 = vmul.f32 -1.442695, %v4111_v24 }
 0x229   : > { %v1491_v30 = vpop.f32.mrf.mxu0 }
 0x22a   : > { %v4114_v32 = vadd.f32 %v1491_v30, %v1443_v29  ;;  %v1514_v20 = vmul.f32 %v4124_v40, %v4124_v40 }
 0x22c   : > { %1505 = vadd.xlane.f32.xlu1 %v4114_v32  ;;  %1515 = vadd.xlane.f32.xlu0 %v1511_v1  ;;  %v1512_v39 = vmul.f32 %v4114_v32, %v4114_v32  ;;  %v2888_v61 = vmul.f32 -1.442695, %v4114_v32 }
 0x230   : > { %1517 = vadd.xlane.f32.xlu1 %v1512_v39  ;;  %1507 = vadd.xlane.f32.xlu0 %v4119_v38 }
 0x234   : > { %1509 = vadd.xlane.f32.xlu1 %v4124_v40  ;;  %1519 = vadd.xlane.f32.xlu0 %v1513_v8 }
 0x238   : > { %1521 = vadd.xlane.f32.xlu1 %v1514_v20 }
 0x2b1   : > { %v1504_v16 = vpop.xlane.xlu0 %1503 }
 0x2b2   : > { %v1523_v17 = vmul.f32 0.015625, %v1504_v16 }
 0x2b4   : > { %v1531_v21 = vmul.f32 %v1523_v17, %v1523_v17  ;;  %v1543_v47 = vsub.f32 %v4111_v24, %v1523_v17 }
 0x2b5   : > { %v1506_v18 = vpop.xlane.xlu1 %1505  ;;  %v1516_v19 = vpop.xlane.xlu0 %1515 }
 0x2b6   : > { %v1524_v22 = vmul.f32 0.015625, %v1506_v18  ;;  %v1527_v23 = vmul.f32 0.015625, %v1516_v19 }
 0x2b8   : > { %v1535_v3 = vsub.f32 %v1527_v23, %v1531_v21  ;;  %v1532_v59 = vmul.f32 %v1524_v22, %v1524_v22  ;;  %v1544_v51 = vsub.f32 %v4114_v32, %v1524_v22 }
 0x2b9   : > { %v1518_v25 = vpop.xlane.xlu1 %1517  ;;  %v1508_v27 = vpop.xlane.xlu0 %1507 }
 0x2ba   : > { %v1539_v28 = vmax.f32 %v1535_v3, 0.0  ;;  %v1528_v36 = vmul.f32 0.015625, %v1518_v25  ;;  %v1525_v29 = vmul.f32 0.015625, %v1508_v27 }
 0x2bc   : > { %v1547_v30 = vadd.f32 1e-05, %v1539_v28  ;;  %v1536_v0 = vsub.f32 %v1528_v36, %v1532_v59  ;;  %v1533_v31 = vmul.f32 %v1525_v29, %v1525_v29  ;;  %v1545_v60 = vsub.f32 %v4119_v38, %v1525_v29 }
 0x2bd   : > { %v1510_v1 = vpop.xlane.xlu1 %1509  ;;  %v1520_v34 = vpop.xlane.xlu0 %1519 }
 0x2be   : > { %3560 = vrsqrt.f32 %v1547_v30  ;;  %v1540_v35 = vmax.f32 %v1536_v0, 0.0  ;;  %v1526_v37 = vmul.f32 0.015625, %v1510_v1  ;;  %v1529_v4 = vmul.f32 0.015625, %v1520_v34 }
 0x2c0   : > { %v1548_v39 = vadd.f32 1e-05, %v1540_v35  ;;  %v1537_v26 = vsub.f32 %v1529_v4, %v1533_v31  ;;  %v1534_v20 = vmul.f32 %v1526_v37, %v1526_v37  ;;  %v1546_v62 = vsub.f32 %v4124_v40, %v1526_v37 }
 0x2c1   : > { %v1522_v8 = vpop.xlane.xlu1 %1521 }
 0x2c2   : > { %3562 = vrsqrt.f32 %v1548_v39  ;;  %v1541_v41 = vmax.f32 %v1537_v26, 0.0  ;;  %v1530_v33 = vmul.f32 0.015625, %v1522_v8 }
 0x2c4   : > { %v1549_v44 = vadd.f32 1e-05, %v1541_v41  ;;  %v1538_v5 = vsub.f32 %v1530_v33, %v1534_v20 }
 0x2c6   : > { %3564 = vrsqrt.f32 %v1549_v44  ;;  %v1542_v45 = vmax.f32 %v1538_v5, 0.0 }
 0x2c8   : > { %v1550_v46 = vadd.f32 1e-05, %v1542_v45 }
 0x2ca   : > { %3566 = vrsqrt.f32 %v1550_v46 }
 0x2cb   : > { %v3561_v48 = vpop.eup %3560  ;;  %3568 = vpow2.f32 %v2887_v54 }
 0x2cc   : > { %v1555_v50 = vmul.f32 %v3561_v48, %v1543_v47  ;;  %3570 = vpow2.f32 %v2888_v61 }
 0x2ce   : > { %v1566_v52 = vmul.f32 %v2853_v49, %v1555_v50 }
 0x2cf   : > { %v3563_v53 = vpop.eup %3562 }
 0x2d0   : > { %v1577_v55 = vadd.f32 %v2854_v13, %v1566_v52  ;;  %v1556_v56 = vmul.f32 %v3563_v53, %v1544_v51 }
 0x2d2   : > { %v4140_v57 = vmul.f32 1.75, %v1577_v55  ;;  %v1567_v58 = vmul.f32 %v2853_v49, %v1556_v56 }
 0x2d3   : > { %v3565_v42 = vpop.eup %3564 }
 0x2d4   : > { %v1578_v63 = vadd.f32 %v2854_v13, %v1567_v58  ;;  %v1557_v2 = vmul.f32 %v3565_v42, %v1545_v60  ;;  %v2859_v6 = vadd.f32 2.5, %v4140_v57  ;;  %v2867_v7 = vadd.f32 0.49999982, %v4140_v57 }
 0x2d5   : > { %v2855_v9 = vadd.f32 3.5, %v4140_v57  ;;  %v2863_v10 = vadd.f32 1.5, %v4140_v57  ;;  %v2875_v11 = vadd.f32 -1.5000001, %v4140_v57  ;;  %v2883_v12 = vadd.f32 -3.5, %v4140_v57 }
 0x2d6   : > { %v4151_v43 = vmul.f32 1.75, %v1578_v63  ;;  %v1568_v14 = vmul.f32 %v2853_v49, %v1557_v2  ;;  %v1609_v15 = vmul.f32 %v2859_v6, %v2859_v6  ;;  %v1649_v16 = vmul.f32 %v2867_v7, %v2867_v7 }
 0x2d7   : > { %v3567_v17 = vpop.eup %3566  ;;  %v1589_v18 = vmul.f32 %v2855_v9, %v2855_v9  ;;  %v1629_v19 = vmul.f32 %v2863_v10, %v2863_v10  ;;  %v4153_v21 = vmul.f32 %v2875_v11, %v2875_v11  ;;  %v4158_v31 = vmul.f32 %v2883_v12, %v2883_v12 }
 0x2d8   : > { %v1579_v22 = vadd.f32 %v2854_v13, %v1568_v14  ;;  %v1558_v23 = vmul.f32 %v3567_v17, %v1546_v62  ;;  %v2860_v3 = vadd.f32 2.5, %v4151_v43  ;;  %v1613_v25 = vsub.f32 0.0, %v1609_v15 }
 0x2d9   : > { %v2868_v27 = vadd.f32 0.49999982, %v4151_v43  ;;  %v1653_v59 = vsub.f32 0.0, %v1649_v16  ;;  %v2856_v28 = vadd.f32 3.5, %v4151_v43  ;;  %v1593_v36 = vsub.f32 0.0, %v1589_v18 }
 0x2da   : > { %v1569_v29 = vmul.f32 %v2853_v49, %v1558_v23  ;;  %v1610_v30 = vmul.f32 %v2860_v3, %v2860_v3  ;;  %v1617_v0 = vmul.f32 1.442695, %v1613_v25  ;;  %v4160_v4 = vmul.f32 1.75, %v1579_v22  ;;  %v4165_v49 = vpop.eup %3568 }
 0x2db   : > { %v1650_v1 = vmul.f32 %v2868_v27, %v2868_v27  ;;  %v1657_v34 = vmul.f32 1.442695, %v1653_v59  ;;  %v1590_v35 = vmul.f32 %v2856_v28, %v2856_v28  ;;  %v1597_v37 = vmul.f32 1.442695, %v1593_v36  ;;  %v4173_v62 = vpop.eup %3570 }
 0x2dc   : > { %v1580_v39 = vadd.f32 %v2854_v13, %v1569_v29  ;;  %v1614_v26 = vsub.f32 0.0, %v1610_v30  ;;  %v2864_v8 = vadd.f32 1.5, %v4151_v43  ;;  %3572 = vpow2.f32 %v1617_v0 }
 0x2dd   : > { %v1654_v20 = vsub.f32 0.0, %v1650_v1  ;;  %v1594_v41 = vsub.f32 0.0, %v1590_v35  ;;  %v1633_v33 = vsub.f32 0.0, %v1629_v19  ;;  %3574 = vpow2.f32 %v1657_v34 }
 0x2de   : > { %v4163_v44 = vmul.f32 1.75, %v1580_v39  ;;  %v1619_v5 = vmul.f32 1.442695, %v1614_v26  ;;  %v1630_v45 = vmul.f32 %v2864_v8, %v2864_v8  ;;  %3576 = vpow2.f32 %v1597_v37 }
 0x2df   : > { %v1659_v46 = vmul.f32 1.442695, %v1654_v20  ;;  %v1599_v47 = vmul.f32 1.442695, %v1594_v41  ;;  %v1637_v48 = vmul.f32 1.442695, %v1633_v33 }
 0x2e0   : > { %3578 = vpow2.f32 %v1619_v5  ;;  %v1634_v50 = vsub.f32 0.0, %v1630_v45  ;;  %v2861_v13 = vadd.f32 2.5, %v4160_v4  ;;  %v2862_v51 = vadd.f32 2.5, %v4163_v44 }
 0x2e1   : > { %3580 = vpow2.f32 %v1659_v46  ;;  %v2869_v52 = vadd.f32 0.49999982, %v4160_v4  ;;  %v2870_v53 = vadd.f32 0.49999982, %v4163_v44  ;;  %v2857_v54 = vadd.f32 3.5, %v4160_v4 }
 0x2e2   : > { %3582 = vpow2.f32 %v1599_v47  ;;  %v1639_v55 = vmul.f32 1.442695, %v1634_v50  ;;  %v1611_v56 = vmul.f32 %v2861_v13, %v2861_v13  ;;  %v1612_v58 = vmul.f32 %v2862_v51, %v2862_v51  ;;  %v3434_v13 = vld [vmem:[#allocation7 + $0x138] sm:$0xff]  }
 0x2e3   : > { %3584 = vpow2.f32 %v1637_v48  ;;  %v1651_v60 = vmul.f32 %v2869_v52, %v2869_v52  ;;  %v1652_v42 = vmul.f32 %v2870_v53, %v2870_v53  ;;  %v2858_v61 = vadd.f32 3.5, %v4163_v44  ;;  %v3436_v53 = vld [vmem:[#allocation7 + $0x170] sm:$0xff]  }
 0x2e4   : > { %3586 = vpow2.f32 %v1639_v55  ;;  %v1615_v63 = vsub.f32 0.0, %v1611_v56  ;;  %v1616_v2 = vsub.f32 0.0, %v1612_v58  ;;  %v1591_v6 = vmul.f32 %v2857_v54, %v2857_v54  ;;  %v3435_v56 = vld [vmem:[#allocation7 + $0x1b8] sm:$0xff]  }
 0x2e5   : > { %v1655_v7 = vsub.f32 0.0, %v1651_v60  ;;  %v1656_v9 = vsub.f32 0.0, %v1652_v42  ;;  %v1592_v10 = vmul.f32 %v2858_v61, %v2858_v61  ;;  %v2865_v11 = vadd.f32 1.5, %v4160_v4  ;;  %v3437_v42 = vld [vmem:[#allocation7 + $0x1f0] sm:$0xff]  }
 0x2e6   : > { %v1621_v12 = vmul.f32 1.442695, %v1615_v63  ;;  %v1623_v14 = vmul.f32 1.442695, %v1616_v2  ;;  %v1595_v15 = vsub.f32 0.0, %v1591_v6  ;;  %v2866_v16 = vadd.f32 1.5, %v4163_v44 }
 0x2e7   : > { %v1661_v17 = vmul.f32 1.442695, %v1655_v7  ;;  %v1663_v18 = vmul.f32 1.442695, %v1656_v9  ;;  %v1596_v19 = vsub.f32 0.0, %v1592_v10  ;;  %v1631_v22 = vmul.f32 %v2865_v11, %v2865_v11  ;;  %v3438_v2 = vld [vmem:[#allocation7 + $0x130] sm:$0xff]  }
 0x2e8   : > { %3588 = vpow2.f32 %v1621_v12  ;;  %v1601_v23 = vmul.f32 1.442695, %v1595_v15  ;;  %v1632_v3 = vmul.f32 %v2866_v16, %v2866_v16  ;;  %v2876_v25 = vadd.f32 -1.5000001, %v4151_v43  ;;  %v3440_v10 = vld [vmem:[#allocation7 + $0x168] sm:$0xff]  }
 0x2e9   : > { %3590 = vpow2.f32 %v1623_v14  ;;  %v1603_v27 = vmul.f32 1.442695, %v1596_v19  ;;  %v1635_v59 = vsub.f32 0.0, %v1631_v22  ;;  %v1693_v28 = vsub.f32 0.0, %v4153_v21  ;;  %v3573_v36 = vpop.eup %3572  ;;  %v3439_v14 = vld [vmem:[#allocation7 + $0x1b0] sm:$0xff]  }
 0x2ea   : > { %3592 = vpow2.f32 %v1661_v17  ;;  %v1636_v29 = vsub.f32 0.0, %v1632_v3  ;;  %v1690_v30 = vmul.f32 %v2876_v25, %v2876_v25  ;;  %v2884_v0 = vadd.f32 -3.5, %v4151_v43  ;;  %v3575_v1 = vpop.eup %3574 }
 0x2eb   : > { %3594 = vpow2.f32 %v1663_v18  ;;  %v1641_v34 = vmul.f32 1.442695, %v1635_v59  ;;  %v1697_v35 = vmul.f32 1.442695, %v1693_v28  ;;  %v1733_v37 = vsub.f32 0.0, %v4158_v31  ;;  %v3577_v39 = vpop.eup %3576 }
 0x2ec   : > { %3596 = vpow2.f32 %v1601_v23  ;;  %v1643_v26 = vmul.f32 1.442695, %v1636_v29  ;;  %v1694_v8 = vsub.f32 0.0, %v1690_v30  ;;  %v1730_v20 = vmul.f32 %v2884_v0, %v2884_v0  ;;  %v3444_v30 = vld [vmem:[#allocation7 + $0x160] sm:$0xff]  }
 0x2ed   : > { %v3579_v41 = vpop.eup %3578  ;;  %3598 = vpow2.f32 %v1603_v27  ;;  %v1737_v21 = vmul.f32 1.442695, %v1733_v37  ;;  %v2871_v33 = vadd.f32 -0.5000002, %v4140_v57  ;;  %v2872_v31 = vadd.f32 -0.5000002, %v4151_v43 }
 0x2ee   : > { %v3581_v5 = vpop.eup %3580  ;;  %v1774_v45 = vpack.c.bf16 %v3579_v41, %v3573_v36  ;;  %3600 = vpow2.f32 %v1641_v34  ;;  %v1699_v46 = vmul.f32 1.442695, %v1694_v8  ;;  %v1734_v47 = vsub.f32 0.0, %v1730_v20  ;;  %v3442_v27 = vld [vmem:[#allocation7 + $0x128] sm:$0xff]   ;;  %v3445_v20 = vld [vmem:[#allocation7 + $0x1e0] sm:$0xff]  }
 0x2ef   : > { %v3583_v48 = vpop.eup %3582  ;;  %v1776_v50 = vpack.c.bf16 %v3581_v5, %v3575_v1  ;;  %3602 = vpow2.f32 %v1643_v26  ;;  %v2880_v58 = vadd.f32 -2.5000005, %v4151_v43  ;;  %v1669_v61 = vmul.f32 %v2871_v33, %v2871_v33 }
 0x2f0   : > { %v3585_v51 = vpop.eup %3584  ;;  %2406 = vmatprep.mubr.bf16.mxu1 %v1774_v45  ;;  %v1773_v52 = vpack.c.bf16 %v3583_v48, %v3577_v39  ;;  %3604 = vpow2.f32 %v1697_v35  ;;  %v1739_v54 = vmul.f32 1.442695, %v1734_v47  ;;  %v2877_v63 = vadd.f32 -1.5000001, %v4160_v4  ;;  %v3443_v35 = vld [vmem:[#allocation7 + $0x1a8] sm:$0xff]   ;;  %v3446_v45 = vld [vmem:[#allocation7 + $0x120] sm:$0xff]  }
 0x2f1   : > { %v3587_v55 = vpop.eup %3586  ;;  %2455 = vmatprep.mubr.bf16.mxu0 %v1776_v50  ;;  %3606 = vpow2.f32 %v1699_v46  ;;  %v1670_v6 = vmul.f32 %v2872_v31, %v2872_v31  ;;  %v2879_v7 = vadd.f32 -2.5000005, %v4140_v57  ;;  %v2889_v9 = vmul.f32 -1.442695, %v4119_v38  ;;  %v3441_v57 = vld [vmem:[#allocation7 + $0x1e8] sm:$0xff]   ;;  %v3448_v46 = vld [vmem:[#allocation7 + $0x158] sm:$0xff]  }
 0x2f2   : > { %2407 = vmatmul.mubr.bf16.vlgmr.msra.gmra.mxu1 %v1773_v52  ;;  %v1775_v60 = vpack.c.bf16 %v3587_v55, %v3585_v51  ;;  %3608 = vpow2.f32 %v1737_v21  ;;  %v1710_v11 = vmul.f32 %v2880_v58, %v2880_v58  ;;  %v2878_v43 = vadd.f32 -1.5000001, %v4163_v44 }
 0x2f3   : > { %3150 = vmatpush3.bf16.msra.mxu1 %v3434_v13  ;;  %3610 = vpow2.f32 %v1739_v54  ;;  %v2885_v15 = vadd.f32 -3.5, %v4160_v4  ;;  %v2886_v16 = vadd.f32 -3.5, %v4163_v44  ;;  %v1758_v18 = vadd.f32 1.0, %v4173_v62 }
 0x2f4   : > { %2456 = vmatmul.mubr.bf16.vlgmr.msra.gmra.mxu0 %v1775_v60  ;;  %3151 = vmatprep.subr.bf16.mxu1 %v3436_v53  ;;  %v1673_v19 = vsub.f32 0.0, %v1669_v61  ;;  %v1691_v22 = vmul.f32 %v2877_v63, %v2877_v63  ;;  %v1692_v23 = vmul.f32 %v2878_v43, %v2878_v43  ;;  %v1674_v59 = vsub.f32 0.0, %v1670_v6  ;;  %v3449_v63 = vld [vmem:[#allocation7 + $0x1d8] sm:$0xff]  }
 0x2f5   : > { %v3589_v12 = vpop.eup %3588  ;;  %3178 = vmatpush3.bf16.msra.mxu0 %v3435_v56  ;;  %v1709_v28 = vmul.f32 %v2879_v7, %v2879_v7  ;;  %v1732_v36 = vmul.f32 %v2886_v16, %v2886_v16  ;;  %3612 = vpow2.f32 %v2889_v9  ;;  %v1714_v0 = vsub.f32 0.0, %v1710_v11  ;;  %v3447_v56 = vld [vmem:[#allocation7 + $0x1a0] sm:$0xff]   ;;  %v3452_v11 = vld [vmem:[#allocation7 + $0x150] sm:$0xff]   ;;  %v3451_v16 = vld [vmem:[#allocation7 + $0x198] sm:$0xff]  }
 0x2f6   : > { %v3591_v17 = vpop.eup %3590  ;;  %3179 = vmatprep.subr.bf16.mxu0 %v3437_v42  ;;  %v2874_v1 = vadd.f32 -0.5000002, %v4163_v44  ;;  %v1696_v37 = vsub.f32 0.0, %v1692_v23  ;;  %v1731_v39 = vmul.f32 %v2885_v15, %v2885_v15  ;;  %v2873_v26 = vadd.f32 -0.5000002, %v4160_v4 }
 0x2f7   : > { %v3593_v3 = vpop.eup %3592  ;;  %3152 = vmatpush3.bf16.msra.mxu1 %v3438_v2  ;;  %v1783_v25 = vpack.c.bf16 %v3591_v17, %v3589_v12  ;;  %3614 = vrcp.f32 %v1758_v18  ;;  %v1677_v41 = vmul.f32 1.442695, %v1673_v19  ;;  %v1695_v21 = vsub.f32 0.0, %v1691_v22  ;;  %v3453_v19 = vld [vmem:[#allocation7 + $0x1d0] sm:$0xff]  }
 0x2f8   : > { %v3595_v29 = vpop.eup %3594  ;;  %3153 = vmatprep.subr.bf16.mxu1 %v3440_v10  ;;  %v1679_v47 = vmul.f32 1.442695, %v1674_v59  ;;  %v1713_v48 = vsub.f32 0.0, %v1709_v28  ;;  %v1736_v50 = vsub.f32 0.0, %v1732_v36  ;;  %v1719_v31 = vmul.f32 1.442695, %v1714_v0 }
 0x2f9   : > { %v3597_v62 = vpop.eup %3596  ;;  %3180 = vmatpush3.bf16.msra.mxu0 %v3439_v14  ;;  %2414 = vmatprep.mubr.bf16.mxu1 %v1783_v25  ;;  %v1785_v34 = vpack.c.bf16 %v3595_v29, %v3593_v3  ;;  %v1672_v51 = vmul.f32 %v2874_v1, %v2874_v1  ;;  %v2881_v52 = vadd.f32 -2.5000005, %v4160_v4  ;;  %v2882_v53 = vadd.f32 -2.5000005, %v4163_v44  ;;  %v3450_v4 = vld [vmem:[#allocation7 + $0x118] sm:$0xff]   ;;  %v3454_v3 = vld [vmem:[#allocation7 + $0x110] sm:$0xff]  }
 0x2fa   : > { %v3599_v8 = vpop.eup %3598  ;;  %3181 = vmatprep.subr.bf16.mxu0 %v3441_v57  ;;  %v1703_v58 = vmul.f32 1.442695, %v1696_v37  ;;  %v1735_v60 = vsub.f32 0.0, %v1731_v39  ;;  %v1671_v42 = vmul.f32 %v2873_v26, %v2873_v26  ;;  %3616 = vpow2.f32 %v1677_v41  ;;  %v3456_v25 = vld [vmem:[#allocation7 + $0x148] sm:$0xff]   ;;  %v3455_v36 = vld [vmem:[#allocation7 + $0x190] sm:$0xff]   ;;  %v3461_v37 = vld [vmem:[#allocation7 + $0x1c0] sm:$0xff]  }
 0x2fb   : > { %v3601_v33 = vpop.eup %3600  ;;  %2463 = vmatprep.mubr.bf16.mxu0 %v1785_v34  ;;  %v1782_v5 = vpack.c.bf16 %v3599_v8, %v3597_v62  ;;  %3154 = vmatpush3.bf16.msra.mxu1 %v3442_v27  ;;  %v1701_v2 = vmul.f32 1.442695, %v1695_v21  ;;  %v1712_v6 = vmul.f32 %v2882_v53, %v2882_v53  ;;  %3618 = vpow2.f32 %v1679_v47  ;;  %v3458_v1 = vld [vmem:[#allocation7 + $0x108] sm:$0xff]   ;;  %v3460_v62 = vld [vmem:[#allocation7 + $0x140] sm:$0xff]   ;;  %v3465_v47 = vld [vmem:[#allocation7 + $0x230] sm:$0xff]  }
 0x2fc   : > { %v3603_v13 = vpop.eup %3602  ;;  %3155 = vmatprep.subr.bf16.mxu1 %v3444_v30  ;;  %v1743_v44 = vmul.f32 1.442695, %v1736_v50  ;;  %v1717_v43 = vmul.f32 1.442695, %v1713_v48  ;;  %3620 = vpow2.f32 %v1719_v31  ;;  %v1676_v12 = vsub.f32 0.0, %v1672_v51  ;;  %v3457_v30 = vld [vmem:[#allocation7 + $0x1c8] sm:$0xff]  }
 0x2fd   : > { %v3605_v54 = vpop.eup %3604  ;;  %2415 = vmatmul.mubr.bf16.gmra.mxu1 %v1782_v5  ;;  %v1784_v55 = vpack.c.bf16 %v3603_v13, %v3601_v33  ;;  %3182 = vmatpush3.bf16.msra.mxu0 %v3443_v35  ;;  %v1711_v14 = vmul.f32 %v2881_v52, %v2881_v52  ;;  %3622 = vpow2.f32 %v1703_v58  ;;  %v1741_v17 = vmul.f32 1.442695, %v1735_v60  ;;  %v3459_v35 = vld [vmem:[#allocation7 + $0x188] sm:$0xff]   ;;  %v3462_v26 = vld [vmem:[#allocation7 + $0x100] sm:$0xff]  }
 0x2fe   : > { %v3607_v61 = vpop.eup %3606  ;;  %3183 = vmatprep.subr.bf16.mxu0 %v3445_v20  ;;  %v1675_v18 = vsub.f32 0.0, %v1671_v42  ;;  %v2890_v57 = vmul.f32 -1.442695, %v4124_v40  ;;  %3624 = vpow2.f32 %v1701_v2  ;;  %v1716_v22 = vsub.f32 0.0, %v1712_v6  ;;  %v3464_v20 = vld [vmem:[#allocation7 + $0x238] sm:$0xff]   ;;  %v3463_v21 = vld [vmem:[#allocation7 + $0x180] sm:$0xff]  }
 0x2ff   : > { %v3609_v7 = vpop.eup %3608  ;;  %2464 = vmatmul.mubr.bf16.gmra.mxu0 %v1784_v55  ;;  %v1778_v9 = vpack.c.bf16 %v3607_v61, %v3605_v54  ;;  %3156 = vmatpush3.bf16.msra.mxu1 %v3446_v45  ;;  %v1757_v23 = vadd.f32 1.0, %v4165_v49  ;;  %3626 = vpow2.f32 %v1743_v44  ;;  %v1683_v27 = vmul.f32 1.442695, %v1676_v12  ;;  %v3466_v54 = vld [vmem:[#allocation7 + $0x228] sm:$0xff]   ;;  %v3467_v2 = vld [vmem:[#allocation7 + $0x220] sm:$0xff]  }
 0x300   : > { %v3611_v10 = vpop.eup %3610  ;;  %3157 = vmatprep.subr.bf16.mxu1 %v3448_v46  ;;  %3628 = vpow2.f32 %v1717_v43  ;;  %v1715_v59 = vsub.f32 0.0, %v1711_v14  ;;  %v1681_v29 = vmul.f32 1.442695, %v1675_v18  ;;  %v1723_v0 = vmul.f32 1.442695, %v1716_v22  ;;  %v3470_v44 = vld [vmem:[#allocation7 + $0x208] sm:$0xff]  }
 0x301   : > { %2504 = vmatprep.mubr.bf16.mxu1 %v1778_v9  ;;  %v1780_v15 = vpack.c.bf16 %v3611_v10, %v3609_v7  ;;  %3184 = vmatpush3.bf16.msra.mxu0 %v3447_v56  ;;  %3630 = vpow2.f32 %v1741_v17  ;;  %v3471_v10 = vld [vmem:[#allocation7 + $0x200] sm:$0xff]  }
 0x302   : > { %3185 = vmatprep.subr.bf16.mxu0 %v3449_v63  ;;  %v4197_v28 = vpop.eup %3612  ;;  %3632 = vpow2.f32 %v2890_v57  ;;  %v1721_v34 = vmul.f32 1.442695, %v1715_v59 }
 0x303   : > { %2553 = vmatprep.mubr.bf16.mxu0 %v1780_v15  ;;  %3158 = vmatpush3.bf16.msra.mxu1 %v3450_v4  ;;  %3634 = vrcp.f32 %v1757_v23  ;;  %v1759_v9 = vadd.f32 1.0, %v4197_v28 }
 0x304   : > { %3159 = vmatprep.subr.bf16.mxu1 %v3452_v11  ;;  %v3615_v49 = vpop.eup %3614  ;;  %3636 = vpow2.f32 %v1683_v27 }
 0x305   : > { %3186 = vmatpush3.bf16.msra.mxu0 %v3451_v16  ;;  %3638 = vpow2.f32 %v1681_v29  ;;  %v1770_v56 = vmul.f32 %v3615_v49, %v4114_v32  ;;  %v3468_v32 = vld [vmem:[#allocation7 + $0x218] sm:$0xff]  }
 0x306   : > { %3187 = vmatprep.subr.bf16.mxu0 %v3453_v19  ;;  %3640 = vpow2.f32 %v1723_v0 }
 0x307   : > { %3160 = vmatpush3.bf16.msra.mxu1 %v3454_v3  ;;  %v3617_v39 = vpop.eup %3616  ;;  %3642 = vpow2.f32 %v1721_v34 }
 0x308   : > { %3161 = vmatprep.subr.bf16.mxu1 %v3456_v25  ;;  %v3619_v8 = vpop.eup %3618 }
 0x309   : > { %3188 = vmatpush3.bf16.msra.mxu0 %v3455_v36  ;;  %v3621_v41 = vpop.eup %3620  ;;  %v1777_v46 = vpack.c.bf16 %v3619_v8, %v3617_v39 }
 0x30a   : > { %3189 = vmatprep.subr.bf16.mxu0 %v3457_v30  ;;  %v3623_v33 = vpop.eup %3622 }
 0x30b   : > { %3162 = vmatpush3.bf16.msra.mxu1 %v3458_v1  ;;  %v3625_v5 = vpop.eup %3624 }
 0x30c   : > { %3163 = vmatprep.subr.bf16.mxu1 %v3460_v62  ;;  %v3627_v45 = vpop.eup %3626  ;;  %v1787_v50 = vpack.c.bf16 %v3623_v33, %v3625_v5 }
 0x30d   : > { %3190 = vmatpush3.bf16.msra.mxu0 %v3459_v35  ;;  %v3629_v48 = vpop.eup %3628 }
 0x30e   : > { %3191 = vmatprep.subr.bf16.mxu0 %v3461_v37  ;;  %v3631_v13 = vpop.eup %3630  ;;  %v1779_v31 = vpack.c.bf16 %v3621_v41, %v3629_v48 }
 0x30f   : > { %3164 = vmatpush3.bf16.msra.mxu1 %v3462_v26  ;;  %v3633_v51 = vpop.eup %3632  ;;  %v1789_v52 = vpack.c.bf16 %v3627_v45, %v3631_v13 }
 0x310   : > { %3235 = vmatprep.subr.bf16.mxu1 %v3464_v20  ;;  %v3635_v53 = vpop.eup %3634  ;;  %v1760_v61 = vadd.f32 1.0, %v3633_v51 }
 0x311   : > { %3192 = vmatpush3.bf16.msra.mxu0 %v3463_v21  ;;  %v3637_v55 = vpop.eup %3636  ;;  %v1769_v42 = vmul.f32 %v3635_v53, %v4111_v24  ;;  %v3469_v24 = vld [vmem:[#allocation7 + $0x210] sm:$0xff]   ;;  %v2891_v21 = vld [vmem:[%s4266_s8] ss:$0 sm:$0xff] }
 0x312   : > { %2505 = vmatmul.mubr.bf16.vlgmr.msra.gmra.mxu1 %v1777_v46  ;;  %v3639_v58 = vpop.eup %3638  ;;  %3644 = vrcp.f32 %v1760_v61 }
 0x313   : > { %2512 = vmatprep.mubr.bf16.mxu1 %v1787_v50  ;;  %3236 = vmatpush3.bf16.msra.mxu1 %v3464_v20  ;;  %v3641_v60 = vpop.eup %3640  ;;  %v1786_v63 = vpack.c.bf16 %v3637_v55, %v3639_v58  ;;  %v1781_v7 = vpack.c.bf16 %v1770_v56, %v1769_v42  ;;  %3646 = vrcp.f32 %v1759_v9 }
 0x314   : > { %2554 = vmatmul.mubr.bf16.vlgmr.msra.gmra.mxu0 %v1779_v31  ;;  %3237 = vmatprep.subr.bf16.mxu1 %v3465_v47  ;;  %v3643_v6 = vpop.eup %3642 }
 0x315   : > { %2561 = vmatprep.mubr.bf16.mxu0 %v1789_v52  ;;  %v1788_v4 = vpack.c.bf16 %v3641_v60, %v3643_v6 }
 0x317   : > { %3238 = vmatpush3.bf16.msra.mxu1 %v3465_v47 }
 0x318   : > { %3239 = vmatprep.subr.bf16.mxu1 %v3466_v54 }
 0x31a   : > { %2513 = vmatmul.mubr.bf16.gmra.mxu1 %v1786_v63 }
 0x31b   : > { %3240 = vmatpush3.bf16.msra.mxu1 %v3466_v54  ;;  %3251 = vmatprep.mubr.bf16.mxu1 %v1781_v7 }
 0x31c   : > { %2562 = vmatmul.mubr.bf16.gmra.mxu0 %v1788_v4  ;;  %3241 = vmatprep.subr.bf16.mxu1 %v3467_v2 }
 0x31f   : > { %3242 = vmatpush3.bf16.msra.mxu1 %v3467_v2  ;;  %v3645_v11 = vpop.eup %3644 }
 0x320   : > { %3243 = vmatprep.subr.bf16.mxu1 %v3468_v32  ;;  %v3647_v43 = vpop.eup %3646  ;;  %v1772_v12 = vmul.f32 %v3645_v11, %v4124_v40 }
 0x321   : > { %v1771_v14 = vmul.f32 %v3647_v43, %v4119_v38 }
 0x323   : > { %3244 = vmatpush3.bf16.msra.mxu1 %v3468_v32  ;;  %v1790_v15 = vpack.c.bf16 %v1772_v12, %v1771_v14 }
 0x324   : > { %3245 = vmatprep.subr.bf16.mxu1 %v3469_v24 }
 0x327   : > { %3246 = vmatpush3.bf16.msra.mxu1 %v3469_v24 }
 0x328   : > { %3247 = vmatprep.subr.bf16.mxu1 %v3470_v44 }
 0x32b   : > { %3248 = vmatpush3.bf16.msra.mxu1 %v3470_v44 }
 0x32c   : > { %3249 = vmatprep.subr.bf16.mxu1 %v3471_v10 }
 0x32f   : > { %3250 = vmatpush3.bf16.msra.mxu1 %v3471_v10 }
 0x332   : > { %3252 = vmatmul.mubr.bf16.vlgmr.msra.gmra.mxu1 %v1790_v15 }
 0x3b2   : > { %v3109_v16 = vpop.f32.mrf.mxu1 }
 0x3b4   : > { %v3137_v17 = vpop.f32.mrf.mxu0  ;;  %v3110_v18 = vpop.f32.mrf.mxu1 }
 0x3b5   : > { %v3111_v20 = vadd.f32 %v3110_v18, %v3109_v16 }
 0x3b6   : > { %v3138_v57 = vpop.f32.mrf.mxu0  ;;  %v3112_v19 = vpop.f32.mrf.mxu1 }
 0x3b7   : > { %v2409_v46 = vadd.f32 %v3111_v20, %v2891_v21  ;;  %v3139_v31 = vadd.f32 %v3138_v57, %v3137_v17 }
 0x3b8   : > { %v3140_v22 = vpop.f32.mrf.mxu0  ;;  %v3113_v23 = vpop.f32.mrf.mxu1 }
 0x3b9   : > { %v3114_v48 = vadd.f32 %v3113_v23, %v3112_v19  ;;  %v2458_v55 = vadd.f32 %v3139_v31, %v2409_v46 }
 0x3ba   : > { %v3141_v3 = vpop.f32.mrf.mxu0 }
 0x3bb   : > { %v2412_v58 = vadd.f32 %v3114_v48, %v2891_v21  ;;  %v3142_v63 = vadd.f32 %v3141_v3, %v3140_v22 }
 0x3bd   : > { %v3115_v25 = vpop.f32.mrf.mxu1  ;;  %v2461_v32 = vadd.f32 %v3142_v63, %v2412_v58 }
 0x3bf   : > { %v3143_v27 = vpop.f32.mrf.mxu0  ;;  %v3116_v59 = vpop.f32.mrf.mxu1 }
 0x3c0   : > { %v3117_v8 = vadd.f32 %v3116_v59, %v3115_v25 }
 0x3c1   : > { %v3144_v28 = vpop.f32.mrf.mxu0  ;;  %v3118_v36 = vpop.f32.mrf.mxu1 }
 0x3c2   : > { %v2417_v5 = vadd.f32 %v3117_v8, %v2891_v21  ;;  %v3145_v50 = vadd.f32 %v3144_v28, %v3143_v27 }
 0x3c3   : > { %v3146_v40 = vpop.f32.mrf.mxu0  ;;  %v3119_v29 = vpop.f32.mrf.mxu1 }
 0x3c4   : > { %v3120_v45 = vadd.f32 %v3119_v29, %v3118_v36  ;;  %v2466_v52 = vadd.f32 %v3145_v50, %v2417_v5 }
 0x3c5   : > { %v3147_v30 = vpop.f32.mrf.mxu0 }
 0x3c6   : > { %v2420_v53 = vadd.f32 %v3120_v45, %v2891_v21  ;;  %v3148_v60 = vadd.f32 %v3147_v30, %v3146_v40 }
 0x3c8   : > { %v2469_v2 = vadd.f32 %v3148_v60, %v2420_v53 }
 0x3d2   : > { %v3165_v38 = vpop.f32.mrf.mxu1 }
 0x3d4   : > { %v3193_v0 = vpop.f32.mrf.mxu0  ;;  %v3166_v49 = vpop.f32.mrf.mxu1 }
 0x3d5   : > { %v3167_v54 = vadd.f32 %v3166_v49, %v3165_v38 }
 0x3d6   : > { %v3168_v1 = vpop.f32.mrf.mxu1  ;;  %v3194_v62 = vpop.f32.mrf.mxu0 }
 0x3d7   : > { %v2507_v6 = vadd.f32 %v3167_v54, %v2458_v55  ;;  %v3195_v24 = vadd.f32 %v3194_v62, %v3193_v0 }
 0x3d8   : > { %v3169_v34 = vpop.f32.mrf.mxu1  ;;  %v3196_v35 = vpop.f32.mrf.mxu0 }
 0x3d9   : > { %v3170_v7 = vadd.f32 %v3169_v34, %v3168_v1  ;;  %v2556_v15 = vadd.f32 %v3195_v24, %v2507_v6 }
 0x3da   : > { %v3171_v37 = vpop.f32.mrf.mxu1  ;;  %v3197_v39 = vpop.f32.mrf.mxu0 }
 0x3db   : > { %v2510_v43 = vadd.f32 %v3170_v7, %v2461_v32  ;;  %v3198_v17 = vadd.f32 %v3197_v39, %v3196_v35 }
 0x3dc   : > { %v3172_v26 = vpop.f32.mrf.mxu1  ;;  %v3199_v41 = vpop.f32.mrf.mxu0 }
 0x3dd   : > { %v3173_v13 = vadd.f32 %v3172_v26, %v3171_v37  ;;  %v2559_v23 = vadd.f32 %v3198_v17, %v2510_v43 }
 0x3de   : > { %v3174_v33 = vpop.f32.mrf.mxu1  ;;  %v3200_v47 = vpop.f32.mrf.mxu0 }
 0x3df   : > { %v2515_v42 = vadd.f32 %v3173_v13, %v2466_v52  ;;  %v3201_v9 = vadd.f32 %v3200_v47, %v3199_v41 }
 0x3e0   : > { %v3175_v51 = vpop.f32.mrf.mxu1  ;;  %v3202_v56 = vpop.f32.mrf.mxu0 }
 0x3e1   : > { %v3176_v61 = vadd.f32 %v3175_v51, %v3174_v33  ;;  %v2564_v10 = vadd.f32 %v3201_v9, %v2515_v42 }
 0x3e2   : > { %v3203_v4 = vpop.f32.mrf.mxu0 }
 0x3e3   : > { %v2518_v44 = vadd.f32 %v3176_v61, %v2469_v2  ;;  %v3204_v12 = vadd.f32 %v3203_v4, %v3202_v56 }
 0x3e5   : > { %v2567_v57 = vadd.f32 %v3204_v12, %v2518_v44 }
 0x3f2   : > { %v3253_v11 = vpop.f32.mrf.mxu1 }
 0x3f3   : > { %v2613_v14 = vadd.f32 %v3253_v11, %v2564_v10 }
 0x3f4   : > { %v2604_v16 = vpop.f32.mrf.mxu1 }
 0x3f5   : > { %2621 = vst [vmem:[%s379_s25 + $0x10] sm:$0xff] %v2613_v14  ;;  %v2605_v18 = vadd.f32 %v2604_v16, %v2556_v15 }
 0x3f6   : > { %v3254_v19 = vpop.f32.mrf.mxu1 }
 0x3f7   : > { %2619 = vst [vmem:[%s379_s25] sm:$0xff] %v2605_v18  ;;  %v2616_v22 = vadd.f32 %v3254_v19, %v2567_v57 }
 0x3f8   : > { %v2607_v3 = vpop.f32.mrf.mxu1 }
 0x3f9   : > { %2622 = vst [vmem:[%s379_s25 + $0x18] sm:$0xff] %v2616_v22  ;;  %v2608_v25 = vadd.f32 %v2607_v3, %v2559_v23 }
 0x3fb   : > { %2620 = vst [vmem:[%s379_s25 + $0x8] sm:$0xff] %v2608_v25 }
 0x3fc   : > { %3745 = shalt.err (!%p3742_p9)
}
 0x3fd   : > { %s3746_s22 = scalar_lea.hbm %s4215_s14, 512  ;;  %s3750_s27 = scalar_lea.hbm %s4267_s9, 1024 }
 0x3fe   : > { %p3747_p13 = scmp.ne.s32.totalorder %s4215_s14, %s3746_s22  ;;  %p3751_p4 = scmp.lt.s32.totalorder %s4215_s14, %s4267_s9 }
 0x3ff   : > { %p3752_p8 = scmp.lt.s32.totalorder %s3750_s27, %s3746_s22 }
 0x400   : > { %p3748_p5 = pnand %p3747_p13, %p4288_p10 }
 0x401   : > { %p3753_p3 = por %p3752_p8, %p3751_p4 }
 0x402   : > { %p3749_p0 = pneg %p3748_p5 }
 0x404   : > { %p3754_p11 = pnand %p3753_p3, %p3749_p0 }
 0x406   : > { %3757 = shalt.err (!%p3754_p11)
}
 0x407   : > { %s3810_s23 = smov 128   ;;  %s3811_s28 = smov 8  }
 0x408   : > { %3265 = dma.vmem_to_hbm [thread:$0]  (%p4288_p10), %s4210_s15, 512, %s4215_s14, %s2624_s20, %s3810_s23, %s3810_s23, %s3811_s28  }
 0x409 PF: > { %s2652_s13 = sand.u32 1, %s3788_s30   ;;  %p4289_p1 = scmp.ne.s32.totalorder %s4275_s16, 0 }
 0x40a   : > { %p4290_p2 = scmp.ge.s32.totalorder %s3800_s12, 2  ;;  %s2653_s19 = scalar_lea.sflag [#allocation4], %s2652_s13 }
 0x40c   : > { %p3279_p6 = pnand %p4290_p2, %p4289_p1 }
 0x40e   : > { %p3280_p12 = pneg %p3279_p6 }
 0x410   : > { %3783 = dma.done.wait (%p3280_p12), %s2653_s19, 512  }
 0x411   : > { %3785 = vsyncadd (%p3280_p12), %s2653_s19, 4294966784  ;;  %s4291_s29 = sld [smem:[#allocation12_spill]]  ;;  %p23_p7 = scmp.ge.s32.totalorder %s3934_s18, 4  }
 0x412   : > { %s4292_s30 = smov %s3792_s10  ;;  %s4293_s10 = smov %s3796_s11 }
 0x413   : > { %s4295_s12 = smov %s3934_s18  ;;  %25 = sbr.rel (!%p23_p7) target bundleno = 9 (0x9), region = 109 }
 0x417   : > { %s4294_s11 = smov %s4291_s29 }
 0x418   :  { %2658 = vsyncpa [#allocation3], 1 }
 0x419   :  { %2660 = vsyncpa [#allocation3 + $0x1], 1 }
 0x41a   :  { %2661 = vsyncpa [#allocation6], 1 }
 0x41b   :  { %2662 = vsyncpa [#allocation4], 1 }
 0x41c   :  { %2664 = vsyncpa [#allocation4 + $0x1], 1 }

</bundles_post_ra>
